<compile_context>
chip_gen: v6e
topology: v6e:2x2x1
jax: 0.10.0
libtpu: 0.0.40
codegen_flags: <defaults>
</compile_context>

<pallas_src>
import jax
import jax.numpy as jnp
from jax.experimental import pallas as pl
from jax.experimental.pallas import tpu as pltpu


def _head_kernel(x_ref, w1_ref, b1_ref, w2_ref, b2_ref, w3_ref, b3_ref,
                 o_ref, acc_ref, act_ref):
    """Fused pool + flatten + classifier.

    Grid = (batch_tiles, channel_tiles).  The channel axis doubles as the K
    (reduction) axis of the first Linear: each step pools a slab of `tk`
    channels, flattens it in torch NCHW order into `act_ref`, and accumulates
    its partial product with the matching (tk*49, hidden) rows of W1 streamed
    from HBM.  Layers 2/3 run once, on the last K step.
    """
    k = pl.program_id(1)

    @pl.when(k == 0)
    def _init():
        acc_ref[...] = jnp.zeros_like(acc_ref)

    # ---- MaxPool2d(kernel=2, stride=2) on the (bt, tk, H, W) slab ---------
    x = x_ref[...]                                        # (bt, tk, H, W) f32
    bt, tk, hh, ww = x.shape
    hp, wp = hh // 2, ww // 2
    mh = jnp.maximum(x[:, :, :, :-1], x[:, :, :, 1:])     # pair-max along W
    mv = jnp.maximum(mh[:, :, :-1, :], mh[:, :, 1:, :])   # pair-max along H
    # The 2x2 window max for output (i, j) sits at mv[..., 2i, 2j]; gather the
    # even rows / cols with static slices + concat (cheap, layout friendly).
    mv = jnp.concatenate([mv[:, :, :, 2 * j:2 * j + 1] for j in range(wp)],
                         axis=3)                          # (bt, tk, H-1, wp)
    mx = jnp.concatenate([mv[:, :, 2 * i:2 * i + 1, :] for i in range(hp)],
                         axis=2)                          # (bt, tk, hp, wp)

    # ---- AdaptiveAvgPool2d((7, 7)) -----------------------------------------
    if hp == 7 and wp == 7:
        pooled = mx                                       # identity (VGG case)
    else:
        # divisible bins only (asserted in the wrapper)
        kh, kw = hp // 7, wp // 7
        t = mx.reshape(bt, tk, 7, kh, 7, kw)
        pooled = jnp.mean(jnp.mean(t, axis=5), axis=3)    # (bt, tk, 7, 7)

    # ---- flatten in torch x.view(N, -1) order: col = c*49 + i*7 + j --------
    for c in range(tk):
        row = jnp.concatenate([pooled[:, c, i:i + 1, :] for i in range(7)],
                              axis=2)                     # (bt, 1, 49)
        act_ref[:, c * 49:(c + 1) * 49] = row[:, 0, :]

    # ---- Linear 1 (K-streamed): bf16 operands, f32 accumulation ------------
    act = act_ref[...].astype(jnp.bfloat16)               # (bt, tk*49)
    acc_ref[...] += jnp.dot(act, w1_ref[...],
                            preferred_element_type=jnp.float32)

    # ---- last K step: bias/ReLU, Linear 2, Linear 3 (Dropout = identity) ---
    @pl.when(k == pl.num_programs(1) - 1)
    def _finalize():
        h1 = jnp.maximum(acc_ref[...] + b1_ref[...], 0.0).astype(jnp.bfloat16)
        h2 = jnp.dot(h1, w2_ref[...], preferred_element_type=jnp.float32)
        h2 = jnp.maximum(h2 + b2_ref[...], 0.0).astype(jnp.bfloat16)
        out = jnp.dot(h2, w3_ref[...], preferred_element_type=jnp.float32)
        o_ref[...] = (out + b3_ref[...]).astype(o_ref.dtype)


def head_model(x_nchw, params, *, channel_tile=8, batch_tile=None):
    """x_nchw: (N, C, H, W) float32 — output of VGG features[:30]."""
    n, c, h, w = x_nchw.shape
    assert h % 2 == 0 and w % 2 == 0, "maxpool needs even spatial dims"
    hp, wp = h // 2, w // 2
    assert hp % 7 == 0 and wp % 7 == 0, (
        "only divisible AdaptiveAvgPool2d((7,7)) bins supported")
    # TODO(synk): PyTorch AdaptiveAvgPool2d with non-divisible (uneven) bins
    # is not implemented.

    w1, b1, w2, b2, w3, b3 = params
    in_features = c * 49
    hidden = w1.shape[1]
    classes = w3.shape[1]
    assert w1.shape[0] == in_features

    bt = n if batch_tile is None else batch_tile
    assert n % bt == 0 and (bt == n or bt % 8 == 0)
    tk = channel_tile
    if c % tk != 0 or (tk * 49) % 8 != 0:
        tk = c                                  # single K step fallback
    kt = c // tk

    return pl.pallas_call(
        _head_kernel,
        out_shape=jax.ShapeDtypeStruct((n, classes), jnp.float32),
        grid=(n // bt, kt),
        in_specs=[
            # feature map: NCHW block with full spatial extent as trailing dims
            pl.BlockSpec((bt, tk, h, w), lambda b, k: (b, k, 0, 0)),
            # W1 streamed along K in (tk*49, hidden) slabs
            pl.BlockSpec((tk * 49, hidden), lambda b, k: (k, 0)),
            pl.BlockSpec((1, hidden), lambda b, k: (0, 0)),
            # W2 / W3 / biases: constant block index -> DMA'd once, resident
            pl.BlockSpec((hidden, hidden), lambda b, k: (0, 0)),
            pl.BlockSpec((1, hidden), lambda b, k: (0, 0)),
            pl.BlockSpec((hidden, classes), lambda b, k: (0, 0)),
            pl.BlockSpec((1, classes), lambda b, k: (0, 0)),
        ],
        out_specs=pl.BlockSpec((bt, classes), lambda b, k: (b, 0)),
        scratch_shapes=[
            pltpu.VMEM((bt, hidden), jnp.float32),    # layer-1 f32 accumulator
            pltpu.VMEM((bt, tk * 49), jnp.float32),   # flattened pooled slab
        ],
        compiler_params=pltpu.CompilerParams(
            dimension_semantics=("parallel", "arbitrary"),
            vmem_limit_bytes=64 * 1024 * 1024,
        ),
    )(x_nchw, w1, b1, w2, b2, w3, b3)


def head_model_ref(x_nchw, params):
    """Pure-JAX reference (f32 math, bf16 weights upcast) for verification."""
    n, c, h, w = x_nchw.shape
    mx = x_nchw.reshape(n, c, h // 2, 2, w // 2, 2).max(axis=(3, 5))
    hp, wp = mx.shape[2], mx.shape[3]
    avg = mx.reshape(n, c, 7, hp // 7, 7, wp // 7).mean(axis=(3, 5))
    flat = avg.reshape(n, -1)
    w1, b1, w2, b2, w3, b3 = params
    f32 = lambda a: a.astype(jnp.float32)
    h1 = jnp.maximum(flat @ f32(w1) + b1, 0.0)
    h2 = jnp.maximum(h1 @ f32(w2) + b2, 0.0)
    return h2 @ f32(w3) + b3


def make_params(key, in_features, hidden, num_classes):
    """Synthetic classifier weights, stored (in, out) in bf16 (x @ W layout)."""
    k1, k2, k3 = jax.random.split(key, 3)
    s = 0.02
    w1 = (s * jax.random.normal(k1, (in_features, hidden), jnp.float32)
          ).astype(jnp.bfloat16)
    b1 = jnp.full((1, hidden), 0.01, jnp.float32)
    w2 = (s * jax.random.normal(k2, (hidden, hidden), jnp.float32)
          ).astype(jnp.bfloat16)
    b2 = jnp.full((1, hidden), -0.01, jnp.float32)
    w3 = (s * jax.random.normal(k3, (hidden, num_classes), jnp.float32)
          ).astype(jnp.bfloat16)
    b3 = jnp.zeros((1, num_classes), jnp.float32)
    return (w1, b1, w2, b2, w3, b3)


if __name__ == "__main__":
    # Small shapes consistent with the VGG head: features output (N, C, 14, 14)
    # -> maxpool -> (N, C, 7, 7) -> adaptive avgpool (7,7) -> flatten (N, C*49).
    N, C, H, W = 2, 32, 14, 14
    HIDDEN, CLASSES = 256, 128

    key = jax.random.PRNGKey(0)
    kx, kp = jax.random.split(key)
    x = jax.random.normal(kx, (N, C, H, W), jnp.float32)
    params = make_params(kp, C * 49, HIDDEN, CLASSES)

    out = jax.block_until_ready(jax.jit(head_model)(x, params))
    ref = jax.block_until_ready(head_model_ref(x, params))

    assert out.shape == (N, CLASSES), out.shape
    err = jnp.max(jnp.abs(out - ref))
    assert jnp.allclose(out, ref, rtol=2e-2, atol=2e-2), f"max abs diff {err}"
    print("KERNEL_OK")
</pallas_src>

<mosaic_0001>
module attributes {stable_mosaic.version = 11 : i64} {
  func.func @_head_kernel(%arg0: i32, %arg1: i32, %arg2: memref<2x8x14x14xf32, #tpu.memory_space<vmem>>, %arg3: memref<392x256xbf16, #tpu.memory_space<vmem>>, %arg4: memref<1x256xf32, #tpu.memory_space<vmem>>, %arg5: memref<256x256xbf16, #tpu.memory_space<vmem>>, %arg6: memref<1x256xf32, #tpu.memory_space<vmem>>, %arg7: memref<256x128xbf16, #tpu.memory_space<vmem>>, %arg8: memref<1x128xf32, #tpu.memory_space<vmem>>, %arg9: memref<2x128xf32, #tpu.memory_space<vmem>>, %arg10: memref<2x256xf32, #tpu.memory_space<vmem>>, %arg11: memref<2x392xf32, #tpu.memory_space<vmem>>) attributes {dimension_semantics = [#tpu.dimension_semantics<parallel>, #tpu.dimension_semantics<arbitrary>], iteration_bounds = array<i64: 1, 4>, scalar_prefetch = 0 : i64, scratch_operands = 2 : i64, tpu.core_type = #tpu.core_type<tc>, window_params = [{transform_indices = @transform_0, window_bounds = array<i64: 2, 8, 14, 14>}, {transform_indices = @transform_1, window_bounds = array<i64: 392, 256>}, {pipeline_mode = #tpu.pipeline_mode<synchronous>, transform_indices = @transform_2, window_bounds = array<i64: 1, 256>}, {pipeline_mode = #tpu.pipeline_mode<synchronous>, transform_indices = @transform_3, window_bounds = array<i64: 256, 256>}, {pipeline_mode = #tpu.pipeline_mode<synchronous>, transform_indices = @transform_4, window_bounds = array<i64: 1, 256>}, {pipeline_mode = #tpu.pipeline_mode<synchronous>, transform_indices = @transform_5, window_bounds = array<i64: 256, 128>}, {pipeline_mode = #tpu.pipeline_mode<synchronous>, transform_indices = @transform_6, window_bounds = array<i64: 1, 128>}, {transform_indices = @transform_7, window_bounds = array<i64: 2, 128>}]} {
    %c0_i32 = arith.constant 0 : i32
    %0 = arith.cmpi eq, %arg1, %c0_i32 : i32
    %1 = arith.extui %0 : i1 to i32
    %c0_i32_0 = arith.constant 0 : i32
    %2 = arith.cmpi ne, %1, %c0_i32_0 : i32
    scf.if %2 {
      %cst_22 = arith.constant 0.000000e+00 : f32
      %172 = vector.broadcast %cst_22 : f32 to vector<2x256xf32>
      %c0_23 = arith.constant 0 : index
      %c0_24 = arith.constant 0 : index
      %173 = vector.load %arg10[%c0_23, %c0_24] : memref<2x256xf32, #tpu.memory_space<vmem>>, vector<2x256xf32>
      tpu.vector_store %arg10[%c0_23, %c0_24], %172 {strides = array<i32>} : memref<2x256xf32, #tpu.memory_space<vmem>>, vector<2x256xf32>,
    } else {
    }
    %c0 = arith.constant 0 : index
    %c0_1 = arith.constant 0 : index
    %c0_2 = arith.constant 0 : index
    %c0_3 = arith.constant 0 : index
    %3 = vector.load %arg2[%c0, %c0_1, %c0_2, %c0_3] : memref<2x8x14x14xf32, #tpu.memory_space<vmem>>, vector<2x8x14x14xf32>
    %4 = vector.extract_strided_slice %3 {offsets = [0, 0, 0, 0], sizes = [2, 8, 14, 13], strides = [1, 1, 1, 1]} : vector<2x8x14x14xf32> to vector<2x8x14x13xf32>
    %5 = vector.extract_strided_slice %3 {offsets = [0, 0, 0, 1], sizes = [2, 8, 14, 13], strides = [1, 1, 1, 1]} : vector<2x8x14x14xf32> to vector<2x8x14x13xf32>
    %6 = arith.maximumf %4, %5 : vector<2x8x14x13xf32>
    %7 = vector.extract_strided_slice %6 {offsets = [0, 0, 0, 0], sizes = [2, 8, 13, 13], strides = [1, 1, 1, 1]} : vector<2x8x14x13xf32> to vector<2x8x13x13xf32>
    %8 = vector.extract_strided_slice %6 {offsets = [0, 0, 1, 0], sizes = [2, 8, 13, 13], strides = [1, 1, 1, 1]} : vector<2x8x14x13xf32> to vector<2x8x13x13xf32>
    %9 = arith.maximumf %7, %8 : vector<2x8x13x13xf32>
    %10 = vector.extract_strided_slice %9 {offsets = [0, 0, 0, 0], sizes = [2, 8, 13, 1], strides = [1, 1, 1, 1]} : vector<2x8x13x13xf32> to vector<2x8x13x1xf32>
    %11 = vector.extract_strided_slice %9 {offsets = [0, 0, 0, 2], sizes = [2, 8, 13, 1], strides = [1, 1, 1, 1]} : vector<2x8x13x13xf32> to vector<2x8x13x1xf32>
    %12 = vector.extract_strided_slice %9 {offsets = [0, 0, 0, 4], sizes = [2, 8, 13, 1], strides = [1, 1, 1, 1]} : vector<2x8x13x13xf32> to vector<2x8x13x1xf32>
    %13 = vector.extract_strided_slice %9 {offsets = [0, 0, 0, 6], sizes = [2, 8, 13, 1], strides = [1, 1, 1, 1]} : vector<2x8x13x13xf32> to vector<2x8x13x1xf32>
    %14 = vector.extract_strided_slice %9 {offsets = [0, 0, 0, 8], sizes = [2, 8, 13, 1], strides = [1, 1, 1, 1]} : vector<2x8x13x13xf32> to vector<2x8x13x1xf32>
    %15 = vector.extract_strided_slice %9 {offsets = [0, 0, 0, 10], sizes = [2, 8, 13, 1], strides = [1, 1, 1, 1]} : vector<2x8x13x13xf32> to vector<2x8x13x1xf32>
    %16 = vector.extract_strided_slice %9 {offsets = [0, 0, 0, 12], sizes = [2, 8, 13, 1], strides = [1, 1, 1, 1]} : vector<2x8x13x13xf32> to vector<2x8x13x1xf32>
    %17 = tpu.concatenate %10, %11, %12, %13, %14, %15, %16 in 3 : vector<2x8x13x1xf32>, vector<2x8x13x1xf32>, vector<2x8x13x1xf32>, vector<2x8x13x1xf32>, vector<2x8x13x1xf32>, vector<2x8x13x1xf32>, vector<2x8x13x1xf32> -> vector<2x8x13x7xf32>
    %18 = vector.extract_strided_slice %17 {offsets = [0, 0, 0, 0], sizes = [2, 8, 1, 7], strides = [1, 1, 1, 1]} : vector<2x8x13x7xf32> to vector<2x8x1x7xf32>
    %19 = vector.extract_strided_slice %17 {offsets = [0, 0, 2, 0], sizes = [2, 8, 1, 7], strides = [1, 1, 1, 1]} : vector<2x8x13x7xf32> to vector<2x8x1x7xf32>
    %20 = vector.extract_strided_slice %17 {offsets = [0, 0, 4, 0], sizes = [2, 8, 1, 7], strides = [1, 1, 1, 1]} : vector<2x8x13x7xf32> to vector<2x8x1x7xf32>
    %21 = vector.extract_strided_slice %17 {offsets = [0, 0, 6, 0], sizes = [2, 8, 1, 7], strides = [1, 1, 1, 1]} : vector<2x8x13x7xf32> to vector<2x8x1x7xf32>
    %22 = vector.extract_strided_slice %17 {offsets = [0, 0, 8, 0], sizes = [2, 8, 1, 7], strides = [1, 1, 1, 1]} : vector<2x8x13x7xf32> to vector<2x8x1x7xf32>
    %23 = vector.extract_strided_slice %17 {offsets = [0, 0, 10, 0], sizes = [2, 8, 1, 7], strides = [1, 1, 1, 1]} : vector<2x8x13x7xf32> to vector<2x8x1x7xf32>
    %24 = vector.extract_strided_slice %17 {offsets = [0, 0, 12, 0], sizes = [2, 8, 1, 7], strides = [1, 1, 1, 1]} : vector<2x8x13x7xf32> to vector<2x8x1x7xf32>
    %25 = tpu.concatenate %18, %19, %20, %21, %22, %23, %24 in 2 : vector<2x8x1x7xf32>, vector<2x8x1x7xf32>, vector<2x8x1x7xf32>, vector<2x8x1x7xf32>, vector<2x8x1x7xf32>, vector<2x8x1x7xf32>, vector<2x8x1x7xf32> -> vector<2x8x7x7xf32>
    %26 = vector.extract_strided_slice %25 {offsets = [0, 0, 0, 0], sizes = [2, 1, 1, 7], strides = [1, 1, 1, 1]} : vector<2x8x7x7xf32> to vector<2x1x1x7xf32>
    %27 = vector.shape_cast %26 : vector<2x1x1x7xf32> to vector<2x1x7xf32>
    %28 = vector.extract_strided_slice %25 {offsets = [0, 0, 1, 0], sizes = [2, 1, 1, 7], strides = [1, 1, 1, 1]} : vector<2x8x7x7xf32> to vector<2x1x1x7xf32>
    %29 = vector.shape_cast %28 : vector<2x1x1x7xf32> to vector<2x1x7xf32>
    %30 = vector.extract_strided_slice %25 {offsets = [0, 0, 2, 0], sizes = [2, 1, 1, 7], strides = [1, 1, 1, 1]} : vector<2x8x7x7xf32> to vector<2x1x1x7xf32>
    %31 = vector.shape_cast %30 : vector<2x1x1x7xf32> to vector<2x1x7xf32>
    %32 = vector.extract_strided_slice %25 {offsets = [0, 0, 3, 0], sizes = [2, 1, 1, 7], strides = [1, 1, 1, 1]} : vector<2x8x7x7xf32> to vector<2x1x1x7xf32>
    %33 = vector.shape_cast %32 : vector<2x1x1x7xf32> to vector<2x1x7xf32>
    %34 = vector.extract_strided_slice %25 {offsets = [0, 0, 4, 0], sizes = [2, 1, 1, 7], strides = [1, 1, 1, 1]} : vector<2x8x7x7xf32> to vector<2x1x1x7xf32>
    %35 = vector.shape_cast %34 : vector<2x1x1x7xf32> to vector<2x1x7xf32>
    %36 = vector.extract_strided_slice %25 {offsets = [0, 0, 5, 0], sizes = [2, 1, 1, 7], strides = [1, 1, 1, 1]} : vector<2x8x7x7xf32> to vector<2x1x1x7xf32>
    %37 = vector.shape_cast %36 : vector<2x1x1x7xf32> to vector<2x1x7xf32>
    %38 = vector.extract_strided_slice %25 {offsets = [0, 0, 6, 0], sizes = [2, 1, 1, 7], strides = [1, 1, 1, 1]} : vector<2x8x7x7xf32> to vector<2x1x1x7xf32>
    %39 = vector.shape_cast %38 : vector<2x1x1x7xf32> to vector<2x1x7xf32>
    %40 = tpu.concatenate %27, %29, %31, %33, %35, %37, %39 in 2 : vector<2x1x7xf32>, vector<2x1x7xf32>, vector<2x1x7xf32>, vector<2x1x7xf32>, vector<2x1x7xf32>, vector<2x1x7xf32>, vector<2x1x7xf32> -> vector<2x1x49xf32>
    %41 = vector.shape_cast %40 : vector<2x1x49xf32> to vector<2x49xf32>
    %c0_4 = arith.constant 0 : index
    %c0_5 = arith.constant 0 : index
    %42 = vector.load %arg11[%c0_4, %c0_5] : memref<2x392xf32, #tpu.memory_space<vmem>>, vector<2x49xf32>
    tpu.vector_store %arg11[%c0_4, %c0_5], %41 {strides = array<i32>} : memref<2x392xf32, #tpu.memory_space<vmem>>, vector<2x49xf32>,
    %43 = vector.extract_strided_slice %25 {offsets = [0, 1, 0, 0], sizes = [2, 1, 1, 7], strides = [1, 1, 1, 1]} : vector<2x8x7x7xf32> to vector<2x1x1x7xf32>
    %44 = vector.shape_cast %43 : vector<2x1x1x7xf32> to vector<2x1x7xf32>
    %45 = vector.extract_strided_slice %25 {offsets = [0, 1, 1, 0], sizes = [2, 1, 1, 7], strides = [1, 1, 1, 1]} : vector<2x8x7x7xf32> to vector<2x1x1x7xf32>
    %46 = vector.shape_cast %45 : vector<2x1x1x7xf32> to vector<2x1x7xf32>
    %47 = vector.extract_strided_slice %25 {offsets = [0, 1, 2, 0], sizes = [2, 1, 1, 7], strides = [1, 1, 1, 1]} : vector<2x8x7x7xf32> to vector<2x1x1x7xf32>
    %48 = vector.shape_cast %47 : vector<2x1x1x7xf32> to vector<2x1x7xf32>
    %49 = vector.extract_strided_slice %25 {offsets = [0, 1, 3, 0], sizes = [2, 1, 1, 7], strides = [1, 1, 1, 1]} : vector<2x8x7x7xf32> to vector<2x1x1x7xf32>
    %50 = vector.shape_cast %49 : vector<2x1x1x7xf32> to vector<2x1x7xf32>
    %51 = vector.extract_strided_slice %25 {offsets = [0, 1, 4, 0], sizes = [2, 1, 1, 7], strides = [1, 1, 1, 1]} : vector<2x8x7x7xf32> to vector<2x1x1x7xf32>
    %52 = vector.shape_cast %51 : vector<2x1x1x7xf32> to vector<2x1x7xf32>
    %53 = vector.extract_strided_slice %25 {offsets = [0, 1, 5, 0], sizes = [2, 1, 1, 7], strides = [1, 1, 1, 1]} : vector<2x8x7x7xf32> to vector<2x1x1x7xf32>
    %54 = vector.shape_cast %53 : vector<2x1x1x7xf32> to vector<2x1x7xf32>
    %55 = vector.extract_strided_slice %25 {offsets = [0, 1, 6, 0], sizes = [2, 1, 1, 7], strides = [1, 1, 1, 1]} : vector<2x8x7x7xf32> to vector<2x1x1x7xf32>
    %56 = vector.shape_cast %55 : vector<2x1x1x7xf32> to vector<2x1x7xf32>
    %57 = tpu.concatenate %44, %46, %48, %50, %52, %54, %56 in 2 : vector<2x1x7xf32>, vector<2x1x7xf32>, vector<2x1x7xf32>, vector<2x1x7xf32>, vector<2x1x7xf32>, vector<2x1x7xf32>, vector<2x1x7xf32> -> vector<2x1x49xf32>
    %58 = vector.shape_cast %57 : vector<2x1x49xf32> to vector<2x49xf32>
    %c0_6 = arith.constant 0 : index
    %c49 = arith.constant 49 : index
    %59 = vector.load %arg11[%c0_6, %c49] : memref<2x392xf32, #tpu.memory_space<vmem>>, vector<2x49xf32>
    tpu.vector_store %arg11[%c0_6, %c49], %58 {strides = array<i32>} : memref<2x392xf32, #tpu.memory_space<vmem>>, vector<2x49xf32>,
    %60 = vector.extract_strided_slice %25 {offsets = [0, 2, 0, 0], sizes = [2, 1, 1, 7], strides = [1, 1, 1, 1]} : vector<2x8x7x7xf32> to vector<2x1x1x7xf32>
    %61 = vector.shape_cast %60 : vector<2x1x1x7xf32> to vector<2x1x7xf32>
    %62 = vector.extract_strided_slice %25 {offsets = [0, 2, 1, 0], sizes = [2, 1, 1, 7], strides = [1, 1, 1, 1]} : vector<2x8x7x7xf32> to vector<2x1x1x7xf32>
    %63 = vector.shape_cast %62 : vector<2x1x1x7xf32> to vector<2x1x7xf32>
    %64 = vector.extract_strided_slice %25 {offsets = [0, 2, 2, 0], sizes = [2, 1, 1, 7], strides = [1, 1, 1, 1]} : vector<2x8x7x7xf32> to vector<2x1x1x7xf32>
    %65 = vector.shape_cast %64 : vector<2x1x1x7xf32> to vector<2x1x7xf32>
    %66 = vector.extract_strided_slice %25 {offsets = [0, 2, 3, 0], sizes = [2, 1, 1, 7], strides = [1, 1, 1, 1]} : vector<2x8x7x7xf32> to vector<2x1x1x7xf32>
    %67 = vector.shape_cast %66 : vector<2x1x1x7xf32> to vector<2x1x7xf32>
    %68 = vector.extract_strided_slice %25 {offsets = [0, 2, 4, 0], sizes = [2, 1, 1, 7], strides = [1, 1, 1, 1]} : vector<2x8x7x7xf32> to vector<2x1x1x7xf32>
    %69 = vector.shape_cast %68 : vector<2x1x1x7xf32> to vector<2x1x7xf32>
    %70 = vector.extract_strided_slice %25 {offsets = [0, 2, 5, 0], sizes = [2, 1, 1, 7], strides = [1, 1, 1, 1]} : vector<2x8x7x7xf32> to vector<2x1x1x7xf32>
    %71 = vector.shape_cast %70 : vector<2x1x1x7xf32> to vector<2x1x7xf32>
    %72 = vector.extract_strided_slice %25 {offsets = [0, 2, 6, 0], sizes = [2, 1, 1, 7], strides = [1, 1, 1, 1]} : vector<2x8x7x7xf32> to vector<2x1x1x7xf32>
    %73 = vector.shape_cast %72 : vector<2x1x1x7xf32> to vector<2x1x7xf32>
    %74 = tpu.concatenate %61, %63, %65, %67, %69, %71, %73 in 2 : vector<2x1x7xf32>, vector<2x1x7xf32>, vector<2x1x7xf32>, vector<2x1x7xf32>, vector<2x1x7xf32>, vector<2x1x7xf32>, vector<2x1x7xf32> -> vector<2x1x49xf32>
    %75 = vector.shape_cast %74 : vector<2x1x49xf32> to vector<2x49xf32>
    %c0_7 = arith.constant 0 : index
    %c98 = arith.constant 98 : index
    %76 = vector.load %arg11[%c0_7, %c98] : memref<2x392xf32, #tpu.memory_space<vmem>>, vector<2x49xf32>
    tpu.vector_store %arg11[%c0_7, %c98], %75 {strides = array<i32>} : memref<2x392xf32, #tpu.memory_space<vmem>>, vector<2x49xf32>,
    %77 = vector.extract_strided_slice %25 {offsets = [0, 3, 0, 0], sizes = [2, 1, 1, 7], strides = [1, 1, 1, 1]} : vector<2x8x7x7xf32> to vector<2x1x1x7xf32>
    %78 = vector.shape_cast %77 : vector<2x1x1x7xf32> to vector<2x1x7xf32>
    %79 = vector.extract_strided_slice %25 {offsets = [0, 3, 1, 0], sizes = [2, 1, 1, 7], strides = [1, 1, 1, 1]} : vector<2x8x7x7xf32> to vector<2x1x1x7xf32>
    %80 = vector.shape_cast %79 : vector<2x1x1x7xf32> to vector<2x1x7xf32>
    %81 = vector.extract_strided_slice %25 {offsets = [0, 3, 2, 0], sizes = [2, 1, 1, 7], strides = [1, 1, 1, 1]} : vector<2x8x7x7xf32> to vector<2x1x1x7xf32>
    %82 = vector.shape_cast %81 : vector<2x1x1x7xf32> to vector<2x1x7xf32>
    %83 = vector.extract_strided_slice %25 {offsets = [0, 3, 3, 0], sizes = [2, 1, 1, 7], strides = [1, 1, 1, 1]} : vector<2x8x7x7xf32> to vector<2x1x1x7xf32>
    %84 = vector.shape_cast %83 : vector<2x1x1x7xf32> to vector<2x1x7xf32>
    %85 = vector.extract_strided_slice %25 {offsets = [0, 3, 4, 0], sizes = [2, 1, 1, 7], strides = [1, 1, 1, 1]} : vector<2x8x7x7xf32> to vector<2x1x1x7xf32>
    %86 = vector.shape_cast %85 : vector<2x1x1x7xf32> to vector<2x1x7xf32>
    %87 = vector.extract_strided_slice %25 {offsets = [0, 3, 5, 0], sizes = [2, 1, 1, 7], strides = [1, 1, 1, 1]} : vector<2x8x7x7xf32> to vector<2x1x1x7xf32>
    %88 = vector.shape_cast %87 : vector<2x1x1x7xf32> to vector<2x1x7xf32>
    %89 = vector.extract_strided_slice %25 {offsets = [0, 3, 6, 0], sizes = [2, 1, 1, 7], strides = [1, 1, 1, 1]} : vector<2x8x7x7xf32> to vector<2x1x1x7xf32>
    %90 = vector.shape_cast %89 : vector<2x1x1x7xf32> to vector<2x1x7xf32>
    %91 = tpu.concatenate %78, %80, %82, %84, %86, %88, %90 in 2 : vector<2x1x7xf32>, vector<2x1x7xf32>, vector<2x1x7xf32>, vector<2x1x7xf32>, vector<2x1x7xf32>, vector<2x1x7xf32>, vector<2x1x7xf32> -> vector<2x1x49xf32>
    %92 = vector.shape_cast %91 : vector<2x1x49xf32> to vector<2x49xf32>
    %c0_8 = arith.constant 0 : index
    %c147 = arith.constant 147 : index
    %93 = vector.load %arg11[%c0_8, %c147] : memref<2x392xf32, #tpu.memory_space<vmem>>, vector<2x49xf32>
    tpu.vector_store %arg11[%c0_8, %c147], %92 {strides = array<i32>} : memref<2x392xf32, #tpu.memory_space<vmem>>, vector<2x49xf32>,
    %94 = vector.extract_strided_slice %25 {offsets = [0, 4, 0, 0], sizes = [2, 1, 1, 7], strides = [1, 1, 1, 1]} : vector<2x8x7x7xf32> to vector<2x1x1x7xf32>
    %95 = vector.shape_cast %94 : vector<2x1x1x7xf32> to vector<2x1x7xf32>
    %96 = vector.extract_strided_slice %25 {offsets = [0, 4, 1, 0], sizes = [2, 1, 1, 7], strides = [1, 1, 1, 1]} : vector<2x8x7x7xf32> to vector<2x1x1x7xf32>
    %97 = vector.shape_cast %96 : vector<2x1x1x7xf32> to vector<2x1x7xf32>
    %98 = vector.extract_strided_slice %25 {offsets = [0, 4, 2, 0], sizes = [2, 1, 1, 7], strides = [1, 1, 1, 1]} : vector<2x8x7x7xf32> to vector<2x1x1x7xf32>
    %99 = vector.shape_cast %98 : vector<2x1x1x7xf32> to vector<2x1x7xf32>
    %100 = vector.extract_strided_slice %25 {offsets = [0, 4, 3, 0], sizes = [2, 1, 1, 7], strides = [1, 1, 1, 1]} : vector<2x8x7x7xf32> to vector<2x1x1x7xf32>
    %101 = vector.shape_cast %100 : vector<2x1x1x7xf32> to vector<2x1x7xf32>
    %102 = vector.extract_strided_slice %25 {offsets = [0, 4, 4, 0], sizes = [2, 1, 1, 7], strides = [1, 1, 1, 1]} : vector<2x8x7x7xf32> to vector<2x1x1x7xf32>
    %103 = vector.shape_cast %102 : vector<2x1x1x7xf32> to vector<2x1x7xf32>
    %104 = vector.extract_strided_slice %25 {offsets = [0, 4, 5, 0], sizes = [2, 1, 1, 7], strides = [1, 1, 1, 1]} : vector<2x8x7x7xf32> to vector<2x1x1x7xf32>
    %105 = vector.shape_cast %104 : vector<2x1x1x7xf32> to vector<2x1x7xf32>
    %106 = vector.extract_strided_slice %25 {offsets = [0, 4, 6, 0], sizes = [2, 1, 1, 7], strides = [1, 1, 1, 1]} : vector<2x8x7x7xf32> to vector<2x1x1x7xf32>
    %107 = vector.shape_cast %106 : vector<2x1x1x7xf32> to vector<2x1x7xf32>
    %108 = tpu.concatenate %95, %97, %99, %101, %103, %105, %107 in 2 : vector<2x1x7xf32>, vector<2x1x7xf32>, vector<2x1x7xf32>, vector<2x1x7xf32>, vector<2x1x7xf32>, vector<2x1x7xf32>, vector<2x1x7xf32> -> vector<2x1x49xf32>
    %109 = vector.shape_cast %108 : vector<2x1x49xf32> to vector<2x49xf32>
    %c0_9 = arith.constant 0 : index
    %c196 = arith.constant 196 : index
    %110 = vector.load %arg11[%c0_9, %c196] : memref<2x392xf32, #tpu.memory_space<vmem>>, vector<2x49xf32>
    tpu.vector_store %arg11[%c0_9, %c196], %109 {strides = array<i32>} : memref<2x392xf32, #tpu.memory_space<vmem>>, vector<2x49xf32>,
    %111 = vector.extract_strided_slice %25 {offsets = [0, 5, 0, 0], sizes = [2, 1, 1, 7], strides = [1, 1, 1, 1]} : vector<2x8x7x7xf32> to vector<2x1x1x7xf32>
    %112 = vector.shape_cast %111 : vector<2x1x1x7xf32> to vector<2x1x7xf32>
    %113 = vector.extract_strided_slice %25 {offsets = [0, 5, 1, 0], sizes = [2, 1, 1, 7], strides = [1, 1, 1, 1]} : vector<2x8x7x7xf32> to vector<2x1x1x7xf32>
    %114 = vector.shape_cast %113 : vector<2x1x1x7xf32> to vector<2x1x7xf32>
    %115 = vector.extract_strided_slice %25 {offsets = [0, 5, 2, 0], sizes = [2, 1, 1, 7], strides = [1, 1, 1, 1]} : vector<2x8x7x7xf32> to vector<2x1x1x7xf32>
    %116 = vector.shape_cast %115 : vector<2x1x1x7xf32> to vector<2x1x7xf32>
    %117 = vector.extract_strided_slice %25 {offsets = [0, 5, 3, 0], sizes = [2, 1, 1, 7], strides = [1, 1, 1, 1]} : vector<2x8x7x7xf32> to vector<2x1x1x7xf32>
    %118 = vector.shape_cast %117 : vector<2x1x1x7xf32> to vector<2x1x7xf32>
    %119 = vector.extract_strided_slice %25 {offsets = [0, 5, 4, 0], sizes = [2, 1, 1, 7], strides = [1, 1, 1, 1]} : vector<2x8x7x7xf32> to vector<2x1x1x7xf32>
    %120 = vector.shape_cast %119 : vector<2x1x1x7xf32> to vector<2x1x7xf32>
    %121 = vector.extract_strided_slice %25 {offsets = [0, 5, 5, 0], sizes = [2, 1, 1, 7], strides = [1, 1, 1, 1]} : vector<2x8x7x7xf32> to vector<2x1x1x7xf32>
    %122 = vector.shape_cast %121 : vector<2x1x1x7xf32> to vector<2x1x7xf32>
    %123 = vector.extract_strided_slice %25 {offsets = [0, 5, 6, 0], sizes = [2, 1, 1, 7], strides = [1, 1, 1, 1]} : vector<2x8x7x7xf32> to vector<2x1x1x7xf32>
    %124 = vector.shape_cast %123 : vector<2x1x1x7xf32> to vector<2x1x7xf32>
    %125 = tpu.concatenate %112, %114, %116, %118, %120, %122, %124 in 2 : vector<2x1x7xf32>, vector<2x1x7xf32>, vector<2x1x7xf32>, vector<2x1x7xf32>, vector<2x1x7xf32>, vector<2x1x7xf32>, vector<2x1x7xf32> -> vector<2x1x49xf32>
    %126 = vector.shape_cast %125 : vector<2x1x49xf32> to vector<2x49xf32>
    %c0_10 = arith.constant 0 : index
    %c245 = arith.constant 245 : index
    %127 = vector.load %arg11[%c0_10, %c245] : memref<2x392xf32, #tpu.memory_space<vmem>>, vector<2x49xf32>
    tpu.vector_store %arg11[%c0_10, %c245], %126 {strides = array<i32>} : memref<2x392xf32, #tpu.memory_space<vmem>>, vector<2x49xf32>,
    %128 = vector.extract_strided_slice %25 {offsets = [0, 6, 0, 0], sizes = [2, 1, 1, 7], strides = [1, 1, 1, 1]} : vector<2x8x7x7xf32> to vector<2x1x1x7xf32>
    %129 = vector.shape_cast %128 : vector<2x1x1x7xf32> to vector<2x1x7xf32>
    %130 = vector.extract_strided_slice %25 {offsets = [0, 6, 1, 0], sizes = [2, 1, 1, 7], strides = [1, 1, 1, 1]} : vector<2x8x7x7xf32> to vector<2x1x1x7xf32>
    %131 = vector.shape_cast %130 : vector<2x1x1x7xf32> to vector<2x1x7xf32>
    %132 = vector.extract_strided_slice %25 {offsets = [0, 6, 2, 0], sizes = [2, 1, 1, 7], strides = [1, 1, 1, 1]} : vector<2x8x7x7xf32> to vector<2x1x1x7xf32>
    %133 = vector.shape_cast %132 : vector<2x1x1x7xf32> to vector<2x1x7xf32>
    %134 = vector.extract_strided_slice %25 {offsets = [0, 6, 3, 0], sizes = [2, 1, 1, 7], strides = [1, 1, 1, 1]} : vector<2x8x7x7xf32> to vector<2x1x1x7xf32>
    %135 = vector.shape_cast %134 : vector<2x1x1x7xf32> to vector<2x1x7xf32>
    %136 = vector.extract_strided_slice %25 {offsets = [0, 6, 4, 0], sizes = [2, 1, 1, 7], strides = [1, 1, 1, 1]} : vector<2x8x7x7xf32> to vector<2x1x1x7xf32>
    %137 = vector.shape_cast %136 : vector<2x1x1x7xf32> to vector<2x1x7xf32>
    %138 = vector.extract_strided_slice %25 {offsets = [0, 6, 5, 0], sizes = [2, 1, 1, 7], strides = [1, 1, 1, 1]} : vector<2x8x7x7xf32> to vector<2x1x1x7xf32>
    %139 = vector.shape_cast %138 : vector<2x1x1x7xf32> to vector<2x1x7xf32>
    %140 = vector.extract_strided_slice %25 {offsets = [0, 6, 6, 0], sizes = [2, 1, 1, 7], strides = [1, 1, 1, 1]} : vector<2x8x7x7xf32> to vector<2x1x1x7xf32>
    %141 = vector.shape_cast %140 : vector<2x1x1x7xf32> to vector<2x1x7xf32>
    %142 = tpu.concatenate %129, %131, %133, %135, %137, %139, %141 in 2 : vector<2x1x7xf32>, vector<2x1x7xf32>, vector<2x1x7xf32>, vector<2x1x7xf32>, vector<2x1x7xf32>, vector<2x1x7xf32>, vector<2x1x7xf32> -> vector<2x1x49xf32>
    %143 = vector.shape_cast %142 : vector<2x1x49xf32> to vector<2x49xf32>
    %c0_11 = arith.constant 0 : index
    %c294 = arith.constant 294 : index
    %144 = vector.load %arg11[%c0_11, %c294] : memref<2x392xf32, #tpu.memory_space<vmem>>, vector<2x49xf32>
    tpu.vector_store %arg11[%c0_11, %c294], %143 {strides = array<i32>} : memref<2x392xf32, #tpu.memory_space<vmem>>, vector<2x49xf32>,
    %145 = vector.extract_strided_slice %25 {offsets = [0, 7, 0, 0], sizes = [2, 1, 1, 7], strides = [1, 1, 1, 1]} : vector<2x8x7x7xf32> to vector<2x1x1x7xf32>
    %146 = vector.shape_cast %145 : vector<2x1x1x7xf32> to vector<2x1x7xf32>
    %147 = vector.extract_strided_slice %25 {offsets = [0, 7, 1, 0], sizes = [2, 1, 1, 7], strides = [1, 1, 1, 1]} : vector<2x8x7x7xf32> to vector<2x1x1x7xf32>
    %148 = vector.shape_cast %147 : vector<2x1x1x7xf32> to vector<2x1x7xf32>
    %149 = vector.extract_strided_slice %25 {offsets = [0, 7, 2, 0], sizes = [2, 1, 1, 7], strides = [1, 1, 1, 1]} : vector<2x8x7x7xf32> to vector<2x1x1x7xf32>
    %150 = vector.shape_cast %149 : vector<2x1x1x7xf32> to vector<2x1x7xf32>
    %151 = vector.extract_strided_slice %25 {offsets = [0, 7, 3, 0], sizes = [2, 1, 1, 7], strides = [1, 1, 1, 1]} : vector<2x8x7x7xf32> to vector<2x1x1x7xf32>
    %152 = vector.shape_cast %151 : vector<2x1x1x7xf32> to vector<2x1x7xf32>
    %153 = vector.extract_strided_slice %25 {offsets = [0, 7, 4, 0], sizes = [2, 1, 1, 7], strides = [1, 1, 1, 1]} : vector<2x8x7x7xf32> to vector<2x1x1x7xf32>
    %154 = vector.shape_cast %153 : vector<2x1x1x7xf32> to vector<2x1x7xf32>
    %155 = vector.extract_strided_slice %25 {offsets = [0, 7, 5, 0], sizes = [2, 1, 1, 7], strides = [1, 1, 1, 1]} : vector<2x8x7x7xf32> to vector<2x1x1x7xf32>
    %156 = vector.shape_cast %155 : vector<2x1x1x7xf32> to vector<2x1x7xf32>
    %157 = vector.extract_strided_slice %25 {offsets = [0, 7, 6, 0], sizes = [2, 1, 1, 7], strides = [1, 1, 1, 1]} : vector<2x8x7x7xf32> to vector<2x1x1x7xf32>
    %158 = vector.shape_cast %157 : vector<2x1x1x7xf32> to vector<2x1x7xf32>
    %159 = tpu.concatenate %146, %148, %150, %152, %154, %156, %158 in 2 : vector<2x1x7xf32>, vector<2x1x7xf32>, vector<2x1x7xf32>, vector<2x1x7xf32>, vector<2x1x7xf32>, vector<2x1x7xf32>, vector<2x1x7xf32> -> vector<2x1x49xf32>
    %160 = vector.shape_cast %159 : vector<2x1x49xf32> to vector<2x49xf32>
    %c0_12 = arith.constant 0 : index
    %c343 = arith.constant 343 : index
    %161 = vector.load %arg11[%c0_12, %c343] : memref<2x392xf32, #tpu.memory_space<vmem>>, vector<2x49xf32>
    tpu.vector_store %arg11[%c0_12, %c343], %160 {strides = array<i32>} : memref<2x392xf32, #tpu.memory_space<vmem>>, vector<2x49xf32>,
    %c0_13 = arith.constant 0 : index
    %c0_14 = arith.constant 0 : index
    %162 = vector.load %arg11[%c0_13, %c0_14] : memref<2x392xf32, #tpu.memory_space<vmem>>, vector<2x392xf32>
    %163 = arith.truncf %162 : vector<2x392xf32> to vector<2x392xbf16>
    %c0_15 = arith.constant 0 : index
    %c0_16 = arith.constant 0 : index
    %164 = vector.load %arg10[%c0_15, %c0_16] : memref<2x256xf32, #tpu.memory_space<vmem>>, vector<2x256xf32>
    %c0_17 = arith.constant 0 : index
    %c0_18 = arith.constant 0 : index
    %165 = vector.load %arg3[%c0_17, %c0_18] : memref<392x256xbf16, #tpu.memory_space<vmem>>, vector<392x256xbf16>
    %cst = arith.constant dense<0.000000e+00> : vector<2x256xf32>
    %166 = tpu.matmul %163, %165, %cst {dimension_numbers = #tpu.dot_dimension_numbers<[1], [0], [0], [1], [0, 0, 1, 1], [], []>} : vector<2x392xbf16>, vector<392x256xbf16>, vector<2x256xf32> -> vector<2x256xf32>
    %167 = arith.addf %164, %166 : vector<2x256xf32>
    %c0_19 = arith.constant 0 : index
    %c0_20 = arith.constant 0 : index
    %168 = vector.load %arg10[%c0_19, %c0_20] : memref<2x256xf32, #tpu.memory_space<vmem>>, vector<2x256xf32>
    tpu.vector_store %arg10[%c0_19, %c0_20], %167 {strides = array<i32>} : memref<2x256xf32, #tpu.memory_space<vmem>>, vector<2x256xf32>,
    %c3_i32 = arith.constant 3 : i32
    %169 = arith.cmpi eq, %arg1, %c3_i32 : i32
    %170 = arith.extui %169 : i1 to i32
    %c0_i32_21 = arith.constant 0 : i32
    %171 = arith.cmpi ne, %170, %c0_i32_21 : i32
    scf.if %171 {
      %c0_22 = arith.constant 0 : index
      %c0_23 = arith.constant 0 : index
      %172 = vector.load %arg10[%c0_22, %c0_23] : memref<2x256xf32, #tpu.memory_space<vmem>>, vector<2x256xf32>
      %c0_24 = arith.constant 0 : index
      %c0_25 = arith.constant 0 : index
      %173 = vector.load %arg4[%c0_24, %c0_25] : memref<1x256xf32, #tpu.memory_space<vmem>>, vector<1x256xf32>
      %174 = vector.broadcast %173 : vector<1x256xf32> to vector<2x256xf32>
      %175 = arith.addf %172, %174 : vector<2x256xf32>
      %cst_26 = arith.constant 0.000000e+00 : f32
      %176 = vector.broadcast %cst_26 : f32 to vector<2x256xf32>
      %177 = arith.maximumf %175, %176 : vector<2x256xf32>
      %178 = arith.truncf %177 : vector<2x256xf32> to vector<2x256xbf16>
      %c0_27 = arith.constant 0 : index
      %c0_28 = arith.constant 0 : index
      %179 = vector.load %arg5[%c0_27, %c0_28] : memref<256x256xbf16, #tpu.memory_space<vmem>>, vector<256x256xbf16>
      %cst_29 = arith.constant dense<0.000000e+00> : vector<2x256xf32>
      %180 = tpu.matmul %178, %179, %cst_29 {dimension_numbers = #tpu.dot_dimension_numbers<[1], [0], [0], [1], [0, 0, 1, 1], [], []>} : vector<2x256xbf16>, vector<256x256xbf16>, vector<2x256xf32> -> vector<2x256xf32>
      %c0_30 = arith.constant 0 : index
      %c0_31 = arith.constant 0 : index
      %181 = vector.load %arg6[%c0_30, %c0_31] : memref<1x256xf32, #tpu.memory_space<vmem>>, vector<1x256xf32>
      %182 = vector.broadcast %181 : vector<1x256xf32> to vector<2x256xf32>
      %183 = arith.addf %180, %182 : vector<2x256xf32>
      %cst_32 = arith.constant 0.000000e+00 : f32
      %184 = vector.broadcast %cst_32 : f32 to vector<2x256xf32>
      %185 = arith.maximumf %183, %184 : vector<2x256xf32>
      %186 = arith.truncf %185 : vector<2x256xf32> to vector<2x256xbf16>
      %c0_33 = arith.constant 0 : index
      %c0_34 = arith.constant 0 : index
      %187 = vector.load %arg7[%c0_33, %c0_34] : memref<256x128xbf16, #tpu.memory_space<vmem>>, vector<256x128xbf16>
      %cst_35 = arith.constant dense<0.000000e+00> : vector<2x128xf32>
      %188 = tpu.matmul %186, %187, %cst_35 {dimension_numbers = #tpu.dot_dimension_numbers<[1], [0], [0], [1], [0, 0, 1, 1], [], []>} : vector<2x256xbf16>, vector<256x128xbf16>, vector<2x128xf32> -> vector<2x128xf32>
      %c0_36 = arith.constant 0 : index
      %c0_37 = arith.constant 0 : index
      %189 = vector.load %arg8[%c0_36, %c0_37] : memref<1x128xf32, #tpu.memory_space<vmem>>, vector<1x128xf32>
      %190 = vector.broadcast %189 : vector<1x128xf32> to vector<2x128xf32>
      %191 = arith.addf %188, %190 : vector<2x128xf32>
      %c0_38 = arith.constant 0 : index
      %c0_39 = arith.constant 0 : index
      %192 = vector.load %arg9[%c0_38, %c0_39] : memref<2x128xf32, #tpu.memory_space<vmem>>, vector<2x128xf32>
      tpu.vector_store %arg9[%c0_38, %c0_39], %191 {strides = array<i32>} : memref<2x128xf32, #tpu.memory_space<vmem>>, vector<2x128xf32>,
    } else {
    }
    return
  }
  func.func @transform_0(%arg0: i32, %arg1: i32) -> (i32, i32, i32, i32) {
    %c0_i32 = arith.constant 0 : i32
    %c0_i32_0 = arith.constant 0 : i32
    %c0_i32_1 = arith.constant 0 : i32
    return %arg0, %arg1, %c0_i32, %c0_i32_0 : i32, i32, i32, i32
  }
  func.func @transform_1(%arg0: i32, %arg1: i32) -> (i32, i32) {
    %c0_i32 = arith.constant 0 : i32
    %c0_i32_0 = arith.constant 0 : i32
    return %arg1, %c0_i32 : i32, i32
  }
  func.func @transform_2(%arg0: i32, %arg1: i32) -> (i32, i32) {
    %c0_i32 = arith.constant 0 : i32
    %c0_i32_0 = arith.constant 0 : i32
    %c0_i32_1 = arith.constant 0 : i32
    return %c0_i32, %c0_i32_0 : i32, i32
  }
  func.func @transform_3(%arg0: i32, %arg1: i32) -> (i32, i32) {
    %c0_i32 = arith.constant 0 : i32
    %c0_i32_0 = arith.constant 0 : i32
    %c0_i32_1 = arith.constant 0 : i32
    return %c0_i32, %c0_i32_0 : i32, i32
  }
  func.func @transform_4(%arg0: i32, %arg1: i32) -> (i32, i32) {
    %c0_i32 = arith.constant 0 : i32
    %c0_i32_0 = arith.constant 0 : i32
    %c0_i32_1 = arith.constant 0 : i32
    return %c0_i32, %c0_i32_0 : i32, i32
  }
  func.func @transform_5(%arg0: i32, %arg1: i32) -> (i32, i32) {
    %c0_i32 = arith.constant 0 : i32
    %c0_i32_0 = arith.constant 0 : i32
    %c0_i32_1 = arith.constant 0 : i32
    return %c0_i32, %c0_i32_0 : i32, i32
  }
  func.func @transform_6(%arg0: i32, %arg1: i32) -> (i32, i32) {
    %c0_i32 = arith.constant 0 : i32
    %c0_i32_0 = arith.constant 0 : i32
    %c0_i32_1 = arith.constant 0 : i32
    return %c0_i32, %c0_i32_0 : i32, i32
  }
  func.func @transform_7(%arg0: i32, %arg1: i32) -> (i32, i32) {
    %c0_i32 = arith.constant 0 : i32
    %c0_i32_0 = arith.constant 0 : i32
    return %arg0, %c0_i32 : i32, i32
  }
}

</mosaic_0001>

<bundles_post_ra>
// kernel: head_model.1
= control target key start
LH: loop header
LB: loop body
LE: loop exit
PB: predicated region body
PF: predicated region fallthrough
CT: control target
= control target key end

     0   :  { %12 = vsyncpa [#allocation6], 0  ;;  %s6673_s0 = inlined_call_operand.vmem [shape: f32[2,32,14,14], index: 0, kind: input, shape index: {}]   ;;  %s6674_s1 = inlined_call_operand.hbm [shape: bf16[1568,256], index: 1, kind: input, shape index: {}]   ;;  %s6675_s2 = inlined_call_operand.vmem [shape: f32[1,256], index: 2, kind: input, shape index: {}]   ;;  %s6676_s3 = inlined_call_operand.vmem [shape: bf16[256,256], index: 3, kind: input, shape index: {}]   ;;  %s6677_s4 = inlined_call_operand.vmem [shape: f32[1,256], index: 4, kind: input, shape index: {}]   ;;  %s6678_s5 = inlined_call_operand.vmem [shape: bf16[256,128], index: 5, kind: input, shape index: {}]   ;;  %s6679_s6 = inlined_call_operand.vmem [shape: f32[1,128], index: 6, kind: input, shape index: {}]   ;;  %s6680_s7 = inlined_call_operand.hbm [shape: f32[2,128], index: 7, kind: output, shape index: {}]  }
   0x1   :  { %14 = vsyncpa [#allocation6 + $0x1], 0 }
   0x2   :  { %15 = vsyncpa [#allocation7], 0  ;;  %s4230_s24 = smov 0   ;;  %s4232_s25 = smov 0  }
   0x3   :  { %s4234_s26 = smov 0   ;;  %s4236_s27 = smov 0  }
   0x4   :  { %s4238_s28 = smov 0   ;;  %s4240_s29 = smov 0  }
   0x5 LB: > { %s3694_s30 = sadd.s32 4294967295, %s4163_s29   ;;  %s30_s8 = sadd.s32 1, %s4159_s28  ;;  %s4163_s29 = sphi %s4240_s29, %s21_s29   ;;  %s4159_s28 = sphi %s4238_s28, %s6806_s28   ;;  %s4155_s27 = sphi %s4236_s27, %s6805_s27   ;;  %s4151_s26 = sphi %s4234_s26, %s6804_s26   ;;  %s4147_s25 = sphi %s4232_s25, %s6803_s25   ;;  %s4143_s24 = sphi %s4230_s24, %s6802_s24  }
   0x6   : > { %p31_p0 = scmp.ge.s32.totalorder %s30_s8, 4  ;;  %s42_s9 = sadd.s32 1, %s4151_s26 }
   0x7   : > { %p49_p1 = scmp.ne.s32.totalorder %s4151_s26, %s4147_s25  ;;  %p50_p2 = scmp.eq.s32.totalorder %s4163_s29, 0 }
   0x8   : > { %s6808_s8 = smov (%p31_p0, %s30_s8), 0  ;;  %p81_p4 = scmp.ne.s32.totalorder %s4147_s25, %s4143_s24 }
   0x9   : > { %p4266_p3 = por %p50_p2, %p49_p1  ;;  %s38_s11 = ssub.s32 %s4159_s28, %s6808_s8 }
   0xa   : > { %p82_p5 = scmp.eq.s32.totalorder %s3694_s30, 0  ;;  %p40_p6 = scmp.eq.s32.totalorder %s38_s11, 0 }
   0xb   : > { %p3696_p8 = scmp.ge.s32.totalorder %s4163_s29, 4 }
   0xc   : > { %p4275_p7 = por %p82_p5, %p81_p4 }
   0xd   : > { %s4280_s13 = scalar_select %p40_p6, %s4151_s26, %s42_s9  }
   0xe   : > { %247 = sbr.rel (%p3696_p8) target bundleno = 56 (0x38), region = 36 }
  0x13   : > { %250 = sbr.rel (!%p4266_p3) target bundleno = 39 (0x27), region = 40  ;;  %s252_s14 = sand.u32 (%p4266_p3), 1, %s4151_s26  }
  0x14   : > { %s3813_s15 = sshll.u32 (%p4266_p3), %s4159_s28, 7  ;;  %s3697_s16 = sshll.u32 (%p4266_p3), %s252_s14, 8 }
  0x15   : > { %s4290_s19 = scalar_lea.vmem (%p4266_p3), %s6673_s0, %s3813_s15  ;;  %s4295_s20 = scalar_lea.vmem (%p4266_p3), [#allocation4], %s3697_s16 }
  0x16   : > { %v352_v0 = vld [vmem:[%s4290_s19] sm:$0xff] (%p4266_p3)  ;;  %v354_v1 = vld [vmem:[%s4290_s19 + $0x8] sm:$0xff] (%p4266_p3)  ;;  %v356_v2 = vld [vmem:[%s4290_s19 + $0x10] sm:$0xff] (%p4266_p3) }
  0x17   : > { %353 = vst [vmem:[%s4295_s20] sm:$0xff] (%p4266_p3), %v352_v0  ;;  %355 = vst [vmem:[%s4295_s20 + $0x8] sm:$0xff] (%p4266_p3), %v354_v1  ;;  %v358_v3 = vld [vmem:[%s4290_s19 + $0x18] sm:$0xff] (%p4266_p3)  ;;  %v360_v4 = vld [vmem:[%s4290_s19 + $0x20] sm:$0xff] (%p4266_p3) }
  0x18   : > { %357 = vst [vmem:[%s4295_s20 + $0x10] sm:$0xff] %v356_v2  ;;  %v362_v5 = vld [vmem:[%s4290_s19 + $0x28] sm:$0xff]  ;;  %359 = vst [vmem:[%s4295_s20 + $0x18] sm:$0xff] %v358_v3  ;;  %v364_v6 = vld [vmem:[%s4290_s19 + $0x30] sm:$0xff] }
  0x19   : > { %361 = vst [vmem:[%s4295_s20 + $0x20] sm:$0xff] %v360_v4  ;;  %363 = vst [vmem:[%s4295_s20 + $0x28] sm:$0xff] %v362_v5  ;;  %v366_v7 = vld [vmem:[%s4290_s19 + $0x38] sm:$0xff]  ;;  %v368_v8 = vld [vmem:[%s4290_s19 + $0x40] sm:$0xff] }
  0x1a   : > { %365 = vst [vmem:[%s4295_s20 + $0x30] sm:$0xff] %v364_v6  ;;  %367 = vst [vmem:[%s4295_s20 + $0x38] sm:$0xff] %v366_v7  ;;  %v370_v9 = vld [vmem:[%s4290_s19 + $0x48] sm:$0xff]  ;;  %v372_v10 = vld [vmem:[%s4290_s19 + $0x50] sm:$0xff] }
  0x1b   : > { %369 = vst [vmem:[%s4295_s20 + $0x40] sm:$0xff] %v368_v8  ;;  %v374_v11 = vld [vmem:[%s4290_s19 + $0x58] sm:$0xff]  ;;  %371 = vst [vmem:[%s4295_s20 + $0x48] sm:$0xff] %v370_v9  ;;  %v376_v12 = vld [vmem:[%s4290_s19 + $0x60] sm:$0xff] }
  0x1c   : > { %373 = vst [vmem:[%s4295_s20 + $0x50] sm:$0xff] %v372_v10  ;;  %375 = vst [vmem:[%s4295_s20 + $0x58] sm:$0xff] %v374_v11  ;;  %v378_v13 = vld [vmem:[%s4290_s19 + $0x68] sm:$0xff]  ;;  %v380_v14 = vld [vmem:[%s4290_s19 + $0x70] sm:$0xff] }
  0x1d   : > { %377 = vst [vmem:[%s4295_s20 + $0x60] sm:$0xff] %v376_v12  ;;  %379 = vst [vmem:[%s4295_s20 + $0x68] sm:$0xff] %v378_v13  ;;  %v382_v15 = vld [vmem:[%s4290_s19 + $0x78] sm:$0xff]  ;;  %v384_v16 = vld [vmem:[%s4290_s19 + $0x200] sm:$0xff] }
  0x1e   : > { %381 = vst [vmem:[%s4295_s20 + $0x70] sm:$0xff] %v380_v14  ;;  %v386_v17 = vld [vmem:[%s4290_s19 + $0x208] sm:$0xff]  ;;  %383 = vst [vmem:[%s4295_s20 + $0x78] sm:$0xff] %v382_v15  ;;  %v388_v18 = vld [vmem:[%s4290_s19 + $0x210] sm:$0xff] }
  0x1f   : > { %385 = vst [vmem:[%s4295_s20 + $0x80] sm:$0xff] %v384_v16  ;;  %387 = vst [vmem:[%s4295_s20 + $0x88] sm:$0xff] %v386_v17  ;;  %v390_v19 = vld [vmem:[%s4290_s19 + $0x218] sm:$0xff]  ;;  %v392_v20 = vld [vmem:[%s4290_s19 + $0x220] sm:$0xff] }
  0x20   : > { %389 = vst [vmem:[%s4295_s20 + $0x90] sm:$0xff] %v388_v18  ;;  %391 = vst [vmem:[%s4295_s20 + $0x98] sm:$0xff] %v390_v19  ;;  %v394_v21 = vld [vmem:[%s4290_s19 + $0x228] sm:$0xff]  ;;  %v396_v22 = vld [vmem:[%s4290_s19 + $0x230] sm:$0xff] }
  0x21   : > { %393 = vst [vmem:[%s4295_s20 + $0xa0] sm:$0xff] %v392_v20  ;;  %v398_v23 = vld [vmem:[%s4290_s19 + $0x238] sm:$0xff]  ;;  %395 = vst [vmem:[%s4295_s20 + $0xa8] sm:$0xff] %v394_v21  ;;  %v400_v24 = vld [vmem:[%s4290_s19 + $0x240] sm:$0xff] }
  0x22   : > { %397 = vst [vmem:[%s4295_s20 + $0xb0] sm:$0xff] %v396_v22  ;;  %399 = vst [vmem:[%s4295_s20 + $0xb8] sm:$0xff] %v398_v23  ;;  %v402_v25 = vld [vmem:[%s4290_s19 + $0x248] sm:$0xff]  ;;  %v404_v26 = vld [vmem:[%s4290_s19 + $0x250] sm:$0xff] }
  0x23   : > { %401 = vst [vmem:[%s4295_s20 + $0xc0] sm:$0xff] %v400_v24  ;;  %403 = vst [vmem:[%s4295_s20 + $0xc8] sm:$0xff] %v402_v25  ;;  %v406_v27 = vld [vmem:[%s4290_s19 + $0x258] sm:$0xff]  ;;  %v408_v28 = vld [vmem:[%s4290_s19 + $0x260] sm:$0xff] }
  0x24   : > { %405 = vst [vmem:[%s4295_s20 + $0xd0] sm:$0xff] %v404_v26  ;;  %v410_v29 = vld [vmem:[%s4290_s19 + $0x268] sm:$0xff]  ;;  %407 = vst [vmem:[%s4295_s20 + $0xd8] sm:$0xff] %v406_v27  ;;  %v412_v30 = vld [vmem:[%s4290_s19 + $0x270] sm:$0xff] }
  0x25   : > { %409 = vst [vmem:[%s4295_s20 + $0xe0] sm:$0xff] %v408_v28  ;;  %411 = vst [vmem:[%s4295_s20 + $0xe8] sm:$0xff] %v410_v29  ;;  %v414_v31 = vld [vmem:[%s4290_s19 + $0x278] sm:$0xff] }
  0x26   : > { %413 = vst [vmem:[%s4295_s20 + $0xf0] sm:$0xff] %v412_v30  ;;  %415 = vst [vmem:[%s4295_s20 + $0xf8] sm:$0xff] %v414_v31 }
  0x27 PF: > { %s422_s21 = sand.u32 1, %s4151_s26   ;;  %s3816_s22 = smul.u32 6272, %s4159_s28 }
  0x28   : > { %s3839_s23 = smul.u32 392, %s422_s21  ;;  %s423_s16 = scalar_lea.sflag [#allocation6], %s422_s21 }
  0x29   : > { %s433_s11 = scalar_lea.hbm %s6674_s1, %s3816_s22  ;;  %s4165_s18 = smov [#allocation5]  }
  0x2a   : > { %s426_s14 = scalar_lea.vmem [#allocation5], %s3839_s23  ;;  %s4075_s19 = sshll.u32 %s4165_s18, 4  ;;  %s4076_s19 = int_to_ptr.vmem [resolvable:$false] %s4075_s19 }
  0x2b   : > { %s434_s15 = sshll.u32 %s426_s14, 4  ;;  %s4077_s20 = scalar_lea.vmem %s4076_s19, 12544  ;;  %s435_s15 = int_to_ptr.vmem [resolvable:$true] %s434_s15 }
  0x2c   : > { %s4071_s17 = scalar_lea.vmem %s435_s15, 6272  ;;  %p4078_p12 = scmp.lt.s32.totalorder %s435_s15, %s4076_s19 }
  0x2d   : > { %p4072_p9 = scmp.ne.s32.totalorder %s435_s15, %s4071_s17  ;;  %p4079_p13 = scmp.lt.s32.totalorder %s4077_s20, %s4071_s17 }
  0x2f   : > { %p4073_p10 = pnand %p4072_p9, %p4266_p3  ;;  %p4080_p0 = por %p4079_p13, %p4078_p12 }
  0x31   : > { %p4074_p11 = pneg %p4073_p10 }
  0x33   : > { %p4081_p1 = pnand %p4080_p0, %p4074_p11 }
  0x35   : > { %4084 = shalt.err (!%p4081_p1)
}
  0x36   : > { %s4166_s24 = smov 128   ;;  %s4167_s22 = smov 8  }
  0x37   : > { %3841 = dma.hbm_to_vmem [thread:$0]  (%p4266_p3), %s433_s11, 6272, %s435_s15, %s423_s16, %s4166_s24, %s4166_s24, %s4167_s22  }
  0x38 PF: > { %p3703_p2 = scmp.ge.s32.totalorder %s4163_s29, 1  ;;  %p442_p4 = scmp.lt.s32.totalorder %s4163_s29, 5 }
  0x3a   : > { %p443_p5 = pnand %p3703_p2, %p442_p4 }
  0x3c   : > { %446 = sbr.rel (%p443_p5) target bundleno = 1726 (0x6be), region = 82 }
  0x41   : > { %s449_s21 = sand.u32 1, %s4147_s25  }
  0x42   : > { %s3704_s23 = sshll.u32 %s449_s21, 8  ;;  %s3840_s9 = smul.u32 392, %s449_s21 }
  0x43   : > { %s4370_s14 = scalar_lea.vmem [#allocation4], %s3704_s23  ;;  %s456_s17 = scalar_lea.sflag [#allocation6], %s449_s21 }
  0x44   : > { %s4372_s18 = scalar_lea.vmem [#allocation5], %s3840_s9 }
  0x45   : > { %4134 = dma.done.wait (%p4275_p7), %s456_s17, 6272  }
  0x46   : > { %4136 = vsyncadd (%p4275_p7), %s456_s17, 4294961024  ;;  %p3705_p3 = scmp.ne.s32.totalorder %s4155_s27, 0 }
  0x48   : > { %496 = sbr.rel (%p3705_p3) target bundleno = 79 (0x4f), region = 94 }
  0x4d   : > { %v4168_v32 = vmov 0.0  }
  0x4e   : > { %497 = vst [vmem:[#allocation2] sm:$0xf] %v4168_v32 }
  0x4f PF: > { %v4380_v33 = vld [vmem:[%s4370_s14 + $0x10] sm:$0xff]  ;;  %v4383_v34 = vld [vmem:[%s4370_s14] sm:$0xff]  ;;  %s4169_s10 = smov 127   ;;  %v4390_v35 = vld [vmem:[%s4370_s14 + $0x18] sm:$0x3f]  ;;  %vm722_vm0 = vcmask 1046528  }
  0x50   : > { %566 = vrot.lane.b32.xlu1 %v4380_v33, %s4169_s10  ;;  %562 = vrot.lane.b32.xlu0 %v4383_v34, %s4169_s10  ;;  %v4393_v36 = vld [vmem:[%s4370_s14 + $0x8] sm:$0x3f]  ;;  %v4403_v38 = vld [vmem:[%s4370_s14 + $0x20] sm:$0xff]  ;;  %s4170_s12 = smov 126   ;;  %s4171_s11 = smov 125   ;;  %vm1443_vm1 = vcmask 7168  }
  0x51   : > { %v4400_v37 = vld [vmem:[%s4370_s14 + $0x28] sm:$0x3f]  ;;  %v4410_v39 = vld [vmem:[%s4370_s14 + $0x38] sm:$0x3f]  ;;  %v4413_v40 = vld [vmem:[%s4370_s14 + $0x30] sm:$0xff]  ;;  %s4172_s15 = smov 124  }
  0x52   : > { %v4416_v41 = vld [vmem:[%s4370_s14 + $0x48] sm:$0x3f]  ;;  %v4419_v42 = vld [vmem:[%s4370_s14 + $0x40] sm:$0xff]  ;;  %v4426_v43 = vld [vmem:[%s4370_s14 + $0x58] sm:$0x3f]  ;;  %s4173_s16 = smov 123  }
  0x53   : > { %v4429_v44 = vld [vmem:[%s4370_s14 + $0x50] sm:$0xff]  ;;  %v4436_v45 = vld [vmem:[%s4370_s14 + $0x68] sm:$0x3f]  ;;  %v4439_v46 = vld [vmem:[%s4370_s14 + $0x60] sm:$0xff]  ;;  %vm1476_vm2 = vcmask 15360   ;;  %s4174_s19 = smov 122  }
  0x54   : > { %568 = vrot.lane.b32.xlu1 %v4390_v35, %s4169_s10  ;;  %564 = vrot.lane.b32.xlu0 %v4393_v36, %s4169_s10  ;;  %v4446_v47 = vld [vmem:[%s4370_s14 + $0x78] sm:$0x3f]  ;;  %v4449_v48 = vld [vmem:[%s4370_s14 + $0x70] sm:$0xff]  ;;  %vm1509_vm3 = vcmask 23552   ;;  %vm1542_vm4 = vcmask 31744   ;;  %vm1575_vm5 = vcmask 39936  }
  0x55   : > { %v4460_v49 = vld [vmem:[%s4370_s14 + $0x88] sm:$0x3f]  ;;  %v4463_v50 = vld [vmem:[%s4370_s14 + $0x80] sm:$0xff]  ;;  %v4470_v51 = vld [vmem:[%s4370_s14 + $0x98] sm:$0x3f]  ;;  %vm1608_vm6 = vcmask 48128  }
  0x56   : > { %v4473_v52 = vld [vmem:[%s4370_s14 + $0x90] sm:$0xff]  ;;  %v4480_v53 = vld [vmem:[%s4370_s14 + $0xa8] sm:$0x3f]  ;;  %v4483_v54 = vld [vmem:[%s4370_s14 + $0xa0] sm:$0xff]  ;;  %vm1865_vm7 = vcmask 1040384   ;;  %vm1882_vm8 = vcmask 1041408  }
  0x57   : > { %v4490_v55 = vld [vmem:[%s4370_s14 + $0xb8] sm:$0x3f]  ;;  %v4493_v56 = vld [vmem:[%s4370_s14 + $0xb0] sm:$0xff]  ;;  %v4500_v57 = vld [vmem:[%s4370_s14 + $0xc8] sm:$0x3f]  ;;  %vm1899_vm9 = vcmask 1042432  }
  0x58   : > { %572 = vrot.lane.b32.xlu1 %v4400_v37, %s4169_s10  ;;  %570 = vrot.lane.b32.xlu0 %v4403_v38, %s4169_s10  ;;  %v4503_v58 = vld [vmem:[%s4370_s14 + $0xc0] sm:$0xff]  ;;  %v4510_v59 = vld [vmem:[%s4370_s14 + $0xd8] sm:$0x3f]  ;;  %vm1916_vm10 = vcmask 1043456   ;;  %vm1933_vm11 = vcmask 1044480   ;;  %vm1950_vm12 = vcmask 1045504  }
  0x59   : > { %v4513_v60 = vld [vmem:[%s4370_s14 + $0xd0] sm:$0xff]  ;;  %v4520_v61 = vld [vmem:[%s4370_s14 + $0xe8] sm:$0x3f]  ;;  %v4523_v62 = vld [vmem:[%s4370_s14 + $0xe0] sm:$0xff]  ;;  %s4175_s20 = smov 14   ;;  %s4176_s24 = smov 7  }
  0x5a   : > { %v4530_v63 = vld [vmem:[%s4370_s14 + $0xf8] sm:$0x3f]  ;;  %v4533_v0 = vld [vmem:[%s4370_s14 + $0xf0] sm:$0xff]  ;;  %s4177_s22 = smov 21   ;;  %s4178_s21 = smov 28   ;;  %vm2017_vm13 = vcmask 56320  }
  0x5b   : > { %s4179_s23 = smov 35   ;;  %s4180_s9 = smov 42   ;;  %vm2020_vm14 = vcmask 113664   ;;  %vm2023_vm15 = vcmask 171008  }
  0x5c   : > { %576 = vrot.lane.b32.xlu1 %v4410_v39, %s4169_s10  ;;  %574 = vrot.lane.b32.xlu0 %v4413_v40, %s4169_s10  ;;  %s4182_s14 = smov 98   ;;  %s4183_s17 = smov 49  }
  0x5d   : > { %p3758_p6 = scmp.ne.s32.totalorder %s4155_s27, 3 }
  0x60   : > { %580 = vrot.lane.b32.xlu1 %v4416_v41, %s4169_s10  ;;  %578 = vrot.lane.b32.xlu0 %v4419_v42, %s4169_s10 }
  0x64   : > { %584 = vrot.lane.b32.xlu1 %v4426_v43, %s4169_s10  ;;  %582 = vrot.lane.b32.xlu0 %v4429_v44, %s4169_s10 }
  0x68   : > { %588 = vrot.lane.b32.xlu1 %v4436_v45, %s4169_s10  ;;  %586 = vrot.lane.b32.xlu0 %v4439_v46, %s4169_s10 }
  0x6c   : > { %592 = vrot.lane.b32.xlu1 %v4446_v47, %s4169_s10  ;;  %590 = vrot.lane.b32.xlu0 %v4449_v48, %s4169_s10 }
  0x70   : > { %596 = vrot.lane.b32.xlu1 %v4460_v49, %s4169_s10  ;;  %594 = vrot.lane.b32.xlu0 %v4463_v50, %s4169_s10 }
  0x74   : > { %600 = vrot.lane.b32.xlu1 %v4470_v51, %s4169_s10  ;;  %598 = vrot.lane.b32.xlu0 %v4473_v52, %s4169_s10 }
  0x78   : > { %604 = vrot.lane.b32.xlu1 %v4480_v53, %s4169_s10  ;;  %602 = vrot.lane.b32.xlu0 %v4483_v54, %s4169_s10 }
  0x7c   : > { %608 = vrot.lane.b32.xlu1 %v4490_v55, %s4169_s10  ;;  %606 = vrot.lane.b32.xlu0 %v4493_v56, %s4169_s10 }
  0x80   : > { %612 = vrot.lane.b32.xlu1 %v4500_v57, %s4169_s10  ;;  %610 = vrot.lane.b32.xlu0 %v4503_v58, %s4169_s10 }
  0x84   : > { %616 = vrot.lane.b32.xlu1 %v4510_v59, %s4169_s10  ;;  %614 = vrot.lane.b32.xlu0 %v4513_v60, %s4169_s10 }
  0x88   : > { %620 = vrot.lane.b32.xlu1 %v4520_v61, %s4169_s10  ;;  %618 = vrot.lane.b32.xlu0 %v4523_v62, %s4169_s10 }
  0x8c   : > { %624 = vrot.lane.b32.xlu1 %v4530_v63, %s4169_s10  ;;  %622 = vrot.lane.b32.xlu0 %v4533_v0, %s4169_s10 }
  0xc2   : > { %v567_v1 = vpop.permute.xlu1 %566  ;;  %v563_v2 = vpop.permute.xlu0 %562 }
  0xc3   : > { %v660_v3 = vmax.f32 %v4380_v33, %v567_v1  ;;  %v658_v4 = vmax.f32 %v4383_v34, %v563_v2 }
  0xc5   : > { %v726_v9 = vrot.slane %v660_v3, 1  ;;  %v723_v10 = vrot.slane %v658_v4, 1 }
  0xc6   : > { %v569_v5 = vpop.permute.xlu1 %568  ;;  %v565_v6 = vpop.permute.xlu0 %564 }
  0xc7   : > { %v661_v7 = vmax.f32 %v4390_v35, %v569_v5  ;;  %v659_v8 = vmax.f32 %v4393_v36, %v565_v6 }
  0xc9   : > { %v727_v11 = vrot.slane %v661_v7, 1  ;;  %v724_v12 = vrot.slane %v659_v8, 1 }
  0xca   : > { %v573_v13 = vpop.permute.xlu1 %572  ;;  %v571_v14 = vpop.permute.xlu0 %570 }
  0xcb   : > { %v725_v15 = vsel %vm722_vm0, %v723_v10, %v724_v12  ;;  %v4544_v16 = vmax.f32 %v659_v8, %v724_v12  ;;  %v663_v18 = vmax.f32 %v4400_v37, %v573_v13  ;;  %v662_v19 = vmax.f32 %v4403_v38, %v571_v14 }
  0xcc   : > { %v4546_v17 = vmax.f32 %v658_v4, %v725_v15  ;;  %v728_v20 = vsel %vm722_vm0, %v726_v9, %v727_v11  ;;  %v4555_v25 = vmax.f32 %v661_v7, %v727_v11 }
  0xcd   : > { %869 = vrot.lane.b32.xlu1 %v4544_v16, %s4169_s10  ;;  %v730_v21 = vrot.slane %v663_v18, 1  ;;  %v729_v22 = vrot.slane %v662_v19, 1  ;;  %v4559_v28 = vmax.f32 %v660_v3, %v728_v20 }
  0xce   : > { %867 = vrot.lane.b32.xlu0 %v4546_v17, %s4169_s10  ;;  %v577_v23 = vpop.permute.xlu1 %576  ;;  %v575_v24 = vpop.permute.xlu0 %574  ;;  %6685 = vst [vmem:[#allocation11_spill] sm:$0xff] %v4555_v25 }
  0xcf   : > { %v665_v26 = vmax.f32 %v4410_v39, %v577_v23  ;;  %v664_v27 = vmax.f32 %v4413_v40, %v575_v24  ;;  %v731_v29 = vsel %vm722_vm0, %v729_v22, %v730_v21  ;;  %v4566_v34 = vmax.f32 %v663_v18, %v730_v21 }
  0xd0   : > { %v4570_v37 = vmax.f32 %v662_v19, %v731_v29 }
  0xd1   : > { %v733_v30 = vrot.slane %v665_v26, 1  ;;  %v732_v31 = vrot.slane %v664_v27, 1  ;;  %873 = vrot.lane.b32.xlu1 %v4555_v25, %s4169_s10 }
  0xd2   : > { %871 = vrot.lane.b32.xlu0 %v4559_v28, %s4169_s10  ;;  %v581_v32 = vpop.permute.xlu1 %580  ;;  %v579_v33 = vpop.permute.xlu0 %578 }
  0xd3   : > { %v667_v35 = vmax.f32 %v4416_v41, %v581_v32  ;;  %v666_v36 = vmax.f32 %v4419_v42, %v579_v33  ;;  %v734_v38 = vsel %vm722_vm0, %v732_v31, %v733_v30  ;;  %v4577_v3 = vmax.f32 %v665_v26, %v733_v30 }
  0xd4   : > { %v4581_v4 = vmax.f32 %v664_v27, %v734_v38 }
  0xd5   : > { %v736_v39 = vrot.slane %v667_v35, 1  ;;  %v735_v40 = vrot.slane %v666_v36, 1  ;;  %877 = vrot.lane.b32.xlu1 %v4566_v34, %s4169_s10 }
  0xd6   : > { %875 = vrot.lane.b32.xlu0 %v4570_v37, %s4169_s10  ;;  %v585_v1 = vpop.permute.xlu1 %584  ;;  %v583_v2 = vpop.permute.xlu0 %582 }
  0xd7   : > { %v669_v41 = vmax.f32 %v4426_v43, %v585_v1  ;;  %v668_v42 = vmax.f32 %v4429_v44, %v583_v2  ;;  %v737_v5 = vsel %vm722_vm0, %v735_v40, %v736_v39  ;;  %v4588_v10 = vmax.f32 %v667_v35, %v736_v39 }
  0xd8   : > { %v4592_v11 = vmax.f32 %v666_v36, %v737_v5 }
  0xd9   : > { %v739_v6 = vrot.slane %v669_v41, 1  ;;  %v738_v7 = vrot.slane %v668_v42, 1  ;;  %881 = vrot.lane.b32.xlu1 %v4577_v3, %s4169_s10 }
  0xda   : > { %879 = vrot.lane.b32.xlu0 %v4581_v4, %s4169_s10  ;;  %v589_v8 = vpop.permute.xlu1 %588  ;;  %v587_v9 = vpop.permute.xlu0 %586 }
  0xdb   : > { %v671_v43 = vmax.f32 %v4436_v45, %v589_v8  ;;  %v670_v44 = vmax.f32 %v4439_v46, %v587_v9  ;;  %v740_v12 = vsel %vm722_vm0, %v738_v7, %v739_v6  ;;  %v4599_v19 = vmax.f32 %v669_v41, %v739_v6 }
  0xdc   : > { %v4603_v20 = vmax.f32 %v668_v42, %v740_v12 }
  0xdd   : > { %v742_v13 = vrot.slane %v671_v43, 1  ;;  %v741_v14 = vrot.slane %v670_v44, 1  ;;  %885 = vrot.lane.b32.xlu1 %v4588_v10, %s4169_s10 }
  0xde   : > { %883 = vrot.lane.b32.xlu0 %v4592_v11, %s4169_s10  ;;  %v593_v15 = vpop.permute.xlu1 %592  ;;  %v591_v18 = vpop.permute.xlu0 %590 }
  0xdf   : > { %v673_v45 = vmax.f32 %v4446_v47, %v593_v15  ;;  %v672_v46 = vmax.f32 %v4449_v48, %v591_v18  ;;  %v743_v21 = vsel %vm722_vm0, %v741_v14, %v742_v13  ;;  %v4610_v27 = vmax.f32 %v671_v43, %v742_v13 }
  0xe0   : > { %v4614_v29 = vmax.f32 %v670_v44, %v743_v21 }
  0xe1   : > { %v745_v22 = vrot.slane %v673_v45, 1  ;;  %v744_v23 = vrot.slane %v672_v46, 1  ;;  %889 = vrot.lane.b32.xlu1 %v4599_v19, %s4169_s10 }
  0xe2   : > { %887 = vrot.lane.b32.xlu0 %v4603_v20, %s4169_s10  ;;  %v597_v24 = vpop.permute.xlu1 %596  ;;  %v595_v26 = vpop.permute.xlu0 %594 }
  0xe3   : > { %v675_v47 = vmax.f32 %v4460_v49, %v597_v24  ;;  %v674_v48 = vmax.f32 %v4463_v50, %v595_v26  ;;  %v746_v30 = vsel %vm722_vm0, %v744_v23, %v745_v22  ;;  %v4621_v36 = vmax.f32 %v673_v45, %v745_v22 }
  0xe4   : > { %v4625_v38 = vmax.f32 %v672_v46, %v746_v30 }
  0xe5   : > { %v748_v31 = vrot.slane %v675_v47, 1  ;;  %v747_v32 = vrot.slane %v674_v48, 1  ;;  %893 = vrot.lane.b32.xlu1 %v4610_v27, %s4169_s10 }
  0xe6   : > { %891 = vrot.lane.b32.xlu0 %v4614_v29, %s4169_s10  ;;  %v601_v33 = vpop.permute.xlu1 %600  ;;  %v599_v35 = vpop.permute.xlu0 %598 }
  0xe7   : > { %v677_v49 = vmax.f32 %v4470_v51, %v601_v33  ;;  %v676_v50 = vmax.f32 %v4473_v52, %v599_v35  ;;  %v749_v39 = vsel %vm722_vm0, %v747_v32, %v748_v31  ;;  %v4632_v42 = vmax.f32 %v675_v47, %v748_v31 }
  0xe8   : > { %v4636_v5 = vmax.f32 %v674_v48, %v749_v39 }
  0xe9   : > { %v751_v40 = vrot.slane %v677_v49, 1  ;;  %v750_v1 = vrot.slane %v676_v50, 1  ;;  %897 = vrot.lane.b32.xlu1 %v4621_v36, %s4169_s10 }
  0xea   : > { %895 = vrot.lane.b32.xlu0 %v4625_v38, %s4169_s10  ;;  %v605_v2 = vpop.permute.xlu1 %604  ;;  %v603_v41 = vpop.permute.xlu0 %602 }
  0xeb   : > { %v679_v51 = vmax.f32 %v4480_v53, %v605_v2  ;;  %v678_v52 = vmax.f32 %v4483_v54, %v603_v41  ;;  %v752_v6 = vsel %vm722_vm0, %v750_v1, %v751_v40  ;;  %v4643_v44 = vmax.f32 %v677_v49, %v751_v40 }
  0xec   : > { %v4647_v12 = vmax.f32 %v676_v50, %v752_v6 }
  0xed   : > { %v754_v7 = vrot.slane %v679_v51, 1  ;;  %v753_v8 = vrot.slane %v678_v52, 1  ;;  %901 = vrot.lane.b32.xlu1 %v4632_v42, %s4169_s10 }
  0xee   : > { %899 = vrot.lane.b32.xlu0 %v4636_v5, %s4169_s10  ;;  %v609_v9 = vpop.permute.xlu1 %608  ;;  %v607_v43 = vpop.permute.xlu0 %606 }
  0xef   : > { %v681_v53 = vmax.f32 %v4490_v55, %v609_v9  ;;  %v680_v54 = vmax.f32 %v4493_v56, %v607_v43  ;;  %v755_v13 = vsel %vm722_vm0, %v753_v8, %v754_v7  ;;  %v4654_v46 = vmax.f32 %v679_v51, %v754_v7 }
  0xf0   : > { %v4658_v21 = vmax.f32 %v678_v52, %v755_v13 }
  0xf1   : > { %v757_v14 = vrot.slane %v681_v53, 1  ;;  %v756_v15 = vrot.slane %v680_v54, 1  ;;  %905 = vrot.lane.b32.xlu1 %v4643_v44, %s4169_s10 }
  0xf2   : > { %903 = vrot.lane.b32.xlu0 %v4647_v12, %s4169_s10  ;;  %v613_v18 = vpop.permute.xlu1 %612  ;;  %v611_v45 = vpop.permute.xlu0 %610 }
  0xf3   : > { %v683_v55 = vmax.f32 %v4500_v57, %v613_v18  ;;  %v682_v56 = vmax.f32 %v4503_v58, %v611_v45  ;;  %v758_v22 = vsel %vm722_vm0, %v756_v15, %v757_v14  ;;  %v4665_v48 = vmax.f32 %v681_v53, %v757_v14 }
  0xf4   : > { %v4669_v30 = vmax.f32 %v680_v54, %v758_v22 }
  0xf5   : > { %v760_v23 = vrot.slane %v683_v55, 1  ;;  %v759_v24 = vrot.slane %v682_v56, 1  ;;  %909 = vrot.lane.b32.xlu1 %v4654_v46, %s4169_s10  ;;  %6686 = vst [vmem:[#allocation12_spill] sm:$0xff] %v4665_v48 }
  0xf6   : > { %907 = vrot.lane.b32.xlu0 %v4658_v21, %s4169_s10  ;;  %v617_v26 = vpop.permute.xlu1 %616  ;;  %v615_v47 = vpop.permute.xlu0 %614 }
  0xf7   : > { %v685_v57 = vmax.f32 %v4510_v59, %v617_v26  ;;  %v684_v58 = vmax.f32 %v4513_v60, %v615_v47  ;;  %v761_v31 = vsel %vm722_vm0, %v759_v24, %v760_v23  ;;  %v4676_v50 = vmax.f32 %v683_v55, %v760_v23 }
  0xf8   : > { %v4680_v39 = vmax.f32 %v682_v56, %v761_v31 }
  0xf9   : > { %v763_v32 = vrot.slane %v685_v57, 1  ;;  %v762_v33 = vrot.slane %v684_v58, 1  ;;  %913 = vrot.lane.b32.xlu1 %v4665_v48, %s4169_s10 }
  0xfa   : > { %911 = vrot.lane.b32.xlu0 %v4669_v30, %s4169_s10  ;;  %v621_v35 = vpop.permute.xlu1 %620  ;;  %v619_v49 = vpop.permute.xlu0 %618 }
  0xfb   : > { %v687_v59 = vmax.f32 %v4520_v61, %v621_v35  ;;  %v686_v60 = vmax.f32 %v4523_v62, %v619_v49  ;;  %v764_v40 = vsel %vm722_vm0, %v762_v33, %v763_v32  ;;  %v4687_v52 = vmax.f32 %v685_v57, %v763_v32 }
  0xfc   : > { %v4691_v6 = vmax.f32 %v684_v58, %v764_v40 }
  0xfd   : > { %v766_v1 = vrot.slane %v687_v59, 1  ;;  %v765_v2 = vrot.slane %v686_v60, 1  ;;  %917 = vrot.lane.b32.xlu1 %v4676_v50, %s4169_s10 }
  0xfe   : > { %915 = vrot.lane.b32.xlu0 %v4680_v39, %s4169_s10  ;;  %v625_v41 = vpop.permute.xlu1 %624  ;;  %v623_v51 = vpop.permute.xlu0 %622 }
  0xff   : > { %v689_v61 = vmax.f32 %v4530_v63, %v625_v41  ;;  %v688_v62 = vmax.f32 %v4533_v0, %v623_v51  ;;  %v767_v7 = vsel %vm722_vm0, %v765_v2, %v766_v1  ;;  %v4698_v43 = vmax.f32 %v687_v59, %v766_v1 }
 0x100   : > { %v4700_v53 = vmax.f32 %v686_v60, %v767_v7 }
 0x101   : > { %v769_v8 = vrot.slane %v689_v61, 1  ;;  %v768_v9 = vrot.slane %v688_v62, 1  ;;  %921 = vrot.lane.b32.xlu1 %v4687_v52, %s4169_s10 }
 0x102   : > { %919 = vrot.lane.b32.xlu0 %v4691_v6, %s4169_s10 }
 0x103   : > { %v770_v63 = vsel %vm722_vm0, %v768_v9, %v769_v8  ;;  %v4707_v0 = vmax.f32 %v689_v61, %v769_v8  ;;  %vm2026_vm0 = vcmask 228352  }
 0x104   : > { %v4709_v54 = vmax.f32 %v688_v62, %v770_v63 }
 0x105   : > { %925 = vrot.lane.b32.xlu1 %v4698_v43, %s4169_s10 }
 0x106   : > { %923 = vrot.lane.b32.xlu0 %v4700_v53, %s4169_s10 }
 0x109   : > { %929 = vrot.lane.b32.xlu1 %v4707_v0, %s4169_s10 }
 0x10a   : > { %927 = vrot.lane.b32.xlu0 %v4709_v54, %s4169_s10  ;;  %s4184_s10 = smov 117  }
 0x10d   : > { %965 = vrot.lane.b32.xlu1 %v4544_v16, %s4170_s12 }
 0x10e   : > { %963 = vrot.lane.b32.xlu0 %v4546_v17, %s4170_s12 }
 0x111   : > { %969 = vrot.lane.b32.xlu1 %v4555_v25, %s4170_s12 }
 0x112   : > { %967 = vrot.lane.b32.xlu0 %v4559_v28, %s4170_s12 }
 0x115   : > { %973 = vrot.lane.b32.xlu1 %v4566_v34, %s4170_s12 }
 0x116   : > { %971 = vrot.lane.b32.xlu0 %v4570_v37, %s4170_s12 }
 0x119   : > { %977 = vrot.lane.b32.xlu1 %v4577_v3, %s4170_s12 }
 0x11a   : > { %975 = vrot.lane.b32.xlu0 %v4581_v4, %s4170_s12 }
 0x11d   : > { %981 = vrot.lane.b32.xlu1 %v4588_v10, %s4170_s12 }
 0x11e   : > { %979 = vrot.lane.b32.xlu0 %v4592_v11, %s4170_s12 }
 0x121   : > { %985 = vrot.lane.b32.xlu1 %v4599_v19, %s4170_s12 }
 0x122   : > { %983 = vrot.lane.b32.xlu0 %v4603_v20, %s4170_s12 }
 0x125   : > { %989 = vrot.lane.b32.xlu1 %v4610_v27, %s4170_s12 }
 0x126   : > { %987 = vrot.lane.b32.xlu0 %v4614_v29, %s4170_s12 }
 0x129   : > { %993 = vrot.lane.b32.xlu1 %v4621_v36, %s4170_s12 }
 0x12a   : > { %991 = vrot.lane.b32.xlu0 %v4625_v38, %s4170_s12 }
 0x12d   : > { %997 = vrot.lane.b32.xlu1 %v4632_v42, %s4170_s12 }
 0x12e   : > { %995 = vrot.lane.b32.xlu0 %v4636_v5, %s4170_s12 }
 0x131   : > { %1001 = vrot.lane.b32.xlu1 %v4643_v44, %s4170_s12 }
 0x132   : > { %999 = vrot.lane.b32.xlu0 %v4647_v12, %s4170_s12 }
 0x135   : > { %1005 = vrot.lane.b32.xlu1 %v4654_v46, %s4170_s12 }
 0x136   : > { %1003 = vrot.lane.b32.xlu0 %v4658_v21, %s4170_s12 }
 0x139   : > { %1009 = vrot.lane.b32.xlu1 %v4665_v48, %s4170_s12 }
 0x13a   : > { %1007 = vrot.lane.b32.xlu0 %v4669_v30, %s4170_s12 }
 0x13d   : > { %1013 = vrot.lane.b32.xlu1 %v4676_v50, %s4170_s12 }
 0x13e   : > { %1011 = vrot.lane.b32.xlu0 %v4680_v39, %s4170_s12 }
 0x13f   : > { %v4767_v13 = vpop.permute.xlu1 %869 }
 0x140   : > { %v4769_v14 = vpop.permute.xlu0 %867 }
 0x141   : > { %1017 = vrot.lane.b32.xlu1 %v4687_v52, %s4170_s12 }
 0x142   : > { %1015 = vrot.lane.b32.xlu0 %v4691_v6, %s4170_s12 }
 0x143   : > { %v4775_v15 = vpop.permute.xlu1 %873 }
 0x144   : > { %6687 = vst [vmem:[#allocation13_spill] sm:$0xff] %v4775_v15  ;;  %v4777_v18 = vpop.permute.xlu0 %871 }
 0x145   : > { %6688 = vst [vmem:[#allocation14_spill] sm:$0xff] %v4777_v18  ;;  %1021 = vrot.lane.b32.xlu1 %v4698_v43, %s4170_s12 }
 0x146   : > { %1019 = vrot.lane.b32.xlu0 %v4700_v53, %s4170_s12 }
 0x147   : > { %v4783_v45 = vpop.permute.xlu1 %877 }
 0x148   : > { %v4785_v55 = vpop.permute.xlu0 %875 }
 0x149   : > { %1025 = vrot.lane.b32.xlu1 %v4707_v0, %s4170_s12 }
 0x14a   : > { %1023 = vrot.lane.b32.xlu0 %v4709_v54, %s4170_s12  ;;  %s4185_s12 = smov 19  }
 0x14b   : > { %v4791_v56 = vpop.permute.xlu1 %881 }
 0x14c   : > { %v4793_v22 = vpop.permute.xlu0 %879 }
 0x14d   : > { %1061 = vrot.lane.b32.xlu1 %v4544_v16, %s4171_s11 }
 0x14e   : > { %1059 = vrot.lane.b32.xlu0 %v4546_v17, %s4171_s11 }
 0x14f   : > { %v4799_v23 = vpop.permute.xlu1 %885 }
 0x150   : > { %v4801_v24 = vpop.permute.xlu0 %883 }
 0x151   : > { %1065 = vrot.lane.b32.xlu1 %v4555_v25, %s4171_s11 }
 0x152   : > { %1063 = vrot.lane.b32.xlu0 %v4559_v28, %s4171_s11 }
 0x153   : > { %v4807_v26 = vpop.permute.xlu1 %889 }
 0x154   : > { %v4809_v47 = vpop.permute.xlu0 %887 }
 0x155   : > { %1069 = vrot.lane.b32.xlu1 %v4566_v34, %s4171_s11 }
 0x156   : > { %1067 = vrot.lane.b32.xlu0 %v4570_v37, %s4171_s11 }
 0x157   : > { %v4815_v57 = vpop.permute.xlu1 %893 }
 0x158   : > { %v4817_v58 = vpop.permute.xlu0 %891 }
 0x159   : > { %1073 = vrot.lane.b32.xlu1 %v4577_v3, %s4171_s11 }
 0x15a   : > { %1071 = vrot.lane.b32.xlu0 %v4581_v4, %s4171_s11 }
 0x15b   : > { %v4823_v31 = vpop.permute.xlu1 %897 }
 0x15c   : > { %v4825_v32 = vpop.permute.xlu0 %895 }
 0x15d   : > { %1077 = vrot.lane.b32.xlu1 %v4588_v10, %s4171_s11 }
 0x15e   : > { %1075 = vrot.lane.b32.xlu0 %v4592_v11, %s4171_s11 }
 0x15f   : > { %v4831_v33 = vpop.permute.xlu1 %901 }
 0x160   : > { %v4833_v35 = vpop.permute.xlu0 %899 }
 0x161   : > { %1081 = vrot.lane.b32.xlu1 %v4599_v19, %s4171_s11 }
 0x162   : > { %1079 = vrot.lane.b32.xlu0 %v4603_v20, %s4171_s11 }
 0x163   : > { %v4839_v49 = vpop.permute.xlu1 %905 }
 0x164   : > { %6689 = vst [vmem:[#allocation15_spill] sm:$0xff] %v4839_v49  ;;  %v4841_v59 = vpop.permute.xlu0 %903 }
 0x165   : > { %1085 = vrot.lane.b32.xlu1 %v4610_v27, %s4171_s11 }
 0x166   : > { %1083 = vrot.lane.b32.xlu0 %v4614_v29, %s4171_s11 }
 0x167   : > { %v4847_v60 = vpop.permute.xlu1 %909 }
 0x168   : > { %v4849_v40 = vpop.permute.xlu0 %907 }
 0x169   : > { %1089 = vrot.lane.b32.xlu1 %v4621_v36, %s4171_s11 }
 0x16a   : > { %1087 = vrot.lane.b32.xlu0 %v4625_v38, %s4171_s11 }
 0x16b   : > { %v4855_v1 = vpop.permute.xlu1 %913 }
 0x16c   : > { %6690 = vst [vmem:[#allocation16_spill] sm:$0xff] %v4855_v1  ;;  %v4857_v2 = vpop.permute.xlu0 %911  ;;  %v1445_v1 = vsel %vm1443_vm1, %v4544_v16, %v4767_v13 }
 0x16d   : > { %6691 = vst [vmem:[#allocation17_spill] sm:$0xff] %v4857_v2  ;;  %1195 = vrot.lane.b32.xlu1 %v4658_v21, %s4172_s15  ;;  %v1444_v2 = vsel %vm1443_vm1, %v4546_v17, %v4769_v14 }
 0x16e   : > { %1099 = vrot.lane.b32.xlu0 %v4658_v21, %s4171_s11 }
 0x16f   : > { %v4863_v41 = vpop.permute.xlu1 %917 }
 0x170   : > { %v4865_v51 = vpop.permute.xlu0 %915 }
 0x171   : > { %1291 = vrot.lane.b32.xlu1 %v4658_v21, %s4173_s16 }
 0x172   : > { %1095 = vrot.lane.b32.xlu0 %v4647_v12, %s4171_s11 }
 0x173   : > { %v4871_v61 = vpop.permute.xlu1 %921 }
 0x174   : > { %6692 = vst [vmem:[#allocation18_spill] sm:$0xff] %v4871_v61  ;;  %v4873_v62 = vpop.permute.xlu0 %919 }
 0x175   : > { %6693 = vst [vmem:[#allocation19_spill] sm:$0xff] %v4873_v62  ;;  %1111 = vrot.lane.b32.xlu1 %v4691_v6, %s4171_s11 }
 0x176   : > { %1101 = vrot.lane.b32.xlu0 %v4654_v46, %s4171_s11 }
 0x177   : > { %v4879_v7 = vpop.permute.xlu1 %925 }
 0x178   : > { %v4881_v8 = vpop.permute.xlu0 %923 }
 0x179   : > { %1191 = vrot.lane.b32.xlu1 %v4647_v12, %s4172_s15 }
 0x17a   : > { %1163 = vrot.lane.b32.xlu0 %v4570_v37, %s4172_s15 }
 0x17b   : > { %v4887_v9 = vpop.permute.xlu1 %929 }
 0x17c   : > { %v4889_v63 = vpop.permute.xlu0 %927 }
 0x17d   : > { %1103 = vrot.lane.b32.xlu1 %v4669_v30, %s4171_s11 }
 0x17e   : > { %1387 = vrot.lane.b32.xlu0 %v4658_v21, %s4174_s19 }
 0x17f   : > { %v966_v15 = vpop.permute.xlu1 %965 }
 0x180   : > { %v4902_v18 = vsel %vm1476_vm2, %v1445_v1, %v966_v15  ;;  %v964_v61 = vpop.permute.xlu0 %963  ;;  %v1451_v1 = vsel %vm1443_vm1, %v4577_v3, %v4791_v56  ;;  %v1453_v56 = vsel %vm1443_vm1, %v4588_v10, %v4799_v23  ;;  %v1455_v23 = vsel %vm1443_vm1, %v4599_v19, %v4807_v26 }
 0x181   : > { %6694 = vst [vmem:[#allocation20_spill] sm:$0xff] %v4902_v18  ;;  %v4905_v62 = vsel %vm1476_vm2, %v1444_v2, %v964_v61  ;;  %1207 = vrot.lane.b32.xlu1 %v4691_v6, %s4172_s15  ;;  %v1450_v61 = vsel %vm1443_vm1, %v4581_v4, %v4793_v22  ;;  %v1452_v22 = vsel %vm1443_vm1, %v4592_v11, %v4801_v24 }
 0x182   : > { %6695 = vst [vmem:[#allocation21_spill] sm:$0xff] %v4905_v62  ;;  %1197 = vrot.lane.b32.xlu0 %v4654_v46, %s4172_s15  ;;  %v1454_v24 = vsel %vm1443_vm1, %v4603_v20, %v4809_v47  ;;  %v1457_v26 = vsel %vm1443_vm1, %v4610_v27, %v4815_v57  ;;  %v1456_v47 = vsel %vm1443_vm1, %v4614_v29, %v4817_v58 }
 0x183   : > { %v4911_v49 = vpop.permute.xlu1 %969  ;;  %v1459_v57 = vsel %vm1443_vm1, %v4621_v36, %v4823_v31  ;;  %v1458_v58 = vsel %vm1443_vm1, %v4625_v38, %v4825_v32  ;;  %v1461_v31 = vsel %vm1443_vm1, %v4632_v42, %v4831_v33  ;;  %v1460_v32 = vsel %vm1443_vm1, %v4636_v5, %v4833_v35 }
 0x184   : > { %6696 = vst [vmem:[#allocation22_spill] sm:$0xff] %v4911_v49  ;;  %v4913_v13 = vpop.permute.xlu0 %967 }
 0x185   : > { %6697 = vst [vmem:[#allocation23_spill] sm:$0xff] %v4913_v13  ;;  %1287 = vrot.lane.b32.xlu1 %v4647_v12, %s4173_s16 }
 0x186   : > { %1259 = vrot.lane.b32.xlu0 %v4570_v37, %s4173_s16 }
 0x187   : > { %v4919_v14 = vpop.permute.xlu1 %973 }
 0x188   : > { %v4921_v15 = vpop.permute.xlu0 %971 }
 0x189   : > { %1107 = vrot.lane.b32.xlu1 %v4680_v39, %s4171_s11 }
 0x18a   : > { %1097 = vrot.lane.b32.xlu0 %v4643_v44, %s4171_s11 }
 0x18b   : > { %v978_v2 = vpop.permute.xlu1 %977 }
 0x18c   : > { %v4934_v18 = vsel %vm1476_vm2, %v1451_v1, %v978_v2  ;;  %v976_v62 = vpop.permute.xlu0 %975 }
 0x18d   : > { %6698 = vst [vmem:[#allocation24_spill] sm:$0xff] %v4934_v18  ;;  %v4937_v49 = vsel %vm1476_vm2, %v1450_v61, %v976_v62  ;;  %1159 = vrot.lane.b32.xlu1 %v4559_v28, %s4172_s15 }
 0x18e   : > { %6699 = vst [vmem:[#allocation25_spill] sm:$0xff] %v4937_v49  ;;  %1119 = vrot.lane.b32.xlu0 %v4709_v54, %s4171_s11 }
 0x18f   : > { %v982_v13 = vpop.permute.xlu1 %981 }
 0x190   : > { %v4950_v1 = vsel %vm1476_vm2, %v1453_v56, %v982_v13  ;;  %v980_v62 = vpop.permute.xlu0 %979 }
 0x191   : > { %6700 = vst [vmem:[#allocation26_spill] sm:$0xff] %v4950_v1  ;;  %v4953_v2 = vsel %vm1476_vm2, %v1452_v22, %v980_v62  ;;  %1293 = vrot.lane.b32.xlu1 %v4654_v46, %s4173_s16 }
 0x192   : > { %6701 = vst [vmem:[#allocation27_spill] sm:$0xff] %v4953_v2  ;;  %1199 = vrot.lane.b32.xlu0 %v4669_v30, %s4172_s15 }
 0x193   : > { %v986_v61 = vpop.permute.xlu1 %985 }
 0x194   : > { %v4966_v13 = vsel %vm1476_vm2, %v1455_v23, %v986_v61  ;;  %v984_v56 = vpop.permute.xlu0 %983 }
 0x195   : > { %6702 = vst [vmem:[#allocation28_spill] sm:$0xff] %v4966_v13  ;;  %v4969_v22 = vsel %vm1476_vm2, %v1454_v24, %v984_v56  ;;  %1355 = vrot.lane.b32.xlu1 %v4570_v37, %s4174_s19 }
 0x196   : > { %6703 = vst [vmem:[#allocation29_spill] sm:$0xff] %v4969_v22  ;;  %1303 = vrot.lane.b32.xlu0 %v4691_v6, %s4173_s16 }
 0x197   : > { %v990_v62 = vpop.permute.xlu1 %989 }
 0x198   : > { %v4982_v23 = vsel %vm1476_vm2, %v1457_v26, %v990_v62  ;;  %v988_v61 = vpop.permute.xlu0 %987 }
 0x199   : > { %6704 = vst [vmem:[#allocation30_spill] sm:$0xff] %v4982_v23  ;;  %v4985_v24 = vsel %vm1476_vm2, %v1456_v47, %v988_v61  ;;  %1113 = vrot.lane.b32.xlu1 %v4687_v52, %s4171_s11 }
 0x19a   : > { %6705 = vst [vmem:[#allocation31_spill] sm:$0xff] %v4985_v24  ;;  %1383 = vrot.lane.b32.xlu0 %v4647_v12, %s4174_s19 }
 0x19b   : > { %v994_v56 = vpop.permute.xlu1 %993 }
 0x19c   : > { %v4998_v26 = vsel %vm1476_vm2, %v1459_v57, %v994_v56  ;;  %v992_v62 = vpop.permute.xlu0 %991 }
 0x19d   : > { %6706 = vst [vmem:[#allocation32_spill] sm:$0xff] %v4998_v26  ;;  %v5001_v47 = vsel %vm1476_vm2, %v1458_v58, %v992_v62  ;;  %1175 = vrot.lane.b32.xlu1 %v4603_v20, %s4172_s15 }
 0x19e   : > { %6707 = vst [vmem:[#allocation33_spill] sm:$0xff] %v5001_v47  ;;  %1165 = vrot.lane.b32.xlu0 %v4566_v34, %s4172_s15 }
 0x19f   : > { %v998_v61 = vpop.permute.xlu1 %997 }
 0x1a0   : > { %v5014_v57 = vsel %vm1476_vm2, %v1461_v31, %v998_v61  ;;  %v996_v56 = vpop.permute.xlu0 %995 }
 0x1a1   : > { %6708 = vst [vmem:[#allocation34_spill] sm:$0xff] %v5014_v57  ;;  %v5017_v58 = vsel %vm1476_vm2, %v1460_v32, %v996_v56  ;;  %1203 = vrot.lane.b32.xlu1 %v4680_v39, %s4172_s15  ;;  %v1469_v56 = vsel %vm1443_vm1, %v4676_v50, %v4863_v41 }
 0x1a2   : > { %6709 = vst [vmem:[#allocation35_spill] sm:$0xff] %v5017_v58  ;;  %1193 = vrot.lane.b32.xlu0 %v4643_v44, %s4172_s15  ;;  %v1468_v58 = vsel %vm1443_vm1, %v4680_v39, %v4865_v51  ;;  %v1473_v51 = vsel %vm1443_vm1, %v4698_v43, %v4879_v7  ;;  %v1475_v7 = vsel %vm1443_vm1, %v4707_v0, %v4887_v9 }
 0x1a3   : > { %v5023_v62 = vpop.permute.xlu1 %1001 }
 0x1a4   : > { %v5025_v33 = vpop.permute.xlu0 %999 }
 0x1a5   : > { %1255 = vrot.lane.b32.xlu1 %v4559_v28, %s4173_s16 }
 0x1a6   : > { %1215 = vrot.lane.b32.xlu0 %v4709_v54, %s4172_s15 }
 0x1a7   : > { %v5031_v35 = vpop.permute.xlu1 %1005 }
 0x1a8   : > { %v5033_v31 = vpop.permute.xlu0 %1003 }
 0x1a9   : > { %1389 = vrot.lane.b32.xlu1 %v4654_v46, %s4174_s19 }
 0x1aa   : > { %1295 = vrot.lane.b32.xlu0 %v4669_v30, %s4173_s16 }
 0x1ab   : > { %v5039_v61 = vpop.permute.xlu1 %1009 }
 0x1ac   : > { %6710 = vst [vmem:[#allocation36_spill] sm:$0xff] %v5039_v61  ;;  %v5041_v32 = vpop.permute.xlu0 %1007 }
 0x1ad   : > { %6711 = vst [vmem:[#allocation37_spill] sm:$0xff] %v5041_v32  ;;  %1105 = vrot.lane.b32.xlu1 %v4665_v48, %s4171_s11 }
 0x1ae   : > { %1399 = vrot.lane.b32.xlu0 %v4691_v6, %s4174_s19 }
 0x1af   : > { %v1014_v57 = vpop.permute.xlu1 %1013 }
 0x1b0   : > { %v5054_v47 = vsel %vm1476_vm2, %v1469_v56, %v1014_v57  ;;  %v1012_v26 = vpop.permute.xlu0 %1011  ;;  %v1472_v57 = vsel %vm1443_vm1, %v4700_v53, %v4881_v8  ;;  %v1474_v8 = vsel %vm1443_vm1, %v4709_v54, %v4889_v63 }
 0x1b1   : > { %6712 = vst [vmem:[#allocation38_spill] sm:$0xff] %v5054_v47  ;;  %v5057_v24 = vsel %vm1476_vm2, %v1468_v58, %v1012_v26  ;;  %1167 = vrot.lane.b32.xlu1 %v4581_v4, %s4172_s15 }
 0x1b2   : > { %6713 = vst [vmem:[#allocation39_spill] sm:$0xff] %v5057_v24  ;;  %1115 = vrot.lane.b32.xlu0 %v4700_v53, %s4171_s11 }
 0x1b3   : > { %v5063_v23 = vpop.permute.xlu1 %1017 }
 0x1b4   : > { %v5065_v41 = vpop.permute.xlu0 %1015 }
 0x1b5   : > { %1261 = vrot.lane.b32.xlu1 %v4566_v34, %s4173_s16 }
 0x1b6   : > { %1209 = vrot.lane.b32.xlu0 %v4687_v52, %s4172_s15 }
 0x1b7   : > { %v1022_v26 = vpop.permute.xlu1 %1021 }
 0x1b8   : > { %v5078_v58 = vsel %vm1476_vm2, %v1473_v51, %v1022_v26  ;;  %v1020_v56 = vpop.permute.xlu0 %1019 }
 0x1b9   : > { %6714 = vst [vmem:[#allocation40_spill] sm:$0xff] %v5078_v58  ;;  %v5081_v47 = vsel %vm1476_vm2, %v1472_v57, %v1020_v56  ;;  %1289 = vrot.lane.b32.xlu1 %v4643_v44, %s4173_s16 }
 0x1ba   : > { %6715 = vst [vmem:[#allocation41_spill] sm:$0xff] %v5081_v47  ;;  %1271 = vrot.lane.b32.xlu0 %v4603_v20, %s4173_s16 }
 0x1bb   : > { %v1026_v13 = vpop.permute.xlu1 %1025 }
 0x1bc   : > { %v5094_v51 = vsel %vm1476_vm2, %v1475_v7, %v1026_v13  ;;  %v1024_v26 = vpop.permute.xlu0 %1023 }
 0x1bd   : > { %6716 = vst [vmem:[#allocation42_spill] sm:$0xff] %v5094_v51  ;;  %v5097_v57 = vsel %vm1476_vm2, %v1474_v8, %v1024_v26  ;;  %1311 = vrot.lane.b32.xlu1 %v4709_v54, %s4173_s16 }
 0x1be   : > { %6717 = vst [vmem:[#allocation43_spill] sm:$0xff] %v5097_v57  ;;  %1299 = vrot.lane.b32.xlu0 %v4680_v39, %s4173_s16 }
 0x1bf   : > { %v5103_v56 = vpop.permute.xlu1 %1061 }
 0x1c0   : > { %6718 = vst [vmem:[#allocation44_spill] sm:$0xff] %v5103_v56  ;;  %v5105_v9 = vpop.permute.xlu0 %1059 }
 0x1c1   : > { %6719 = vst [vmem:[#allocation45_spill] sm:$0xff] %v5105_v9  ;;  %1391 = vrot.lane.b32.xlu1 %v4669_v30, %s4174_s19 }
 0x1c2   : > { %1351 = vrot.lane.b32.xlu0 %v4559_v28, %s4174_s19 }
 0x1c3   : > { %v5111_v63 = vpop.permute.xlu1 %1065 }
 0x1c4   : > { %6720 = vst [vmem:[#allocation46_spill] sm:$0xff] %v5111_v63  ;;  %v5113_v13 = vpop.permute.xlu0 %1063 }
 0x1c5   : > { %1121 = vrot.lane.b32.xlu1 %v4707_v0, %s4171_s11 }
 0x1c6   : > { %1109 = vrot.lane.b32.xlu0 %v4676_v50, %s4171_s11 }
 0x1c7   : > { %v5119_v7 = vpop.permute.xlu1 %1069 }
 0x1c8   : > { %v5121_v8 = vpop.permute.xlu0 %1067 }
 0x1c9   : > { %1171 = vrot.lane.b32.xlu1 %v4592_v11, %s4172_s15 }
 0x1ca   : > { %1161 = vrot.lane.b32.xlu0 %v4555_v25, %s4172_s15 }
 0x1cb   : > { %v5127_v26 = vpop.permute.xlu1 %1073 }
 0x1cc   : > { %6721 = vst [vmem:[#allocation47_spill] sm:$0xff] %v5127_v26  ;;  %v5129_v56 = vpop.permute.xlu0 %1071 }
 0x1cd   : > { %6722 = vst [vmem:[#allocation48_spill] sm:$0xff] %v5129_v56  ;;  %1201 = vrot.lane.b32.xlu1 %v4665_v48, %s4172_s15 }
 0x1ce   : > { %1183 = vrot.lane.b32.xlu0 %v4625_v38, %s4172_s15 }
 0x1cf   : > { %v5135_v9 = vpop.permute.xlu1 %1077 }
 0x1d0   : > { %6723 = vst [vmem:[#allocation49_spill] sm:$0xff] %v5135_v9  ;;  %v5137_v58 = vpop.permute.xlu0 %1075 }
 0x1d1   : > { %6724 = vst [vmem:[#allocation50_spill] sm:$0xff] %v5137_v58  ;;  %1263 = vrot.lane.b32.xlu1 %v4581_v4, %s4173_s16 }
 0x1d2   : > { %1211 = vrot.lane.b32.xlu0 %v4700_v53, %s4172_s15 }
 0x1d3   : > { %v5143_v51 = vpop.permute.xlu1 %1081 }
 0x1d4   : > { %6725 = vst [vmem:[#allocation51_spill] sm:$0xff] %v5143_v51  ;;  %v5145_v47 = vpop.permute.xlu0 %1079 }
 0x1d5   : > { %6726 = vst [vmem:[#allocation52_spill] sm:$0xff] %v5145_v47  ;;  %1357 = vrot.lane.b32.xlu1 %v4566_v34, %s4174_s19 }
 0x1d6   : > { %1305 = vrot.lane.b32.xlu0 %v4687_v52, %s4173_s16 }
 0x1d7   : > { %v5151_v2 = vpop.permute.xlu1 %1085 }
 0x1d8   : > { %6727 = vst [vmem:[#allocation53_spill] sm:$0xff] %v5151_v2  ;;  %v5153_v1 = vpop.permute.xlu0 %1083 }
 0x1d9   : > { %6728 = vst [vmem:[#allocation54_spill] sm:$0xff] %v5153_v1  ;;  %1385 = vrot.lane.b32.xlu1 %v4643_v44, %s4174_s19 }
 0x1da   : > { %1367 = vrot.lane.b32.xlu0 %v4603_v20, %s4174_s19 }
 0x1db   : > { %v5159_v58 = vpop.permute.xlu1 %1089 }
 0x1dc   : > { %6729 = vst [vmem:[#allocation55_spill] sm:$0xff] %v5159_v58  ;;  %v5161_v51 = vpop.permute.xlu0 %1087 }
 0x1dd   : > { %6730 = vst [vmem:[#allocation56_spill] sm:$0xff] %v5161_v51  ;;  %1407 = vrot.lane.b32.xlu1 %v4709_v54, %s4174_s19 }
 0x1de   : > { %1395 = vrot.lane.b32.xlu0 %v4680_v39, %s4174_s19 }
 0x1df   : > { %v5167_v9 = vpop.permute.xlu1 %1195 }
 0x1e0   : > { %v5169_v2 = vpop.permute.xlu0 %1099 }
 0x1e1   : > { %1205 = vrot.lane.b32.xlu1 %v4676_v50, %s4172_s15 }
 0x1e2   : > { %1177 = vrot.lane.b32.xlu0 %v4599_v19, %s4172_s15 }
 0x1e3   : > { %v5175_v20 = vpop.permute.xlu1 %1291 }
 0x1e4   : > { %v5177_v58 = vpop.permute.xlu0 %1095 }
 0x1e5   : > { %1257 = vrot.lane.b32.xlu1 %v4555_v25, %s4173_s16 }
 0x1e6   : > { %1217 = vrot.lane.b32.xlu0 %v4707_v0, %s4172_s15 }
 0x1e7   : > { %v5183_v39 = vpop.permute.xlu1 %1111 }
 0x1e8   : > { %v5185_v54 = vpop.permute.xlu0 %1101 }
 0x1e9   : > { %1279 = vrot.lane.b32.xlu1 %v4625_v38, %s4173_s16 }
 0x1ea   : > { %1267 = vrot.lane.b32.xlu0 %v4592_v11, %s4173_s16 }
 0x1eb   : > { %v5191_v51 = vpop.permute.xlu1 %1191 }
 0x1ec   : > { %v5193_v1 = vpop.permute.xlu0 %1163 }
 0x1ed   : > { %1307 = vrot.lane.b32.xlu1 %v4700_v53, %s4173_s16 }
 0x1ee   : > { %1297 = vrot.lane.b32.xlu0 %v4665_v48, %s4173_s16 }
 0x1ef   : > { %v5199_v49 = vpop.permute.xlu1 %1103 }
 0x1f0   : > { %6731 = vst [vmem:[#allocation57_spill] sm:$0xff] %v5199_v49  ;;  %v5201_v56 = vpop.permute.xlu0 %1387 }
 0x1f1   : > { %1401 = vrot.lane.b32.xlu1 %v4687_v52, %s4174_s19 }
 0x1f2   : > { %1359 = vrot.lane.b32.xlu0 %v4581_v4, %s4174_s19 }
 0x1f3   : > { %v5207_v57 = vpop.permute.xlu1 %1207 }
 0x1f4   : > { %v5209_v24 = vpop.permute.xlu0 %1197 }
 0x1f5   : > { %1169 = vrot.lane.b32.xlu1 %v4577_v3, %s4172_s15 }
 0x1f6   : > { %1117 = vrot.lane.b32.xlu0 %v4698_v43, %s4171_s11 }
 0x1f7   : > { %v5215_v22 = vpop.permute.xlu1 %1287 }
 0x1f8   : > { %v5217_v47 = vpop.permute.xlu0 %1259 }
 0x1f9   : > { %1273 = vrot.lane.b32.xlu1 %v4599_v19, %s4173_s16 }
 0x1fa   : > { %1179 = vrot.lane.b32.xlu0 %v4614_v29, %s4172_s15 }
 0x1fb   : > { %v5223_v4 = vpop.permute.xlu1 %1107 }
 0x1fc   : > { %6732 = vst [vmem:[#allocation58_spill] sm:$0xff] %v5223_v4  ;;  %v5225_v18 = vpop.permute.xlu0 %1097 }
 0x1fd   : > { %1313 = vrot.lane.b32.xlu1 %v4707_v0, %s4173_s16 }
 0x1fe   : > { %1301 = vrot.lane.b32.xlu0 %v4676_v50, %s4173_s16 }
 0x1ff   : > { %v5231_v26 = vpop.permute.xlu1 %1159 }
 0x200   : > { %6733 = vst [vmem:[#allocation59_spill] sm:$0xff] %v5231_v26  ;;  %v5233_v63 = vpop.permute.xlu0 %1119 }
 0x201   : > { %6734 = vst [vmem:[#allocation60_spill] sm:$0xff] %v5233_v63  ;;  %1363 = vrot.lane.b32.xlu1 %v4592_v11, %s4174_s19 }
 0x202   : > { %1353 = vrot.lane.b32.xlu0 %v4555_v25, %s4174_s19 }
 0x203   : > { %v5239_v61 = vpop.permute.xlu1 %1293 }
 0x204   : > { %v5241_v4 = vpop.permute.xlu0 %1199 }
 0x205   : > { %6735 = vst [vmem:[#allocation61_spill] sm:$0xff] %v5241_v4  ;;  %1393 = vrot.lane.b32.xlu1 %v4665_v48, %s4174_s19 }
 0x206   : > { %1375 = vrot.lane.b32.xlu0 %v4625_v38, %s4174_s19 }
 0x207   : > { %v5247_v49 = vpop.permute.xlu1 %1355 }
 0x208   : > { %v5249_v32 = vpop.permute.xlu0 %1303 }
 0x209   : > { %1173 = vrot.lane.b32.xlu1 %v4588_v10, %s4172_s15 }
 0x20a   : > { %1403 = vrot.lane.b32.xlu0 %v4700_v53, %s4174_s19 }
 0x20b   : > { %v5255_v11 = vpop.permute.xlu1 %1113 }
 0x20c   : > { %v5257_v63 = vpop.permute.xlu0 %1383 }
 0x20d   : > { %1213 = vrot.lane.b32.xlu1 %v4698_v43, %s4172_s15 }
 0x20e   : > { %1185 = vrot.lane.b32.xlu0 %v4621_v36, %s4172_s15 }
 0x20f   : > { %v5263_v38 = vpop.permute.xlu1 %1175 }
 0x210   : > { %6736 = vst [vmem:[#allocation62_spill] sm:$0xff] %v5263_v38  ;;  %v5265_v48 = vpop.permute.xlu0 %1165 }
 0x211   : > { %1275 = vrot.lane.b32.xlu1 %v4614_v29, %s4173_s16 }
 0x212   : > { %1265 = vrot.lane.b32.xlu0 %v4577_v3, %s4173_s16 }
 0x213   : > { %v5271_v53 = vpop.permute.xlu1 %1203 }
 0x214   : > { %6737 = vst [vmem:[#allocation63_spill] sm:$0xff] %v5271_v53  ;;  %v5273_v25 = vpop.permute.xlu0 %1193 }
 0x215   : > { %1397 = vrot.lane.b32.xlu1 %v4676_v50, %s4174_s19 }
 0x216   : > { %1369 = vrot.lane.b32.xlu0 %v4599_v19, %s4174_s19 }
 0x217   : > { %v5279_v4 = vpop.permute.xlu1 %1255 }
 0x218   : > { %v5281_v38 = vpop.permute.xlu0 %1215 }
 0x219   : > { %6738 = vst [vmem:[#allocation64_spill] sm:$0xff] %v5281_v38  ;;  %1269 = vrot.lane.b32.xlu1 %v4588_v10, %s4173_s16 }
 0x21a   : > { %1409 = vrot.lane.b32.xlu0 %v4707_v0, %s4174_s19 }
 0x21b   : > { %v1390_v26 = vpop.permute.xlu1 %1389 }
 0x21c   : > { %v5287_v53 = vpop.permute.xlu0 %1295 }
 0x21d   : > { %6739 = vst [vmem:[#allocation65_spill] sm:$0xff] %v5287_v53  ;;  %1309 = vrot.lane.b32.xlu1 %v4698_v43, %s4173_s16 }
 0x21e   : > { %1281 = vrot.lane.b32.xlu0 %v4621_v36, %s4173_s16 }
 0x21f   : > { %v5293_v19 = vpop.permute.xlu1 %1105 }
 0x220   : > { %6740 = vst [vmem:[#allocation66_spill] sm:$0xff] %v5293_v19  ;;  %v5295_v50 = vpop.permute.xlu0 %1399 }
 0x221   : > { %1371 = vrot.lane.b32.xlu1 %v4614_v29, %s4174_s19 }
 0x222   : > { %1361 = vrot.lane.b32.xlu0 %v4577_v3, %s4174_s19  ;;  %v1464_v3 = vsel %vm1443_vm1, %v4658_v21, %v4849_v40 }
 0x223   : > { %v5301_v0 = vpop.permute.xlu1 %1167 }
 0x224   : > { %6741 = vst [vmem:[#allocation67_spill] sm:$0xff] %v5301_v0  ;;  %v5303_v38 = vpop.permute.xlu0 %1115 }
 0x225   : > { %6742 = vst [vmem:[#allocation68_spill] sm:$0xff] %v5303_v38  ;;  %1365 = vrot.lane.b32.xlu1 %v4588_v10, %s4174_s19  ;;  %v1497_v10 = vsel %vm1476_vm2, %v1464_v3, %v5033_v31 }
 0x226   : > { %1181 = vrot.lane.b32.xlu0 %v4610_v27, %s4172_s15  ;;  %v1530_v0 = vsel %vm1509_vm3, %v1497_v10, %v5169_v2 }
 0x227   : > { %v5309_v53 = vpop.permute.xlu1 %1261  ;;  %v1563_v21 = vsel %vm1542_vm4, %v1530_v0, %v5167_v9  ;;  %v1465_v9 = vsel %vm1443_vm1, %v4654_v46, %v4847_v60 }
 0x228   : > { %v5311_v19 = vpop.permute.xlu0 %1209  ;;  %v1596_v40 = vsel %vm1575_vm5, %v1563_v21, %v5175_v20  ;;  %v1498_v20 = vsel %vm1476_vm2, %v1465_v9, %v5031_v35  ;;  %v1462_v35 = vsel %vm1443_vm1, %v4647_v12, %v4841_v59 }
 0x229   : > { %1405 = vrot.lane.b32.xlu1 %v4698_v43, %s4174_s19  ;;  %v1531_v10 = vsel %vm1509_vm3, %v1498_v20, %v5185_v54  ;;  %v1495_v12 = vsel %vm1476_vm2, %v1462_v35, %v5025_v33 }
 0x22a   : > { %1377 = vrot.lane.b32.xlu0 %v4621_v36, %s4174_s19  ;;  %v1564_v60 = vsel %vm1542_vm4, %v1531_v10, %v5209_v24 }
 0x22b   : > { %v5320_v29 = vpop.permute.xlu1 %1289  ;;  %v1597_v54 = vsel %vm1575_vm5, %v1564_v60, %v5239_v61 }
 0x22c   : > { %v5324_v38 = vpop.permute.xlu0 %1271  ;;  %v1630_v24 = vsel %vm1608_vm6, %v1597_v54, %v1390_v26 }
 0x22d   : > { %1373 = vrot.lane.b32.xlu1 %v4610_v27, %s4174_s19  ;;  %v1779_v9 = vrot.slane %v1630_v24, 4  ;;  %v1811_v10 = vrot.slane %v1630_v24, 5 }
 0x22e   : > { %1277 = vrot.lane.b32.xlu0 %v4610_v27, %s4173_s16  ;;  %v1629_v27 = vsel %vm1608_vm6, %v1596_v40, %v5201_v56  ;;  %v1448_v56 = vsel %vm1443_vm1, %v4570_v37, %v4785_v55 }
 0x22f   : > { %v5332_v36 = vpop.permute.xlu1 %1311  ;;  %v1667_v0 = vrot.slane %v1629_v27, 1  ;;  %v1481_v46 = vsel %vm1476_vm2, %v1448_v56, %v4921_v15  ;;  %v1699_v55 = vrot.slane %v1629_v27, 2 }
 0x230   : > { %v5336_v43 = vpop.permute.xlu0 %1299  ;;  %v1514_v37 = vsel %vm1509_vm3, %v1481_v46, %v5121_v8  ;;  %v1528_v8 = vsel %vm1509_vm3, %v1495_v12, %v5177_v58 }
 0x231   : > { %1187 = vrot.lane.b32.xlu1 %v4636_v5, %s4172_s15  ;;  %v1547_v15 = vsel %vm1542_vm4, %v1514_v37, %v5193_v1  ;;  %v1561_v26 = vsel %vm1542_vm4, %v1528_v8, %v5191_v51 }
 0x232   : > { %1091 = vrot.lane.b32.xlu0 %v4636_v5, %s4171_s11  ;;  %v1580_v59 = vsel %vm1575_vm5, %v1547_v15, %v5217_v47  ;;  %v1731_v47 = vrot.slane %v1629_v27, 3  ;;  %v1594_v58 = vsel %vm1575_vm5, %v1561_v26, %v5215_v22  ;;  %v1449_v22 = vsel %vm1443_vm1, %v4566_v34, %v4783_v45 }
 0x233   : > { %v5344_v2 = vpop.permute.xlu1 %1391  ;;  %v1613_v1 = vsel %vm1608_vm6, %v1580_v59, %v5247_v49  ;;  %v1482_v35 = vsel %vm1476_vm2, %v1449_v22, %v4919_v14  ;;  %v1843_v15 = vrot.slane %v1630_v24, 6  ;;  %v6743_v14 = vld [vmem:[#allocation15_spill] sm:$0xff] }
 0x234   : > { %v5348_v31 = vpop.permute.xlu0 %1351  ;;  %v1659_v49 = vrot.slane %v1613_v1, 1  ;;  %v1691_v46 = vrot.slane %v1613_v1, 2 }
 0x235   : > { %1093 = vrot.lane.b32.xlu1 %v4632_v42, %s4171_s11  ;;  %s4186_s11 = smov 68  }
 0x236   : > { %1283 = vrot.lane.b32.xlu0 %v4636_v5, %s4173_s16  ;;  %v1868_v37 = vsel %vm1865_vm7, %v1613_v1, %v1659_v49 }
 0x237   : > { %v5359_v3 = vpop.permute.xlu1 %1121 }
 0x238   : > { %v5366_v21 = vpop.permute.xlu0 %1109 }
 0x239   : > { %1379 = vrot.lane.b32.xlu1 %v4636_v5, %s4174_s19  ;;  %v1876_v5 = vsel %vm1865_vm7, %v1629_v27, %v1667_v0  ;;  %v1627_v0 = vsel %vm1608_vm6, %v1594_v58, %v5257_v63 }
 0x23a   : > { %1155 = vrot.lane.b32.xlu0 %v4546_v17, %s4172_s15  ;;  %v1893_v33 = vsel %vm1882_vm8, %v1876_v5, %v1699_v55  ;;  %v1666_v63 = vrot.slane %v1627_v0, 1  ;;  %v1515_v55 = vsel %vm1509_vm3, %v1482_v35, %v5119_v7  ;;  %v1698_v34 = vrot.slane %v1627_v0, 2 }
 0x23b   : > { %v5387_v40 = vpop.permute.xlu1 %1171  ;;  %v1910_v51 = vsel %vm1899_vm9, %v1893_v33, %v1731_v47  ;;  %v1548_v45 = vsel %vm1542_vm4, %v1515_v55, %v5265_v48  ;;  %v1463_v5 = vsel %vm1443_vm1, %v4643_v44, %v6743_v14  ;;  %v1885_v7 = vsel %vm1882_vm8, %v1868_v37, %v1691_v46 }
 0x23c   : > { %v5393_v61 = vpop.permute.xlu0 %1161  ;;  %v1927_v27 = vsel %vm1916_vm10, %v1910_v51, %v1779_v9  ;;  %v1875_v12 = vsel %vm1865_vm7, %v1627_v0, %v1666_v63  ;;  %v1581_v59 = vsel %vm1575_vm5, %v1548_v45, %v5309_v53  ;;  %v1496_v8 = vsel %vm1476_vm2, %v1463_v5, %v5023_v62 }
 0x23d   : > { %1251 = vrot.lane.b32.xlu1 %v4546_v17, %s4173_s16  ;;  %v1944_v54 = vsel %vm1933_vm11, %v1927_v27, %v1811_v10  ;;  %v1723_v48 = vrot.slane %v1613_v1, 3  ;;  %v1529_v44 = vsel %vm1509_vm3, %v1496_v8, %v5225_v18  ;;  %v1892_v62 = vsel %vm1882_vm8, %v1875_v12, %v1698_v34  ;;  %v6744_v12 = vld [vmem:[#allocation19_spill] sm:$0xff] }
 0x23e   : > { %1189 = vrot.lane.b32.xlu0 %v4632_v42, %s4172_s15  ;;  %v5449_v24 = vsel %vm1950_vm12, %v1944_v54, %v1843_v15  ;;  %v1562_v1 = vsel %vm1542_vm4, %v1529_v44, %v5273_v25  ;;  %v1730_v27 = vrot.slane %v1627_v0, 3 }
 0x23f   : > { %v5408_v20 = vpop.permute.xlu1 %1201  ;;  %v1902_v53 = vsel %vm1899_vm9, %v1885_v7, %v1723_v48  ;;  %v1595_v58 = vsel %vm1575_vm5, %v1562_v1, %v5320_v29  ;;  %v2168_v10 = vrot.slane %v5449_v24, 2  ;;  %v2160_v25 = vrot.slane %v5449_v24, 1 }
 0x240   : > { %v5412_v56 = vpop.permute.xlu0 %1183  ;;  %v1909_v37 = vsel %vm1899_vm9, %v1892_v62, %v1730_v27  ;;  %v2176_v44 = vrot.slane %v5449_v24, 3 }
 0x241   : > { %1347 = vrot.lane.b32.xlu1 %v4546_v17, %s4174_s19 }
 0x242   : > { %1285 = vrot.lane.b32.xlu0 %v4632_v42, %s4173_s16 }
 0x243   : > { %v5423_v60 = vpop.permute.xlu1 %1263 }
 0x244   : > { %v5428_v17 = vpop.permute.xlu0 %1211 }
 0x245   : > { %1381 = vrot.lane.b32.xlu1 %v4632_v42, %s4174_s19 }
 0x246   : > { %1157 = vrot.lane.b32.xlu0 %v4544_v16, %s4172_s15  ;;  %s4187_s15 = smov 87  }
 0x247   : > { %v1358_v42 = vpop.permute.xlu1 %1357 }
 0x248   : > { %v1614_v26 = vsel %vm1608_vm6, %v1581_v59, %v1358_v42  ;;  %v5452_v33 = vpop.permute.xlu0 %1305  ;;  %v1470_v59 = vsel %vm1443_vm1, %v4691_v6, %v6744_v12 }
 0x249   : > { %v1771_v9 = vrot.slane %v1614_v26, 4  ;;  %v1803_v47 = vrot.slane %v1614_v26, 5  ;;  %1349 = vrot.lane.b32.xlu1 %v4544_v16, %s4174_s19  ;;  %v1835_v49 = vrot.slane %v1614_v26, 6  ;;  %v1503_v48 = vsel %vm1476_vm2, %v1470_v59, %v5065_v41 }
 0x24a   : > { %1253 = vrot.lane.b32.xlu0 %v4544_v16, %s4173_s16  ;;  %v1536_v26 = vsel %vm1509_vm3, %v1503_v48, %v5183_v39  ;;  %v2184_v41 = vrot.slane %v5449_v24, 4  ;;  %v6748_v48 = vld [vmem:[#allocation17_spill] sm:$0xff]  ;;  %s4188_s16 = smov 38  }
 0x24b   : > { %v1919_v18 = vsel %vm1916_vm10, %v1902_v53, %v1771_v9  ;;  %v1386_v51 = vpop.permute.xlu1 %1385  ;;  %v1569_v9 = vsel %vm1542_vm4, %v1536_v26, %v5207_v57  ;;  %v1466_v26 = vsel %vm1443_vm1, %v4669_v30, %v6748_v48 }
 0x24c   : > { %v1936_v22 = vsel %vm1933_vm11, %v1919_v18, %v1803_v47  ;;  %v1628_v46 = vsel %vm1608_vm6, %v1595_v58, %v1386_v51  ;;  %v5470_v63 = vpop.permute.xlu0 %1367  ;;  %v1602_v47 = vsel %vm1575_vm5, %v1569_v9, %v5249_v32  ;;  %v6745_v58 = vld [vmem:[#allocation18_spill] sm:$0xff] }
 0x24d   : > { %v5474_v16 = vsel %vm1950_vm12, %v1936_v22, %v1835_v49  ;;  %v1778_v35 = vrot.slane %v1628_v46, 4  ;;  %v1810_v29 = vrot.slane %v1628_v46, 5  ;;  %2171 = vrot.lane.b32.xlu1 %v2168_v10, %s4175_s20  ;;  %v1842_v55 = vrot.slane %v1628_v46, 6 }
 0x24e   : > { %2163 = vrot.lane.b32.xlu0 %v2160_v25, %s4176_s24  ;;  %v2159_v0 = vrot.slane %v5474_v16, 1  ;;  %v1635_v39 = vsel %vm1608_vm6, %v1602_v47, %v5295_v50  ;;  %v2167_v57 = vrot.slane %v5474_v16, 2  ;;  %v1471_v49 = vsel %vm1443_vm1, %v4687_v52, %v6745_v58 }
 0x24f   : > { %v1926_v54 = vsel %vm1916_vm10, %v1909_v37, %v1778_v35  ;;  %v5481_v34 = vpop.permute.xlu1 %1407  ;;  %v1670_v1 = vrot.slane %v1635_v39, 1  ;;  %v1702_v18 = vrot.slane %v1635_v39, 2  ;;  %v1504_v50 = vsel %vm1476_vm2, %v1471_v49, %v5063_v23 }
 0x250   : > { %v1943_v45 = vsel %vm1933_vm11, %v1926_v54, %v1810_v29  ;;  %v5484_v15 = vpop.permute.xlu0 %1395  ;;  %v1537_v22 = vsel %vm1509_vm3, %v1504_v50, %v5255_v11  ;;  %v1734_v29 = vrot.slane %v1635_v39, 3 }
 0x251   : > { %v5487_v14 = vsel %vm1950_vm12, %v1943_v45, %v1842_v55  ;;  %2161 = vrot.lane.b32.xlu1 %v2159_v0, %s4176_s24  ;;  %v1879_v10 = vsel %vm1865_vm7, %v1635_v39, %v1670_v1  ;;  %v1570_v46 = vsel %vm1542_vm4, %v1537_v22, %v5311_v19  ;;  %v6746_v0 = vld [vmem:[#allocation14_spill] sm:$0xff]  ;;  %v6747_v45 = vld [vmem:[#allocation23_spill] sm:$0xff]  ;;  %v6751_v1 = vld [vmem:[#allocation57_spill] sm:$0xff] }
 0x252   : > { %v2070_v5 = vrot.slane %v5487_v14, 1  ;;  %v2078_v8 = vrot.slane %v5487_v14, 2  ;;  %v1896_v25 = vsel %vm1882_vm8, %v1879_v10, %v1702_v18  ;;  %v1603_v52 = vsel %vm1575_vm5, %v1570_v46, %v5452_v33  ;;  %v6752_v18 = vld [vmem:[#allocation61_spill] sm:$0xff] }
 0x253   : > { %v5491_v7 = vpop.permute.xlu1 %1205  ;;  %v1446_v55 = vsel %vm1443_vm1, %v4559_v28, %v6746_v0  ;;  %v6749_v28 = vld [vmem:[#allocation59_spill] sm:$0xff]  ;;  %v6753_v22 = vld [vmem:[#allocation65_spill] sm:$0xff]  ;;  %v6756_v0 = vld [vmem:[#allocation16_spill] sm:$0xff] }
 0x254   : > { %2073 = vrot.lane.b32.xlu0 %v2070_v5, %s4176_s24  ;;  %v5497_v42 = vpop.permute.xlu0 %1177  ;;  %v1479_v19 = vsel %vm1476_vm2, %v1446_v55, %v6747_v45  ;;  %v1913_v5 = vsel %vm1899_vm9, %v1896_v25, %v1734_v29  ;;  %v6757_v55 = vld [vmem:[#allocation12_spill] sm:$0xff] }
 0x255   : > { %2081 = vrot.lane.b32.xlu1 %v2078_v8, %s4175_s20  ;;  %v1512_v33 = vsel %vm1509_vm3, %v1479_v19, %v5113_v13 }
 0x257   : > { %v5508_v6 = vpop.permute.xlu1 %1257 }
 0x258   : > { %2179 = vrot.lane.b32.xlu0 %v2176_v44, %s4177_s22  ;;  %v5513_v53 = vpop.permute.xlu0 %1217  ;;  %v1545_v44 = vsel %vm1542_vm4, %v1512_v33, %v6749_v28  ;;  %v6761_v28 = vld [vmem:[#allocation47_spill] sm:$0xff] }
 0x259   : > { %2187 = vrot.lane.b32.xlu1 %v2184_v41, %s4178_s21  ;;  %v6750_v41 = vld [vmem:[#allocation37_spill] sm:$0xff]  ;;  %v1578_v13 = vsel %vm1575_vm5, %v1545_v44, %v5279_v4  ;;  %v6762_v44 = vld [vmem:[#allocation24_spill] sm:$0xff] }
 0x25a   : > { %v1499_v39 = vsel %vm1476_vm2, %v1466_v26, %v6750_v41  ;;  %v1611_v30 = vsel %vm1608_vm6, %v1578_v13, %v5348_v31  ;;  %v6755_v31 = vld [vmem:[#allocation11_spill] sm:$0xff]  ;;  %v6763_v41 = vld [vmem:[#allocation52_spill] sm:$0xff] }
 0x25b   : > { %v5520_v62 = vpop.permute.xlu1 %1279  ;;  %v1532_v58 = vsel %vm1509_vm3, %v1499_v39, %v6751_v1  ;;  %v1690_v48 = vrot.slane %v1611_v30, 2  ;;  %v6764_v39 = vld [vmem:[#allocation29_spill] sm:$0xff]  ;;  %v6765_v1 = vld [vmem:[#allocation58_spill] sm:$0xff] }
 0x25c   : > { %2169 = vrot.lane.b32.xlu0 %v2167_v57, %s4175_s20  ;;  %v5523_v32 = vpop.permute.xlu0 %1267  ;;  %v1565_v50 = vsel %vm1542_vm4, %v1532_v58, %v6752_v18  ;;  %v1520_v13 = vsel %vm1509_vm3, %v6764_v39, %v6763_v41  ;;  %v6766_v58 = vld [vmem:[#allocation39_spill] sm:$0xff] }
 0x25d   : > { %v1598_v46 = vsel %vm1575_vm5, %v1565_v50, %v6753_v22  ;;  %v6767_v50 = vld [vmem:[#allocation60_spill] sm:$0xff]  ;;  %v6768_v22 = vld [vmem:[#allocation43_spill] sm:$0xff] }
 0x25e   : > { %v1631_v25 = vsel %vm1608_vm6, %v1598_v46, %v5344_v2  ;;  %v6760_v2 = vld [vmem:[#allocation46_spill] sm:$0xff]  ;;  %v1540_v46 = vsel %vm1509_vm3, %v6768_v22, %v6767_v50 }
 0x25f   : > { %v5528_v51 = vpop.permute.xlu1 %1307 }
 0x260   : > { %v5533_v27 = vpop.permute.xlu0 %1297 }
 0x263   : > { %v1402_v35 = vpop.permute.xlu1 %1401 }
 0x264   : > { %v1636_v37 = vsel %vm1608_vm6, %v1603_v52, %v1402_v35  ;;  %v5543_v23 = vpop.permute.xlu0 %1359  ;;  %v1658_v52 = vrot.slane %v1611_v30, 1  ;;  %v6754_v35 = vld [vmem:[#allocation13_spill] sm:$0xff] }
 0x265   : > { %v1782_v54 = vrot.slane %v1636_v37, 4  ;;  %v1814_v11 = vrot.slane %v1636_v37, 5  ;;  %v1846_v12 = vrot.slane %v1636_v37, 6  ;;  %v1447_v29 = vsel %vm1443_vm1, %v6755_v31, %v6754_v35  ;;  %v6769_v35 = vld [vmem:[#allocation62_spill] sm:$0xff] }
 0x266   : > { %v2086_v37 = vrot.slane %v5487_v14, 3  ;;  %v1867_v18 = vsel %vm1865_vm7, %v1611_v30, %v1658_v52  ;;  %v1553_v31 = vsel %vm1542_vm4, %v1520_v13, %v6769_v35 }
 0x267   : > { %v1930_v59 = vsel %vm1916_vm10, %v1913_v5, %v1782_v54  ;;  %v5554_v8 = vpop.permute.xlu1 %1169  ;;  %v1467_v54 = vsel %vm1443_vm1, %v6757_v55, %v6756_v0  ;;  %v6759_v5 = vld [vmem:[#allocation36_spill] sm:$0xff]  ;;  %v2192_v0 = vrot.slane %v5449_v24, 5  ;;  %v1884_v41 = vsel %vm1882_vm8, %v1867_v18, %v1690_v48 }
 0x268   : > { %v1947_v9 = vsel %vm1933_vm11, %v1930_v59, %v1814_v11  ;;  %v5562_v47 = vpop.permute.xlu0 %1117  ;;  %v6758_v11 = vld [vmem:[#allocation22_spill] sm:$0xff]  ;;  %v1500_v33 = vsel %vm1476_vm2, %v1467_v54, %v6759_v5  ;;  %v1668_v59 = vrot.slane %v1631_v25, 1  ;;  %v6771_v55 = vld [vmem:[#allocation64_spill] sm:$0xff]  ;;  %v1700_v5 = vrot.slane %v1631_v25, 2 }
 0x269   : > { %v5569_v57 = vsel %vm1950_vm12, %v1947_v9, %v1846_v12  ;;  %v1480_v45 = vsel %vm1476_vm2, %v1447_v29, %v6758_v11  ;;  %v5608_v9 = vsel %vm1509_vm3, %v6762_v44, %v6761_v28  ;;  %v6770_v29 = vld [vmem:[#allocation63_spill] sm:$0xff]  ;;  %v1573_v54 = vsel %vm1542_vm4, %v1540_v46, %v6771_v55  ;;  %v6772_v11 = vld [vmem:[#allocation66_spill] sm:$0xff]  ;;  %v6773_v55 = vld [vmem:[#allocation48_spill] sm:$0xff] }
 0x26a   : > { %v2435_v49 = vrot.slane %v5569_v57, 1  ;;  %v1513_v12 = vsel %vm1509_vm3, %v1480_v45, %v6760_v2  ;;  %v1533_v45 = vsel %vm1509_vm3, %v1500_v33, %v6772_v11  ;;  %v1586_v28 = vsel %vm1575_vm5, %v1553_v31, %v5324_v38  ;;  %v6775_v11 = vld [vmem:[#allocation49_spill] sm:$0xff] }
 0x26b   : > { %v5578_v10 = vpop.permute.xlu1 %1273  ;;  %v1546_v52 = vsel %vm1542_vm4, %v1513_v12, %v5393_v61  ;;  %v1877_v44 = vsel %vm1865_vm7, %v1631_v25, %v1668_v59  ;;  %v1606_v13 = vsel %vm1575_vm5, %v1573_v54, %v5332_v36  ;;  %v1722_v12 = vrot.slane %v1611_v30, 3  ;;  %v6774_v54 = vld [vmem:[#allocation25_spill] sm:$0xff] }
 0x26c   : > { %2438 = vrot.lane.b32.xlu0 %v2435_v49, %s4176_s24  ;;  %v5583_v4 = vpop.permute.xlu0 %1179  ;;  %v1534_v49 = vsel %vm1509_vm3, %v6766_v58, %v6765_v1  ;;  %v1579_v39 = vsel %vm1575_vm5, %v1546_v52, %v5508_v6  ;;  %v1566_v59 = vsel %vm1542_vm4, %v1533_v45, %v5408_v20  ;;  %v2443_v6 = vrot.slane %v5569_v57, 2  ;;  %v6776_v45 = vld [vmem:[#allocation26_spill] sm:$0xff] }
 0x26d   : > { %v1732_v58 = vrot.slane %v1631_v25, 3  ;;  %v1901_v18 = vsel %vm1899_vm9, %v1884_v41, %v1722_v12  ;;  %v1599_v36 = vsel %vm1575_vm5, %v1566_v59, %v5533_v27  ;;  %v5663_v46 = vsel %vm1608_vm6, %v1606_v13, %v5481_v34  ;;  %v6778_v41 = vld [vmem:[#allocation27_spill] sm:$0xff]  ;;  %v6780_v59 = vld [vmem:[#allocation28_spill] sm:$0xff] }
 0x26e   : > { %v1516_v34 = vsel %vm1509_vm3, %v6774_v54, %v6773_v55  ;;  %v2200_v54 = vrot.slane %v5449_v24, 6  ;;  %vm2029_vm1 = vcmask 285696   ;;  %vm2032_vm2 = vcmask 343040  }
 0x26f   : > { %v5596_v19 = vpop.permute.xlu1 %1313 }
 0x270   : > { %2089 = vrot.lane.b32.xlu0 %v2086_v37, %s4177_s22  ;;  %v5603_v26 = vpop.permute.xlu0 %1301  ;;  %v1567_v37 = vsel %vm1542_vm4, %v1534_v49, %v6770_v29  ;;  %v1894_v49 = vsel %vm1882_vm8, %v1877_v44, %v1700_v5  ;;  %v6777_v44 = vld [vmem:[#allocation50_spill] sm:$0xff] }
 0x271   : > { %v1600_v61 = vsel %vm1575_vm5, %v1567_v37, %v5336_v43  ;;  %v5654_v43 = vsel %vm1608_vm6, %v1586_v28, %v5470_v63  ;;  %v1911_v31 = vsel %vm1899_vm9, %v1894_v49, %v1732_v58  ;;  %v6783_v49 = vld [vmem:[#allocation54_spill] sm:$0xff] }
 0x272   : > { %v5667_v27 = vsel %vm1608_vm6, %v1600_v61, %v5484_v15  ;;  %v5681_v15 = vsel %vm1509_vm3, %v6776_v45, %v6775_v11  ;;  %v1662_v5 = vrot.slane %v5654_v43, 1  ;;  %v1704_v45 = vrot.slane %v5663_v46, 2 }
 0x273   : > { %v5631_v2 = vpop.permute.xlu1 %1363  ;;  %v1669_v13 = vrot.slane %v5667_v27, 1 }
 0x274   : > { %2195 = vrot.lane.b32.xlu0 %v2192_v0, %s4179_s23  ;;  %v1354_v33 = vpop.permute.xlu0 %1353  ;;  %v2094_v0 = vrot.slane %v5487_v14, 4  ;;  %v1871_v11 = vsel %vm1865_vm7, %v5654_v43, %v1662_v5 }
 0x275   : > { %v1612_v38 = vsel %vm1608_vm6, %v1579_v39, %v1354_v33  ;;  %v1518_v39 = vsel %vm1509_vm3, %v6778_v41, %v6777_v44  ;;  %v1672_v33 = vrot.slane %v5663_v46, 1  ;;  %v1701_v44 = vrot.slane %v5667_v27, 2 }
 0x276   : > { %v1770_v48 = vrot.slane %v1612_v38, 4  ;;  %v1802_v1 = vrot.slane %v1612_v38, 5  ;;  %v1834_v30 = vrot.slane %v1612_v38, 6  ;;  %v6779_v38 = vld [vmem:[#allocation51_spill] sm:$0xff] }
 0x277   : > { %v1394_v50 = vpop.permute.xlu1 %1393 }
 0x278   : > { %v1918_v20 = vsel %vm1916_vm10, %v1901_v18, %v1770_v48  ;;  %v1632_v22 = vsel %vm1608_vm6, %v1599_v36, %v1394_v50  ;;  %2446 = vrot.lane.b32.xlu0 %v2443_v6, %s4175_s20  ;;  %v5659_v25 = vpop.permute.xlu0 %1375  ;;  %v1521_v48 = vsel %vm1509_vm3, %v6780_v59, %v6779_v38  ;;  %v6782_v6 = vld [vmem:[#allocation30_spill] sm:$0xff]  ;;  %v6784_v18 = vld [vmem:[#allocation31_spill] sm:$0xff] }
 0x279   : > { %v1935_v63 = vsel %vm1933_vm11, %v1918_v20, %v1802_v1  ;;  %v1780_v35 = vrot.slane %v1632_v22, 4  ;;  %v1812_v37 = vrot.slane %v1632_v22, 5  ;;  %v6781_v1 = vld [vmem:[#allocation53_spill] sm:$0xff]  ;;  %v5707_v36 = vsel %vm1509_vm3, %v6784_v18, %v6783_v49  ;;  %v6785_v50 = vld [vmem:[#allocation55_spill] sm:$0xff]  ;;  %v6792_v18 = vld [vmem:[#allocation42_spill] sm:$0xff] }
 0x27a   : > { %v5672_v29 = vsel %vm1950_vm12, %v1935_v63, %v1834_v30  ;;  %v5702_v58 = vsel %vm1509_vm3, %v6782_v6, %v6781_v1  ;;  %v6786_v30 = vld [vmem:[#allocation32_spill] sm:$0xff]  ;;  %v1844_v41 = vrot.slane %v1632_v22, 6  ;;  %v6789_v59 = vld [vmem:[#allocation67_spill] sm:$0xff]  ;;  %v6791_v22 = vld [vmem:[#allocation41_spill] sm:$0xff] }
 0x27b   : > { %v1928_v52 = vsel %vm1916_vm10, %v1911_v31, %v1780_v35  ;;  %v5685_v28 = vpop.permute.xlu1 %1173  ;;  %v2069_v12 = vrot.slane %v5672_v29, 1  ;;  %v5712_v20 = vsel %vm1509_vm3, %v6786_v30, %v6785_v50  ;;  %v6787_v63 = vld [vmem:[#allocation56_spill] sm:$0xff]  ;;  %v6788_v35 = vld [vmem:[#allocation33_spill] sm:$0xff]  ;;  %v1549_v1 = vsel %vm1542_vm4, %v1516_v34, %v6789_v59 }
 0x27c   : > { %2097 = vrot.lane.b32.xlu0 %v2094_v0, %s4178_s21  ;;  %v5693_v61 = vpop.permute.xlu0 %1403  ;;  %v1524_v31 = vsel %vm1509_vm3, %v6788_v35, %v6787_v63  ;;  %v1694_v0 = vrot.slane %v5654_v43, 2  ;;  %v1945_v55 = vsel %vm1933_vm11, %v1928_v52, %v1812_v37  ;;  %v1881_v37 = vsel %vm1865_vm7, %v5663_v46, %v1672_v33  ;;  %v6790_v6 = vld [vmem:[#allocation68_spill] sm:$0xff]  ;;  %v6793_v33 = vld [vmem:[#allocation38_spill] sm:$0xff] }
 0x27d   : > { %2071 = vrot.lane.b32.xlu1 %v2069_v12, %s4176_s24  ;;  %v1878_v52 = vsel %vm1865_vm7, %v5667_v27, %v1669_v13  ;;  %v2175_v12 = vrot.slane %v5474_v16, 3  ;;  %v1538_v49 = vsel %vm1509_vm3, %v6791_v22, %v6790_v6  ;;  %v1541_v34 = vsel %vm1509_vm3, %v6792_v18, %v5359_v3 }
 0x27e   : > { %v1535_v50 = vsel %vm1509_vm3, %v6793_v33, %v5366_v21  ;;  %v5747_v13 = vsel %vm1950_vm12, %v1945_v55, %v1844_v41  ;;  %v1551_v30 = vsel %vm1542_vm4, %v1518_v39, %v5387_v40  ;;  %v1557_v63 = vsel %vm1542_vm4, %v1524_v31, %v5412_v56 }
 0x27f   : > { %v5725_v38 = vpop.permute.xlu1 %1213  ;;  %v1582_v35 = vsel %vm1575_vm5, %v1549_v1, %v5423_v60  ;;  %v1571_v3 = vsel %vm1542_vm4, %v1538_v49, %v5428_v17  ;;  %v1726_v21 = vrot.slane %v5654_v43, 3  ;;  %v1898_v55 = vsel %vm1882_vm8, %v1881_v37, %v1704_v45 }
 0x280   : > { %2203 = vrot.lane.b32.xlu0 %v2200_v54, %s4180_s9  ;;  %v5734_v5 = vpop.permute.xlu0 %1185  ;;  %v1888_v54 = vsel %vm1882_vm8, %v1871_v11, %v1694_v0  ;;  %v1895_v41 = vsel %vm1882_vm8, %v1878_v52, %v1701_v44  ;;  %v1736_v56 = vrot.slane %v5663_v46, 3  ;;  %v1733_v39 = vrot.slane %v5667_v27, 3 }
 0x281   : > { %2177 = vrot.lane.b32.xlu1 %v2175_v12, %s4177_s22  ;;  %v5768_v60 = vsel %vm1608_vm6, %v1582_v35, %v5543_v23  ;;  %v2255_v17 = vrot.slane %v5747_v13, 1  ;;  %v1905_v43 = vsel %vm1899_vm9, %v1888_v54, %v1726_v21  ;;  %v1568_v0 = vsel %vm1542_vm4, %v1535_v50, %v5491_v7 }
 0x282   : > { %v2183_v11 = vrot.slane %v5474_v16, 4  ;;  %v2191_v45 = vrot.slane %v5474_v16, 5  ;;  %v1915_v46 = vsel %vm1899_vm9, %v1898_v55, %v1736_v56  ;;  %v1912_v27 = vsel %vm1899_vm9, %v1895_v41, %v1733_v39 }
 0x283   : > { %v5762_v40 = vpop.permute.xlu1 %1275  ;;  %v1554_v23 = vsel %vm1542_vm4, %v1521_v48, %v5497_v42  ;;  %v1584_v44 = vsel %vm1575_vm5, %v1551_v30, %v5523_v32  ;;  %v1574_v59 = vsel %vm1542_vm4, %v1541_v34, %v5513_v53  ;;  %v1660_v7 = vrot.slane %v5768_v60, 1 }
 0x284   : > { %v5770_v31 = vpop.permute.xlu0 %1265  ;;  %v1601_v1 = vsel %vm1575_vm5, %v1568_v0, %v5603_v26  ;;  %v1617_v37 = vsel %vm1608_vm6, %v1584_v44, %v5631_v2  ;;  %v1590_v42 = vsel %vm1575_vm5, %v1557_v63, %v5520_v62  ;;  %v1587_v32 = vsel %vm1575_vm5, %v1554_v23, %v5578_v10 }
 0x285   : > { %2258 = vrot.lane.b32.xlu1 %v2255_v17, %s4176_s24  ;;  %v2077_v53 = vrot.slane %v5672_v29, 2  ;;  %v1604_v6 = vsel %vm1575_vm5, %v1571_v3, %v5528_v51  ;;  %v1692_v2 = vrot.slane %v5768_v60, 2  ;;  %v1661_v18 = vrot.slane %v1617_v37, 1 }
 0x286   : > { %v1869_v10 = vsel %vm1865_vm7, %v5768_v60, %v1660_v7  ;;  %v1607_v33 = vsel %vm1575_vm5, %v1574_v59, %v5596_v19  ;;  %v5810_v63 = vsel %vm1608_vm6, %v1590_v42, %v5659_v25  ;;  %v1693_v55 = vrot.slane %v1617_v37, 2 }
 0x287   : > { %v1398_v52 = vpop.permute.xlu1 %1397  ;;  %v1870_v39 = vsel %vm1865_vm7, %v1617_v37, %v1661_v18  ;;  %v1664_v23 = vrot.slane %v5810_v63, 1  ;;  %v5830_v7 = vsel %vm1608_vm6, %v1604_v6, %v5693_v61  ;;  %v1725_v6 = vrot.slane %v1617_v37, 3 }
 0x288   : > { %v1634_v48 = vsel %vm1608_vm6, %v1601_v1, %v1398_v52  ;;  %v1370_v12 = vpop.permute.xlu0 %1369 }
 0x289   : > { %v1781_v22 = vrot.slane %v1634_v48, 4  ;;  %v1813_v26 = vrot.slane %v1634_v48, 5  ;;  %v1620_v49 = vsel %vm1608_vm6, %v1587_v32, %v1370_v12  ;;  %2079 = vrot.lane.b32.xlu1 %v2077_v53, %s4175_s20  ;;  %v1845_v50 = vrot.slane %v1634_v48, 6  ;;  %v6794_v53 = vld [vmem:[#allocation40_spill] sm:$0xff] }
 0x28a   : > { %v1774_v34 = vrot.slane %v1620_v49, 4  ;;  %v1806_v62 = vrot.slane %v1620_v49, 5  ;;  %v1838_v54 = vrot.slane %v1620_v49, 6  ;;  %v2263_v32 = vrot.slane %v5747_v13, 2 }
 0x28b   : > { %v1929_v51 = vsel %vm1916_vm10, %v1912_v27, %v1781_v22  ;;  %v1270_v30 = vpop.permute.xlu1 %1269  ;;  %v1886_v27 = vsel %vm1882_vm8, %v1869_v10, %v1692_v2  ;;  %v2102_v12 = vrot.slane %v5487_v14, 5  ;;  %v2451_v2 = vrot.slane %v5569_v57, 3 }
 0x28c   : > { %v1946_v35 = vsel %vm1933_vm11, %v1929_v51, %v1813_v26  ;;  %v1922_v3 = vsel %vm1916_vm10, %v1905_v43, %v1774_v34  ;;  %v1410_v21 = vpop.permute.xlu0 %1409  ;;  %v1724_v43 = vrot.slane %v5768_v60, 3  ;;  %v1550_v60 = vsel %vm1542_vm4, %v5608_v9, %v5554_v8 }
 0x28d   : > { %v5815_v41 = vsel %vm1950_vm12, %v1946_v35, %v1845_v50  ;;  %v1939_v19 = vsel %vm1933_vm11, %v1922_v3, %v1806_v62  ;;  %v1640_v56 = vsel %vm1608_vm6, %v1607_v33, %v1410_v21  ;;  %2185 = vrot.lane.b32.xlu1 %v2183_v11, %s4178_s21  ;;  %v1887_v11 = vsel %vm1882_vm8, %v1870_v39, %v1693_v55 }
 0x28e   : > { %v5821_v17 = vsel %vm1950_vm12, %v1939_v19, %v1838_v54  ;;  %v1784_v25 = vrot.slane %v1640_v56, 4  ;;  %v1816_v0 = vrot.slane %v1640_v56, 5  ;;  %v2345_v59 = vrot.slane %v5815_v41, 1 }
 0x28f   : > { %v1310_v44 = vpop.permute.xlu1 %1309  ;;  %v1848_v1 = vrot.slane %v1640_v56, 6  ;;  %v1903_v61 = vsel %vm1899_vm9, %v1886_v27, %v1724_v43  ;;  %v1555_v8 = vsel %vm1542_vm4, %v5707_v36, %v5583_v4  ;;  %v1696_v9 = vrot.slane %v5810_v63, 2 }
 0x290   : > { %v1932_v52 = vsel %vm1916_vm10, %v1915_v46, %v1784_v25  ;;  %v1282_v42 = vpop.permute.xlu0 %1281  ;;  %2348 = vrot.lane.b32.xlu0 %v2345_v59, %s4176_s24  ;;  %v1539_v46 = vsel %vm1509_vm3, %v6794_v53, %v5562_v47  ;;  %v1671_v26 = vrot.slane %v5830_v7, 1  ;;  %v1904_v18 = vsel %vm1899_vm9, %v1887_v11, %v1725_v6 }
 0x291   : > { %v1949_v48 = vsel %vm1933_vm11, %v1932_v52, %v1816_v0  ;;  %2266 = vrot.lane.b32.xlu1 %v2263_v32, %s4175_s20  ;;  %v1873_v47 = vsel %vm1865_vm7, %v5810_v63, %v1664_v23  ;;  %v1583_v37 = vsel %vm1575_vm5, %v1550_v60, %v5770_v31  ;;  %v2434_v62 = vrot.slane %v5821_v17, 1 }
 0x292   : > { %v5846_v22 = vsel %vm1950_vm12, %v1949_v48, %v1848_v1  ;;  %v1728_v4 = vrot.slane %v5810_v63, 3  ;;  %v1552_v36 = vsel %vm1542_vm4, %v5681_v15, %v5685_v28  ;;  %v1588_v10 = vsel %vm1575_vm5, %v1555_v8, %v5762_v40 }
 0x293   : > { %v1372_v49 = vpop.permute.xlu1 %1371  ;;  %v1703_v50 = vrot.slane %v5830_v7, 2  ;;  %v1890_v63 = vsel %vm1882_vm8, %v1873_v47, %v1696_v9  ;;  %v1880_v15 = vsel %vm1865_vm7, %v5830_v7, %v1671_v26  ;;  %v1585_v28 = vsel %vm1575_vm5, %v1552_v36, %v1270_v30 }
 0x294   : > { %v1362_v34 = vpop.permute.xlu0 %1361  ;;  %2454 = vrot.lane.b32.xlu0 %v2451_v2, %s4177_s22  ;;  %v5871_v31 = vsel %vm1608_vm6, %v1588_v10, %v1372_v49  ;;  %v2085_v54 = vrot.slane %v5672_v29, 3  ;;  %v2620_v56 = vrot.slane %v5846_v22, 1  ;;  %v1735_v30 = vrot.slane %v5830_v7, 3 }
 0x295   : > { %v1616_v33 = vsel %vm1608_vm6, %v1583_v37, %v1362_v34  ;;  %2436 = vrot.lane.b32.xlu1 %v2434_v62, %s4176_s24  ;;  %v1663_v39 = vrot.slane %v5871_v31, 1  ;;  %v1897_v27 = vsel %vm1882_vm8, %v1880_v15, %v1703_v50  ;;  %v1572_v23 = vsel %vm1542_vm4, %v1539_v46, %v5725_v38 }
 0x296   : > { %v1772_v51 = vrot.slane %v1616_v33, 4  ;;  %v1804_v35 = vrot.slane %v1616_v33, 5  ;;  %v1836_v3 = vrot.slane %v1616_v33, 6  ;;  %v1558_v1 = vsel %vm1542_vm4, %v5712_v20, %v5734_v5 }
 0x297   : > { %v1366_v40 = vpop.permute.xlu1 %1365  ;;  %v1605_v52 = vsel %vm1575_vm5, %v1572_v23, %v1310_v44  ;;  %v1591_v11 = vsel %vm1575_vm5, %v1558_v1, %v1282_v42  ;;  %v1695_v48 = vrot.slane %v5871_v31, 2  ;;  %v1872_v46 = vsel %vm1865_vm7, %v5871_v31, %v1663_v39 }
 0x298   : > { %v1920_v21 = vsel %vm1916_vm10, %v1903_v61, %v1772_v51  ;;  %v1618_v55 = vsel %vm1608_vm6, %v1585_v28, %v1366_v40  ;;  %v1182_v19 = vpop.permute.xlu0 %1181  ;;  %2087 = vrot.lane.b32.xlu0 %v2085_v54, %s4177_s22  ;;  %v1907_v42 = vsel %vm1899_vm9, %v1890_v63, %v1728_v4  ;;  %v1914_v6 = vsel %vm1899_vm9, %v1897_v27, %v1735_v30 }
 0x299   : > { %v1937_v25 = vsel %vm1933_vm11, %v1920_v21, %v1804_v35  ;;  %v1773_v0 = vrot.slane %v1618_v55, 4  ;;  %v1805_v43 = vrot.slane %v1618_v55, 5  ;;  %2623 = vrot.lane.b32.xlu1 %v2620_v56, %s4176_s24  ;;  %v1837_v32 = vrot.slane %v1618_v55, 6 }
 0x29a   : > { %v5890_v59 = vsel %vm1950_vm12, %v1937_v25, %v1836_v3  ;;  %v2271_v9 = vrot.slane %v5747_v13, 3  ;;  %v1556_v37 = vsel %vm1542_vm4, %v5702_v58, %v1182_v19  ;;  %v1727_v50 = vrot.slane %v5871_v31, 3 }
 0x29b   : > { %v1921_v60 = vsel %vm1916_vm10, %v1904_v18, %v1773_v0  ;;  %v1406_v7 = vpop.permute.xlu1 %1405  ;;  %v2254_v4 = vrot.slane %v5890_v59, 1  ;;  %v2442_v40 = vrot.slane %v5821_v17, 2  ;;  %v2353_v21 = vrot.slane %v5815_v41, 2  ;;  %v6795_v0 = vld [vmem:[#allocation35_spill] sm:$0xff] }
 0x29c   : > { %v1938_v38 = vsel %vm1933_vm11, %v1921_v60, %v1805_v43  ;;  %v1638_v61 = vsel %vm1608_vm6, %v1605_v52, %v1406_v7  ;;  %v1378_v53 = vpop.permute.xlu0 %1377  ;;  %2193 = vrot.lane.b32.xlu0 %v2191_v45, %s4179_s23  ;;  %v1889_v45 = vsel %vm1882_vm8, %v1872_v46, %v1695_v48  ;;  %v2628_v25 = vrot.slane %v5846_v22, 2 }
 0x29d   : > { %v5905_v20 = vsel %vm1950_vm12, %v1938_v38, %v1837_v32  ;;  %v1783_v5 = vrot.slane %v1638_v61, 4  ;;  %v1815_v44 = vrot.slane %v1638_v61, 5  ;;  %v1624_v8 = vsel %vm1608_vm6, %v1591_v11, %v1378_v53  ;;  %2105 = vrot.lane.b32.xlu1 %v2102_v12, %s4179_s23 }
 0x29e   : > { %v1847_v26 = vrot.slane %v1638_v61, 6  ;;  %v1776_v2 = vrot.slane %v1624_v8, 4  ;;  %v1808_v18 = vrot.slane %v1624_v8, 5  ;;  %v1840_v36 = vrot.slane %v1624_v8, 6 }
 0x29f   : > { %v1931_v49 = vsel %vm1916_vm10, %v1914_v6, %v1783_v5  ;;  %v1374_v47 = vpop.permute.xlu1 %1373  ;;  %v1906_v54 = vsel %vm1899_vm9, %v1889_v45, %v1727_v50  ;;  %v2459_v27 = vrot.slane %v5569_v57, 4  ;;  %v2110_v52 = vrot.slane %v5487_v14, 6  ;;  %v6796_v5 = vld [vmem:[#allocation45_spill] sm:$0xff] }
 0x2a0   : > { %v1948_v34 = vsel %vm1933_vm11, %v1931_v49, %v1815_v44  ;;  %v1278_v62 = vpop.permute.xlu0 %1277  ;;  %v1924_v10 = vsel %vm1916_vm10, %v1907_v42, %v1776_v2  ;;  %2274 = vrot.lane.b32.xlu0 %v2271_v9, %s4177_s22  ;;  %v2093_v7 = vrot.slane %v5672_v29, 4  ;;  %v2262_v38 = vrot.slane %v5890_v59, 2  ;;  %v6797_v44 = vld [vmem:[#allocation21_spill] sm:$0xff] }
 0x2a1   : > { %v5924_v12 = vsel %vm1950_vm12, %v1948_v34, %v1847_v26  ;;  %v1589_v33 = vsel %vm1575_vm5, %v1556_v37, %v1278_v62  ;;  %v1941_v51 = vsel %vm1933_vm11, %v1924_v10, %v1808_v18  ;;  %2256 = vrot.lane.b32.xlu1 %v2254_v4, %s4176_s24  ;;  %v2199_v46 = vrot.slane %v5474_v16, 6  ;;  %v6798_v37 = vld [vmem:[#allocation34_spill] sm:$0xff] }
 0x2a2   : > { %v1622_v58 = vsel %vm1608_vm6, %v1589_v33, %v1374_v47  ;;  %v5934_v35 = vsel %vm1950_vm12, %v1941_v51, %v1840_v36  ;;  %v1510_v42 = vsel %vm1509_vm3, %v6797_v44, %v6796_v5  ;;  %v2344_v49 = vrot.slane %v5905_v20, 1 }
 0x2a3   : > { %v1775_v63 = vrot.slane %v1622_v58, 4  ;;  %v1807_v15 = vrot.slane %v1622_v58, 5  ;;  %v1188_v28 = vpop.permute.xlu1 %1187  ;;  %v1839_v31 = vrot.slane %v1622_v58, 6  ;;  %v2279_v45 = vrot.slane %v5747_v13, 4 }
 0x2a4   : > { %v1092_v3 = vpop.permute.xlu0 %1091  ;;  %2444 = vrot.lane.b32.xlu0 %v2442_v40, %s4175_s20  ;;  %v2450_v50 = vrot.slane %v5821_v17, 3 }
 0x2a5   : > { %v1923_v55 = vsel %vm1916_vm10, %v1906_v54, %v1775_v63  ;;  %2356 = vrot.lane.b32.xlu1 %v2353_v21, %s4175_s20  ;;  %v1526_v43 = vsel %vm1509_vm3, %v6795_v0, %v1092_v3  ;;  %v2530_v0 = vrot.slane %v5924_v12, 1 }
 0x2a6   : > { %v1940_v19 = vsel %vm1933_vm11, %v1923_v55, %v1807_v15  ;;  %v1559_v23 = vsel %vm1542_vm4, %v1526_v43, %v1188_v28  ;;  %v2361_v15 = vrot.slane %v5815_v41, 3  ;;  %v6800_v55 = vld [vmem:[#allocation20_spill] sm:$0xff] }
 0x2a7   : > { %v5944_v56 = vsel %vm1950_vm12, %v1940_v19, %v1839_v31  ;;  %v1094_v39 = vpop.permute.xlu1 %1093  ;;  %v6799_v31 = vld [vmem:[#allocation44_spill] sm:$0xff] }
 0x2a8   : > { %v1284_v30 = vpop.permute.xlu0 %1283  ;;  %2631 = vrot.lane.b32.xlu0 %v2628_v25, %s4175_s20  ;;  %v1527_v34 = vsel %vm1509_vm3, %v6798_v37, %v1094_v39  ;;  %v1511_v19 = vsel %vm1509_vm3, %v6800_v55, %v6799_v31  ;;  %v2538_v37 = vrot.slane %v5924_v12, 2  ;;  %vm2056_vm3 = vcmask 1041409  }
 0x2a9   : > { %2462 = vrot.lane.b32.xlu1 %v2459_v27, %s4178_s21  ;;  %v1592_v32 = vsel %vm1575_vm5, %v1559_v23, %v1284_v30  ;;  %v2467_v23 = vrot.slane %v5569_v57, 5 }
 0x2ab   : > { %v1380_v1 = vpop.permute.xlu1 %1379 }
 0x2ac   : > { %v1156_v60 = vpop.permute.xlu0 %1155  ;;  %v1625_v11 = vsel %vm1608_vm6, %v1592_v32, %v1380_v1  ;;  %2113 = vrot.lane.b32.xlu0 %v2110_v52, %s4180_s9 }
 0x2ad   : > { %2095 = vrot.lane.b32.xlu1 %v2093_v7, %s4178_s21  ;;  %v1665_v61 = vrot.slane %v1625_v11, 1  ;;  %v1543_v6 = vsel %vm1542_vm4, %v1510_v42, %v1156_v60  ;;  %v1697_v8 = vrot.slane %v1625_v11, 2  ;;  %v1729_v51 = vrot.slane %v1625_v11, 3 }
 0x2af   : > { %v1252_v48 = vpop.permute.xlu1 %1251  ;;  %v1874_v2 = vsel %vm1865_vm7, %v1625_v11, %v1665_v61  ;;  %v2636_v61 = vrot.slane %v5846_v22, 3 }
 0x2b0   : > { %v1190_v53 = vpop.permute.xlu0 %1189  ;;  %2264 = vrot.lane.b32.xlu0 %v2262_v38, %s4175_s20  ;;  %v1576_v9 = vsel %vm1575_vm5, %v1543_v6, %v1252_v48  ;;  %v1891_v36 = vsel %vm1882_vm8, %v1874_v2, %v1697_v8  ;;  %v2270_v8 = vrot.slane %v5890_v59, 3 }
 0x2b1   : > { %2201 = vrot.lane.b32.xlu1 %v2199_v46, %s4180_s9  ;;  %v1560_v62 = vsel %vm1542_vm4, %v1527_v34, %v1190_v53  ;;  %v1908_v3 = vsel %vm1899_vm9, %v1891_v36, %v1729_v51  ;;  %v2619_v46 = vrot.slane %v5934_v35, 1  ;;  %v2475_v34 = vrot.slane %v5569_v57, 6 }
 0x2b3   : > { %v1348_v26 = vpop.permute.xlu1 %1347 }
 0x2b4   : > { %v1609_v18 = vsel %vm1608_vm6, %v1576_v9, %v1348_v26  ;;  %v1286_v47 = vpop.permute.xlu0 %1285  ;;  %2346 = vrot.lane.b32.xlu0 %v2344_v49, %s4176_s24  ;;  %v2101_v9 = vrot.slane %v5672_v29, 5  ;;  %v2352_v26 = vrot.slane %v5905_v20, 2  ;;  %v2287_v49 = vrot.slane %v5747_v13, 5 }
 0x2b5   : > { %v1657_v4 = vrot.slane %v1609_v18, 1  ;;  %2282 = vrot.lane.b32.xlu1 %v2279_v45, %s4178_s21  ;;  %v1593_v10 = vsel %vm1575_vm5, %v1560_v62, %v1286_v47  ;;  %v1689_v28 = vrot.slane %v1609_v18, 2  ;;  %v1721_v7 = vrot.slane %v1609_v18, 3 }
 0x2b6   : > { %v2369_v47 = vrot.slane %v5815_v41, 4 }
 0x2b7   : > { %v1382_v33 = vpop.permute.xlu1 %1381  ;;  %v1866_v21 = vsel %vm1865_vm7, %v1609_v18, %v1657_v4  ;;  %v2458_v18 = vrot.slane %v5821_v17, 4  ;;  %v2644_v4 = vrot.slane %v5846_v22, 4  ;;  %vm2065_vm7 = vcmask 394240  }
 0x2b8   : > { %v1626_v58 = vsel %vm1608_vm6, %v1593_v10, %v1382_v33  ;;  %v1158_v63 = vpop.permute.xlu0 %1157  ;;  %2452 = vrot.lane.b32.xlu0 %v2450_v50, %s4177_s22  ;;  %v1883_v1 = vsel %vm1882_vm8, %v1866_v21, %v1689_v28  ;;  %v2627_v10 = vrot.slane %v5934_v35, 2  ;;  %v2278_v33 = vrot.slane %v5890_v59, 4 }
 0x2b9   : > { %v1777_v40 = vrot.slane %v1626_v58, 4  ;;  %v1809_v54 = vrot.slane %v1626_v58, 5  ;;  %2364 = vrot.lane.b32.xlu1 %v2361_v15, %s4177_s22  ;;  %v1841_v39 = vrot.slane %v1626_v58, 6  ;;  %v1544_v30 = vsel %vm1542_vm4, %v1511_v19, %v1158_v63 }
 0x2ba   : > { %v1900_v53 = vsel %vm1899_vm9, %v1883_v1, %v1721_v7  ;;  %v2109_v50 = vrot.slane %v5672_v29, 6  ;;  %v2360_v63 = vrot.slane %v5905_v20, 3  ;;  %v2295_v15 = vrot.slane %v5747_v13, 6 }
 0x2bb   : > { %v1925_v25 = vsel %vm1916_vm10, %v1908_v3, %v1777_v40  ;;  %v1350_v32 = vpop.permute.xlu1 %1349  ;;  %v2466_v3 = vrot.slane %v5821_v17, 5  ;;  %v2377_v21 = vrot.slane %v5815_v41, 5  ;;  %v2368_v1 = vrot.slane %v5905_v20, 4 }
 0x2bc   : > { %v1942_v43 = vsel %vm1933_vm11, %v1925_v25, %v1809_v54  ;;  %v1254_v27 = vpop.permute.xlu0 %1253  ;;  %2533 = vrot.lane.b32.xlu0 %v2530_v0, %s4176_s24  ;;  %v2652_v0 = vrot.slane %v5846_v22, 5  ;;  %vm2058_vm4 = vcmask 1043459   ;;  %vm2248_vm8 = vcmask 1042192  }
 0x2bd   : > { %v5996_v52 = vsel %vm1950_vm12, %v1942_v43, %v1841_v39  ;;  %v1577_v60 = vsel %vm1575_vm5, %v1544_v30, %v1254_v27  ;;  %2470 = vrot.lane.b32.xlu1 %v2467_v23, %s4179_s23  ;;  %v2546_v39 = vrot.slane %v5924_v12, 3  ;;  %v2635_v43 = vrot.slane %v5934_v35, 3 }
 0x2be   : > { %v1610_v11 = vsel %vm1608_vm6, %v1577_v60, %v1350_v32  ;;  %v2286_v60 = vrot.slane %v5890_v59, 5  ;;  %vm2060_vm5 = vcmask 1045509   ;;  %vm2062_vm6 = vcmask 1047559  }
 0x2bf   : > { %v1769_v48 = vrot.slane %v1610_v11, 4  ;;  %v1801_v38 = vrot.slane %v1610_v11, 5  ;;  %v1833_v5 = vrot.slane %v1610_v11, 6  ;;  %v6030_v62 = vpop.permute.xlu1 %2171  ;;  %vm2249_vm9 = vcmask 150530  }
 0x2c0   : > { %2639 = vrot.lane.b32.xlu0 %v2636_v61, %s4177_s22  ;;  %v6019_v2 = vpop.permute.xlu0 %2163  ;;  %v2554_v61 = vrot.slane %v5924_v12, 4 }
 0x2c1   : > { %v1917_v44 = vsel %vm1916_vm10, %v1900_v53, %v1769_v48  ;;  %2621 = vrot.lane.b32.xlu1 %v2619_v46, %s4176_s24  ;;  %v2537_v46 = vrot.slane %v5944_v56, 2 }
 0x2c2   : > { %v1934_v42 = vsel %vm1933_vm11, %v1917_v44, %v1801_v38  ;;  %v2385_v38 = vrot.slane %v5815_v41, 6  ;;  %vm2155_vm11 = vcmask 796040  }
 0x2c3   : > { %v6010_v6 = vsel %vm1950_vm12, %v1934_v42, %v1833_v5  ;;  %v6040_v51 = vpop.permute.xlu1 %2161  ;;  %v2660_v5 = vrot.slane %v5846_v22, 6  ;;  %v2643_v42 = vrot.slane %v5934_v35, 4  ;;  %vm2250_vm12 = vmor %vm2249_vm9, %vm2248_vm8  ;;  %vm3034_vm8 = vcmask 64512  }
 0x2c4   : > { %2272 = vrot.lane.b32.xlu0 %v2270_v8, %s4177_s22  ;;  %v2376_v8 = vrot.slane %v5905_v20, 5 }
 0x2c5   : > { %2103 = vrot.lane.b32.xlu1 %v2101_v9, %s4179_s23 }
 0x2c6   : > { %v2074_v45 = vpop.permute.xlu0 %2073 }
 0x2c7   : > { %v2118_v40 = vsel %vm2017_vm13, %v5487_v14, %v2074_v45  ;;  %v2082_v54 = vpop.permute.xlu1 %2081  ;;  %v2529_v14 = vrot.slane %v5944_v56, 1  ;;  %v2562_v45 = vrot.slane %v5924_v12, 5 }
 0x2c8   : > { %2354 = vrot.lane.b32.xlu0 %v2352_v26, %s4175_s20  ;;  %v2120_v31 = vsel %vm2020_vm14, %v2118_v40, %v2082_v54 }
 0x2c9   : > { %2290 = vrot.lane.b32.xlu1 %v2287_v49, %s4179_s23  ;;  %v2294_v49 = vrot.slane %v5890_v59, 6 }
 0x2ca   : > { %v6033_v36 = vpop.permute.xlu0 %2179 }
 0x2cb   : > { %v6072_v32 = vpop.permute.xlu1 %2187 }
 0x2cc   : > { %2460 = vrot.lane.b32.xlu0 %v2458_v18, %s4178_s21 }
 0x2cd   : > { %2372 = vrot.lane.b32.xlu1 %v2369_v47, %s4178_s21 }
 0x2ce   : > { %v6043_v58 = vpop.permute.xlu0 %2169 }
 0x2d0   : > { %2541 = vrot.lane.b32.xlu0 %v2538_v37, %s4175_s20 }
 0x2d1   : > { %2478 = vrot.lane.b32.xlu1 %v2475_v34, %s4180_s9  ;;  %v2545_v34 = vrot.slane %v5944_v56, 3 }
 0x2d4   : > { %2647 = vrot.lane.b32.xlu0 %v2644_v4, %s4178_s21  ;;  %v2384_v4 = vrot.slane %v5905_v20, 6 }
 0x2d5   : > { %2629 = vrot.lane.b32.xlu1 %v2627_v10, %s4175_s20 }
 0x2d8   : > { %2280 = vrot.lane.b32.xlu0 %v2278_v33, %s4178_s21 }
 0x2d9   : > { %2111 = vrot.lane.b32.xlu1 %v2109_v50, %s4180_s9  ;;  %v2651_v50 = vrot.slane %v5934_v35, 5 }
 0x2dc   : > { %2362 = vrot.lane.b32.xlu0 %v2360_v63, %s4177_s22 }
 0x2dd   : > { %2298 = vrot.lane.b32.xlu1 %v2295_v15, %s4180_s9 }
 0x2de   : > { %v2439_v28 = vpop.permute.xlu0 %2438 }
 0x2df   : > { %v2483_v30 = vsel %vm2017_vm13, %v5569_v57, %v2439_v28  ;;  %v2474_v57 = vrot.slane %v5821_v17, 6  ;;  %v2570_v28 = vrot.slane %v5924_v12, 6 }
 0x2e0   : > { %2468 = vrot.lane.b32.xlu0 %v2466_v3, %s4179_s23  ;;  %v2553_v3 = vrot.slane %v5944_v56, 4 }
 0x2e1   : > { %2380 = vrot.lane.b32.xlu1 %v2377_v21, %s4179_s23  ;;  %v2561_v21 = vrot.slane %v5944_v56, 5 }
 0x2e2   : > { %v2090_v55 = vpop.permute.xlu0 %2089 }
 0x2e3   : > { %v2122_v19 = vsel %vm2023_vm15, %v2120_v31, %v2090_v55  ;;  %v2659_v55 = vrot.slane %v5934_v35, 6 }
 0x2e4   : > { %2549 = vrot.lane.b32.xlu0 %v2546_v39, %s4177_s22  ;;  %v1970_v39 = vrot.slane %v5996_v52, 1 }
 0x2e5   : > { %2531 = vrot.lane.b32.xlu1 %v2529_v14, %s4176_s24 }
 0x2e6   : > { %v6062_v25 = vpop.permute.xlu0 %2195 }
 0x2e8   : > { %2655 = vrot.lane.b32.xlu0 %v2652_v0, %s4179_s23  ;;  %v2569_v0 = vrot.slane %v5944_v56, 6 }
 0x2e9   : > { %2637 = vrot.lane.b32.xlu1 %v2635_v43, %s4177_s22 }
 0x2ea   : > { %v2447_v27 = vpop.permute.xlu0 %2446 }
 0x2eb   : > { %v2485_v23 = vsel %vm2020_vm14, %v2483_v30, %v2447_v27  ;;  %v1969_v30 = vrot.slane %v6010_v6, 1 }
 0x2ec   : > { %2370 = vrot.lane.b32.xlu0 %v2368_v1, %s4178_s21  ;;  %v1978_v1 = vrot.slane %v5996_v52, 2 }
 0x2ed   : > { %2288 = vrot.lane.b32.xlu1 %v2286_v60, %s4179_s23  ;;  %v2208_v60 = vsel %vm2017_vm13, %v5449_v24, %v6019_v2  ;;  %v1986_v24 = vrot.slane %v5996_v52, 3 }
 0x2ee   : > { %v2098_v7 = vpop.permute.xlu0 %2097  ;;  %v2210_v2 = vsel %vm2020_vm14, %v2208_v60, %v6030_v62 }
 0x2ef   : > { %v6078_v11 = vsel %vm2026_vm0, %v2122_v19, %v2098_v7  ;;  %v2072_v48 = vpop.permute.xlu1 %2071  ;;  %v4181_v7 = vmov 1983009808  }
 0x2f0   : > { %2476 = vrot.lane.b32.xlu0 %v2474_v57, %s4180_s9  ;;  %v2117_v9 = vsel %vm2017_vm13, %v5672_v29, %v2072_v48  ;;  %v2038_v57 = vunpack.c.l.s4 %v4181_v7  ;;  %v2040_v48 = vlaneseq }
 0x2f1   : > { %2388 = vrot.lane.b32.xlu1 %v2385_v38, %s4180_s9 }
 0x2f2   : > { %v6103_v47 = vpop.permute.xlu0 %2203 }
 0x2f3   : > { %v6085_v53 = vpop.permute.xlu1 %2177 }
 0x2f4   : > { %2557 = vrot.lane.b32.xlu0 %v2554_v61, %s4178_s21 }
 0x2f5   : > { %2539 = vrot.lane.b32.xlu1 %v2537_v46, %s4175_s20  ;;  %v1977_v46 = vrot.slane %v6010_v6, 2 }
 0x2f7   : > { %v2259_v44 = vpop.permute.xlu1 %2258 }
 0x2f8   : > { %2663 = vrot.lane.b32.xlu0 %v2660_v5, %s4180_s9  ;;  %v2303_v10 = vsel %vm2017_vm13, %v5747_v13, %v2259_v44 }
 0x2f9   : > { %2645 = vrot.lane.b32.xlu1 %v2643_v42, %s4178_s21 }
 0x2fb   : > { %v2080_v26 = vpop.permute.xlu1 %2079 }
 0x2fc   : > { %v6099_v18 = vsel %vm2020_vm14, %v2117_v9, %v2080_v26  ;;  %2378 = vrot.lane.b32.xlu0 %v2376_v8, %s4179_s23  ;;  %v2039_v9 = vunpack.c.0.s8 %v2038_v57  ;;  %v6160_v26 = vshrl.u32 %v2040_v48, 7 }
 0x2fd   : > { %2296 = vrot.lane.b32.xlu1 %v2294_v49, %s4180_s9 }
 0x2ff   : > { %v6106_v37 = vpop.permute.xlu1 %2185 }
 0x300   : > { %2565 = vrot.lane.b32.xlu0 %v2562_v45, %s4179_s23  ;;  %v1985_v45 = vrot.slane %v6010_v6, 3 }
 0x301   : > { %2547 = vrot.lane.b32.xlu1 %v2545_v34, %s4177_s22 }
 0x302   : > { %v2349_v29 = vpop.permute.xlu0 %2348 }
 0x303   : > { %v2267_v33 = vpop.permute.xlu1 %2266  ;;  %v2393_v5 = vsel %vm2017_vm13, %v5815_v41, %v2349_v29  ;;  %v1994_v29 = vrot.slane %v5996_v52, 4 }
 0x304   : > { %v2305_v63 = vsel %vm2020_vm14, %v2303_v10, %v2267_v33  ;;  %2386 = vrot.lane.b32.xlu0 %v2384_v4, %s4180_s9  ;;  %v6177_v10 = vsub.s32 %v2039_v9, %v6160_v26 }
 0x305   : > { %2653 = vrot.lane.b32.xlu1 %v2651_v50, %s4179_s23 }
 0x306   : > { %v2455_v15 = vpop.permute.xlu0 %2454 }
 0x307   : > { %v2487_v40 = vsel %vm2023_vm15, %v2485_v23, %v2455_v15  ;;  %v2437_v54 = vpop.permute.xlu1 %2436 }
 0x308   : > { %2573 = vrot.lane.b32.xlu0 %v2570_v28, %s4180_s9  ;;  %v2482_v38 = vsel %vm2017_vm13, %v5821_v17, %v2437_v54  ;;  %v2212_v17 = vsel %vm2023_vm15, %v2210_v2, %v6033_v36  ;;  %v2002_v28 = vrot.slane %v5996_v52, 5 }
 0x309   : > { %2555 = vrot.lane.b32.xlu1 %v2553_v3, %s4178_s21  ;;  %v2214_v36 = vsel %vm2026_vm0, %v2212_v17, %v6072_v32  ;;  %v2207_v32 = vsel %vm2017_vm13, %v5474_v16, %v6040_v51  ;;  %v2001_v3 = vrot.slane %v6010_v6, 5 }
 0x30a   : > { %v6123_v13 = vpop.permute.xlu0 %2087 }
 0x30b   : > { %v2624_v31 = vpop.permute.xlu1 %2623 }
 0x30c   : > { %2563 = vrot.lane.b32.xlu0 %v2561_v21, %s4179_s23  ;;  %v2668_v41 = vsel %vm2017_vm13, %v5846_v22, %v2624_v31  ;;  %v2216_v22 = vsel %vm2029_vm1, %v2214_v36, %v6062_v25  ;;  %v2209_v25 = vsel %vm2020_vm14, %v2207_v32, %v6043_v58  ;;  %v3923_v36 = vld [vmem:[%s4372_s18 + $0x70] ss:$8 sps:$4 sm:$0xff]  }
 0x30d   : > { %2661 = vrot.lane.b32.xlu1 %v2659_v55, %s4180_s9  ;;  %v2218_v33 = vsel %vm2032_vm2, %v2216_v22, %v6103_v47  ;;  %v2211_v47 = vsel %vm2023_vm15, %v2209_v25, %v6085_v53  ;;  %v2010_v55 = vrot.slane %v5996_v52, 6  ;;  %v3924_v22 = vld [vmem:[%s4372_s18 + $0x64] ss:$8 sps:$4 sm:$0xff]  }
 0x30e   : > { %v2194_v19 = vpop.permute.xlu0 %2193  ;;  %v2213_v54 = vsel %vm2026_vm0, %v2211_v47, %v6106_v37 }
 0x30f   : > { %v6130_v14 = vpop.permute.xlu1 %2105  ;;  %v2215_v58 = vsel %vm2029_vm1, %v2213_v54, %v2194_v19 }
 0x310   : > { %1973 = vrot.lane.b32.xlu0 %v1970_v39, %s4176_s24 }
 0x311   : > { %2571 = vrot.lane.b32.xlu1 %v2569_v0, %s4180_s9 }
 0x312   : > { %v2275_v43 = vpop.permute.xlu0 %2274 }
 0x313   : > { %v6137_v27 = vsel %vm2023_vm15, %v2305_v63, %v2275_v43  ;;  %v2257_v23 = vpop.permute.xlu1 %2256  ;;  %v1993_v63 = vrot.slane %v6010_v6, 4  ;;  %v2009_v43 = vrot.slane %v6010_v6, 6 }
 0x314   : > { %1971 = vrot.lane.b32.xlu0 %v1969_v30, %s4176_s24  ;;  %v2302_v16 = vsel %vm2017_vm13, %v5890_v59, %v2257_v23 }
 0x315   : > { %1981 = vrot.lane.b32.xlu1 %v1978_v1, %s4175_s20 }
 0x316   : > { %v2445_v61 = vpop.permute.xlu0 %2444 }
 0x317   : > { %v6151_v44 = vsel %vm2020_vm14, %v2482_v38, %v2445_v61  ;;  %v2357_v42 = vpop.permute.xlu1 %2356 }
 0x318   : > { %v2395_v8 = vsel %vm2020_vm14, %v2393_v5, %v2357_v42  ;;  %1979 = vrot.lane.b32.xlu0 %v1977_v46, %s4175_s20 }
 0x319   : > { %1989 = vrot.lane.b32.xlu1 %v1986_v24, %s4177_s22 }
 0x31a   : > { %v2632_v49 = vpop.permute.xlu0 %2631 }
 0x31b   : > { %v2670_v62 = vsel %vm2020_vm14, %v2668_v41, %v2632_v49  ;;  %v2463_v34 = vpop.permute.xlu1 %2462 }
 0x31c   : > { %v6171_v4 = vsel %vm2026_vm0, %v2487_v40, %v2463_v34  ;;  %1987 = vrot.lane.b32.xlu0 %v1985_v45, %s4177_s22  ;;  %v2234_v40 = vrot.slane %v2218_v33, %v6177_v10  ;;  %v2126_v45 = vsel %vm2029_vm1, %v6078_v11, %v6130_v14  ;;  %v3926_v11 = vld [vmem:[%s4372_s18 + $0x60] ss:$8 sps:$4 sm:$0xff]  }
 0x31d   : > { %1997 = vrot.lane.b32.xlu1 %v1994_v29, %s4178_s21  ;;  %v3921_v29 = vld [vmem:[%s4372_s18 + $0x74] ss:$8 sps:$4 sm:$0xff]  }
 0x31e   : > { %v2114_v50 = vpop.permute.xlu0 %2113  ;;  %v2237_v37 = vrot.slane %v2234_v40, 7  ;;  %3044 = vmatprep.subr.bf16.mxu0 %v3921_v29 }
 0x31f   : > { %v6186_v15 = vpop.permute.xlu1 %2095  ;;  %3045 = vmatpush1.bf16.msra.mxu0 %v3923_v36 }
 0x320   : > { %1995 = vrot.lane.b32.xlu0 %v1993_v63, %s4178_s21  ;;  %v2121_v63 = vsel %vm2023_vm15, %v6099_v18, %v6123_v13  ;;  %3046 = vmatprep.subr.bf16.mxu0 %v3924_v22  ;;  %v3929_v13 = vld [vmem:[%s4372_s18 + $0x50] ss:$8 sps:$4 sm:$0xff]  }
 0x321   : > { %2005 = vrot.lane.b32.xlu1 %v2002_v28, %s4179_s23  ;;  %v2123_v14 = vsel %vm2026_vm0, %v2121_v63, %v6186_v15  ;;  %v3927_v28 = vld [vmem:[%s4372_s18 + $0x54] ss:$8 sps:$4 sm:$0xff]  }
 0x322   : > { %v2265_v51 = vpop.permute.xlu0 %2264 }
 0x323   : > { %v6203_v21 = vsel %vm2020_vm14, %v2302_v16, %v2265_v51  ;;  %v2202_v31 = vpop.permute.xlu1 %2201  ;;  %3047 = vmatpush1.bf16.msra.mxu0 %v3926_v11  ;;  %v3930_v51 = vld [vmem:[%s4372_s18 + $0x44] ss:$8 sps:$4 sm:$0xff]   ;;  %v3939_v11 = vld [vmem:[%s4372_s18 + $0x14] ss:$8 sps:$4 sm:$0xff]  }
 0x324   : > { %v2217_v53 = vsel %vm2032_vm2, %v2215_v58, %v2202_v31  ;;  %2003 = vrot.lane.b32.xlu0 %v2001_v3, %s4179_s23  ;;  %3048 = vmatprep.subr.bf16.mxu0 %v3927_v28 }
 0x325   : > { %v2227_v39 = vrot.slane %v2217_v53, %v6177_v10  ;;  %2013 = vrot.lane.b32.xlu1 %v2010_v55, %s4180_s9  ;;  %v3932_v55 = vld [vmem:[%s4372_s18 + $0x40] ss:$8 sps:$4 sm:$0xff]  }
 0x326   : > { %v6210_v59 = vpop.permute.xlu0 %2346 }
 0x327   : > { %v2238_v19 = vsel %vm2056_vm3, %v2237_v37, %v2227_v39  ;;  %v2283_v0 = vpop.permute.xlu1 %2282  ;;  %3049 = vmatpush1.bf16.msra.mxu0 %v3929_v13 }
 0x328   : > { %v6216_v30 = vsel %vm2026_vm0, %v6137_v27, %v2283_v0  ;;  %v2239_v23 = vsel %vm2058_vm4, %v2237_v37, %v2238_v19  ;;  %3050 = vmatprep.subr.bf16.mxu0 %v3930_v51 }
 0x329   : > { %2011 = vrot.lane.b32.xlu1 %v2009_v43, %s4180_s9  ;;  %v2240_v1 = vsel %vm2060_vm5, %v2237_v37, %v2239_v23 }
 0x32a   : > { %v6221_v60 = vpop.permute.xlu0 %2452  ;;  %v2241_v7 = vsel %vm2062_vm6, %v2237_v37, %v2240_v1 }
 0x32b   : > { %v2365_v57 = vpop.permute.xlu1 %2364  ;;  %2242 = vrot.lane.b32.xlu0 %v2241_v7, %s4182_s14  ;;  %3051 = vmatpush1.bf16.msra.mxu0 %v3932_v55  ;;  %v2486_v29 = vsel %vm2023_vm15, %v6151_v44, %v6221_v60 }
 0x32c   : > { %v6225_v48 = vsel %vm2023_vm15, %v2395_v8, %v2365_v57 }
 0x32e   : > { %v6227_v38 = vpop.permute.xlu0 %2533 }
 0x32f   : > { %v2471_v27 = vpop.permute.xlu1 %2470 }
 0x330   : > { %v2491_v1 = vsel %vm2029_vm1, %v6171_v4, %v2471_v27 }
 0x332   : > { %v2640_v61 = vpop.permute.xlu0 %2639 }
 0x333   : > { %v6230_v46 = vsel %vm2023_vm15, %v2670_v62, %v2640_v61  ;;  %v6232_v5 = vpop.permute.xlu1 %2621  ;;  %v2128_v62 = vsel %vm2032_vm2, %v2126_v45, %v2114_v50  ;;  %v3935_v45 = vld [vmem:[%s4372_s18 + $0x30] ss:$8 sps:$4 sm:$0xff]  }
 0x334   : > { %v2144_v32 = vrot.slane %v2128_v62, %v6177_v10  ;;  %v3936_v62 = vld [vmem:[%s4372_s18 + $0x24] ss:$8 sps:$4 sm:$0xff]  }
 0x336   : > { %v6234_v42 = vpop.permute.xlu0 %2272  ;;  %v2147_v54 = vrot.slane %v2144_v32, 7 }
 0x337   : > { %v2104_v24 = vpop.permute.xlu1 %2103 }
 0x338   : > { %v2125_v25 = vsel %vm2029_vm1, %v2123_v14, %v2104_v24  ;;  %v3933_v24 = vld [vmem:[%s4372_s18 + $0x34] ss:$8 sps:$4 sm:$0xff]  }
 0x339   : > { %3052 = vmatprep.subr.bf16.mxu0 %v3933_v24  ;;  %v3950_v24 = vld [vmem:[%s4372_s18 + $0xf0] ss:$8 sps:$4 sm:$0xff]  }
 0x33a   : > { %v6236_v2 = vpop.permute.xlu0 %2354  ;;  %3053 = vmatpush1.bf16.msra.mxu0 %v3935_v45  ;;  %v2784_v45 = vld [vmem:[%s4372_s18 + $0x160] sm:$0xff] }
 0x33b   : > { %v6238_v17 = vpop.permute.xlu1 %2290  ;;  %3054 = vmatprep.subr.bf16.mxu0 %v3936_v62  ;;  %v2785_v62 = vld [vmem:[%s4372_s18 + $0x168] sm:$0xff] }
 0x33e   : > { %v2461_v8 = vpop.permute.xlu0 %2460 }
 0x33f   : > { %v6240_v9 = vpop.permute.xlu1 %2372  ;;  %v2488_v22 = vsel %vm2026_vm0, %v2486_v29, %v2461_v8  ;;  %v3941_v8 = vld [vmem:[%s4372_s18 + $0x10] ss:$8 sps:$4 sm:$0xff]  }
 0x340   : > { %v2399_v29 = vsel %vm2026_vm0, %v6225_v48, %v6240_v9  ;;  %v2392_v48 = vsel %vm2017_vm13, %v5905_v20, %v6210_v59  ;;  %v3959_v59 = vld [vmem:[%s4372_s18 + $0xd4] ss:$8 sps:$4 sm:$0xff]  }
 0x342   : > { %v6242_v41 = vpop.permute.xlu0 %2541 }
 0x343   : > { %v2479_v49 = vpop.permute.xlu1 %2478 }
 0x344   : > { %v2493_v7 = vsel %vm2032_vm2, %v2491_v1, %v2479_v49  ;;  %v3938_v49 = vld [vmem:[%s4372_s18 + $0x20] ss:$8 sps:$4 sm:$0xff]  }
 0x345   : > { %v2509_v36 = vrot.slane %v2493_v7, %v6177_v10  ;;  %3055 = vmatpush1.bf16.msra.mxu0 %v3938_v49  ;;  %v3750_v49 = vcombine.low %v2784_v45, %v2785_v62  ;;  %v3965_v45 = vld [vmem:[%s4372_s18 + $0xc4] ss:$8 sps:$4 sm:$0xff]   ;;  %v3967_v62 = vld [vmem:[%s4372_s18 + $0xc0] ss:$8 sps:$4 sm:$0xff]  }
 0x346   : > { %v6248_v34 = vpop.permute.xlu0 %2647  ;;  %3056 = vmatprep.subr.bf16.mxu0 %v3939_v11  ;;  %v3956_v11 = vld [vmem:[%s4372_s18 + $0x154] ss:$8 sps:$4 sm:$0xff]  }
 0x347   : > { %v6253_v33 = vpop.permute.xlu1 %2629  ;;  %v2512_v14 = vrot.slane %v2509_v36, 7 }
 0x349   : > { %3057 = vmatpush1.bf16.msra.mxu0 %v3941_v8 }
 0x34a   : > { %v6262_v50 = vpop.permute.xlu0 %2280 }
 0x34b   : > { %v2112_v40 = vpop.permute.xlu1 %2111 }
 0x34c   : > { %v2127_v47 = vsel %vm2032_vm2, %v2125_v25, %v2112_v40 }
 0x34d   : > { %v2137_v18 = vrot.slane %v2127_v47, %v6177_v10 }
 0x34e   : > { %v6269_v16 = vpop.permute.xlu0 %2362 }
 0x34f   : > { %v2148_v15 = vsel %vm2056_vm3, %v2147_v54, %v2137_v18  ;;  %v2299_v3 = vpop.permute.xlu1 %2298 }
 0x350   : > { %v2149_v58 = vsel %vm2058_vm4, %v2147_v54, %v2148_v15  ;;  %v3942_v15 = vld [vmem:[%s4372_s18 + $0x4] ss:$8 sps:$4 sm:$0xff]  }
 0x351   : > { %v2150_v31 = vsel %vm2060_vm5, %v2147_v54, %v2149_v58  ;;  %v3944_v58 = vld [vmem:[%s4372_s18] ss:$8 sps:$4 sm:$0xff]   ;;  %3058 = vmatprep.subr.bf16.mxu0 %v3942_v15 }
 0x352   : > { %v2469_v53 = vpop.permute.xlu0 %2468  ;;  %v2151_v37 = vsel %vm2062_vm6, %v2147_v54, %v2150_v31  ;;  %v2311_v54 = vsel %vm2029_vm1, %v6216_v30, %v6238_v17  ;;  %v3945_v31 = vld [vmem:[%s4372_s18 + $0x174] ss:$8 sps:$4 sm:$0xff]   ;;  %v3951_v30 = vld [vmem:[%s4372_s18 + $0x164] ss:$8 sps:$4 sm:$0xff]   ;;  %v2306_v17 = vsel %vm2023_vm15, %v6203_v21, %v6234_v42  ;;  %3059 = vmatpush1.bf16.msra.mxu0 %v3944_v58 }
 0x353   : > { %v6277_v39 = vpop.permute.xlu1 %2380  ;;  %2152 = vrot.lane.b32.xlu1 %v2151_v37, %s4183_s17  ;;  %v2490_v4 = vsel %vm2029_vm1, %v2488_v22, %v2469_v53  ;;  %v2313_v13 = vsel %vm2032_vm2, %v2311_v54, %v2299_v3  ;;  %v3947_v53 = vld [vmem:[%s4372_s18 + $0x170] ss:$8 sps:$4 sm:$0xff]   ;;  %v3948_v37 = vld [vmem:[%s4372_s18 + $0xf4] ss:$8 sps:$4 sm:$0xff]   ;;  %3085 = vmatprep.subr.bf16.mxu1 %v3945_v31  ;;  %v2308_v1 = vsel %vm2026_vm0, %v2306_v17, %v6262_v50  ;;  %v3964_v31 = vld [vmem:[%s4372_s18 + $0x140] ss:$8 sps:$4 sm:$0xff]  }
 0x354   : > { %v2329_v3 = vrot.slane %v2313_v13, %v6177_v10  ;;  %3086 = vmatpush1.bf16.msra.mxu1 %v3947_v53  ;;  %3060 = vmatprep.subr.bf16.mxu0 %v3948_v37  ;;  %v2401_v50 = vsel %vm2029_vm1, %v2399_v29, %v6277_v39  ;;  %v3955_v39 = vld [vmem:[%s4372_s18 + $0xe0] ss:$8 sps:$4 sm:$0xff]   ;;  %v3968_v29 = vld [vmem:[%s4372_s18 + $0x134] ss:$8 sps:$4 sm:$0xff]  }
 0x355   : > { %3087 = vmatprep.subr.bf16.mxu1 %v3951_v30  ;;  %v2578_v30 = vsel %vm2017_vm13, %v5924_v12, %v6227_v38  ;;  %v2667_v12 = vsel %vm2017_vm13, %v5934_v35, %v6232_v5 }
 0x356   : > { %v6279_v19 = vpop.permute.xlu0 %2549  ;;  %v2332_v22 = vrot.slane %v2329_v3, 7  ;;  %3061 = vmatpush2.bf16.msra.mxu0 %v3950_v24  ;;  %v2580_v3 = vsel %vm2020_vm14, %v2578_v30, %v6242_v41  ;;  %v2669_v41 = vsel %vm2020_vm14, %v2667_v12, %v6253_v33  ;;  %v3988_v30 = vld [vmem:[%s4372_s18 + $0x100] ss:$8 sps:$4 sm:$0xff]  }
 0x357   : > { %v6281_v0 = vpop.permute.xlu1 %2531  ;;  %v2582_v38 = vsel %vm2023_vm15, %v2580_v3, %v6279_v19 }
 0x358   : > { %3088 = vmatpush1.bf16.msra.mxu1 %v3750_v49 }
 0x359   : > { %3089 = vmatprep.subr.bf16.mxu1 %v3956_v11  ;;  %v3976_v11 = vld [vmem:[%s4372_s18 + $0x120] ss:$8 sps:$4 sm:$0xff]  }
 0x35a   : > { %v6283_v43 = vpop.permute.xlu0 %2655 }
 0x35b   : > { %v6285_v23 = vpop.permute.xlu1 %2637 }
 0x35c   : > { %v2671_v35 = vsel %vm2023_vm15, %v2669_v41, %v6285_v23 }
 0x35e   : > { %v6290_v57 = vpop.permute.xlu0 %2370 }
 0x35f   : > { %v2289_v61 = vpop.permute.xlu1 %2288 }
 0x360   : > { %v2310_v21 = vsel %vm2029_vm1, %v2308_v1, %v2289_v61  ;;  %v2394_v61 = vsel %vm2020_vm14, %v2392_v48, %v6236_v2  ;;  %v3977_v48 = vld [vmem:[%s4372_s18 + $0xa4] ss:$8 sps:$4 sm:$0xff]  }
 0x362   : > { %v2477_v27 = vpop.permute.xlu0 %2476 }
 0x363   : > { %v2492_v63 = vsel %vm2032_vm2, %v2490_v4, %v2477_v27  ;;  %v2389_v32 = vpop.permute.xlu1 %2388 }
 0x364   : > { %v2502_v28 = vrot.slane %v2492_v63, %v6177_v10  ;;  %v2403_v4 = vsel %vm2032_vm2, %v2401_v50, %v2389_v32  ;;  %v3953_v63 = vld [vmem:[%s4372_s18 + $0xe4] ss:$8 sps:$4 sm:$0xff]   ;;  %v2577_v50 = vsel %vm2017_vm13, %v5944_v56, %v6281_v0 }
 0x365   : > { %3062 = vmatprep.subr.bf16.mxu0 %v3953_v63  ;;  %v2419_v8 = vrot.slane %v2403_v4, %v6177_v10  ;;  %v3971_v4 = vld [vmem:[%s4372_s18 + $0xb4] ss:$8 sps:$4 sm:$0xff]  }
 0x366   : > { %v2513_v44 = vsel %vm2056_vm3, %v2512_v14, %v2502_v28  ;;  %v6306_v60 = vpop.permute.xlu0 %2557  ;;  %v3958_v28 = vld [vmem:[%s4372_s18 + $0x150] ss:$8 sps:$4 sm:$0xff]   ;;  %3063 = vmatpush2.bf16.msra.mxu0 %v3955_v39 }
 0x367   : > { %v6309_v25 = vpop.permute.xlu1 %2539  ;;  %v2514_v40 = vsel %vm2058_vm4, %v2512_v14, %v2513_v44  ;;  %v2396_v44 = vsel %vm2023_vm15, %v2394_v61, %v6269_v16  ;;  %v3961_v16 = vld [vmem:[%s4372_s18 + $0xd0] ss:$8 sps:$4 sm:$0xff]   ;;  %3090 = vmatpush1.bf16.msra.mxu1 %v3958_v28  ;;  %v2422_v53 = vrot.slane %v2419_v8, 7  ;;  %3064 = vmatprep.subr.bf16.mxu0 %v3959_v59  ;;  %v3980_v61 = vld [vmem:[%s4372_s18 + $0x114] ss:$8 sps:$4 sm:$0xff]  }
 0x368   : > { %v2515_v47 = vsel %vm2060_vm5, %v2512_v14, %v2514_v40  ;;  %v3962_v40 = vld [vmem:[%s4372_s18 + $0x144] ss:$8 sps:$4 sm:$0xff]   ;;  %v2398_v2 = vsel %vm2026_vm0, %v2396_v44, %v6290_v57  ;;  %v2674_v57 = vsel %vm2026_vm0, %v6230_v46, %v6248_v34  ;;  %v2579_v49 = vsel %vm2020_vm14, %v2577_v50, %v6309_v25 }
 0x369   : > { %v2516_v18 = vsel %vm2062_vm6, %v2512_v14, %v2515_v47  ;;  %3091 = vmatprep.subr.bf16.mxu1 %v3962_v40  ;;  %v2676_v17 = vsel %vm2029_vm1, %v2674_v57, %v6283_v43  ;;  %v3982_v40 = vld [vmem:[%s4372_s18 + $0x110] ss:$8 sps:$4 sm:$0xff]  }
 0x36a   : > { %2517 = vrot.lane.b32.xlu0 %v2516_v18, %s4184_s10  ;;  %v6318_v51 = vpop.permute.xlu0 %2663  ;;  %3065 = vmatpush2.bf16.msra.mxu0 %v3961_v16 }
 0x36b   : > { %v6323_v55 = vpop.permute.xlu1 %2645  ;;  %v2678_v46 = vsel %vm2032_vm2, %v2676_v17, %v6318_v51  ;;  %3092 = vmatpush1.bf16.msra.mxu1 %v3964_v31  ;;  %v2584_v51 = vsel %vm2026_vm0, %v2582_v38, %v6306_v60  ;;  %3066 = vmatprep.subr.bf16.mxu0 %v3965_v45  ;;  %v3989_v17 = vld [vmem:[%s4372_s18 + $0x84] ss:$8 sps:$4 sm:$0xff]   ;;  %v3991_v38 = vld [vmem:[%s4372_s18 + $0x80] ss:$8 sps:$4 sm:$0xff]  }
 0x36c   : > { %v2694_v5 = vrot.slane %v2678_v46, %v6177_v10  ;;  %v2673_v60 = vsel %vm2026_vm0, %v2671_v35, %v6323_v55  ;;  %3093 = vmatprep.subr.bf16.mxu1 %v3968_v29  ;;  %v3973_v55 = vld [vmem:[%s4372_s18 + $0xb0] ss:$8 sps:$4 sm:$0xff]  }
 0x36e   : > { %v2379_v7 = vpop.permute.xlu0 %2378  ;;  %3067 = vmatpush2.bf16.msra.mxu0 %v3967_v62 }
 0x36f   : > { %v2297_v42 = vpop.permute.xlu1 %2296  ;;  %v2400_v54 = vsel %vm2029_vm1, %v2398_v2, %v2379_v7  ;;  %3068 = vmatprep.subr.bf16.mxu0 %v3971_v4  ;;  %v3983_v2 = vld [vmem:[%s4372_s18 + $0x94] ss:$8 sps:$4 sm:$0xff]  }
 0x370   : > { %v2312_v36 = vsel %vm2032_vm2, %v2310_v21, %v2297_v42  ;;  %v3970_v21 = vld [vmem:[%s4372_s18 + $0x130] ss:$8 sps:$4 sm:$0xff]  }
 0x371   : > { %v2322_v27 = vrot.slane %v2312_v36, %v6177_v10  ;;  %3094 = vmatpush1.bf16.msra.mxu1 %v3970_v21 }
 0x372   : > { %v2566_v9 = vpop.permute.xlu0 %2565  ;;  %3069 = vmatpush2.bf16.msra.mxu0 %v3973_v55 }
 0x373   : > { %v2333_v14 = vsel %vm2056_vm3, %v2332_v22, %v2322_v27  ;;  %v6355_v32 = vpop.permute.xlu1 %2547  ;;  %v2586_v19 = vsel %vm2029_vm1, %v2584_v51, %v2566_v9  ;;  %v3974_v27 = vld [vmem:[%s4372_s18 + $0x124] ss:$8 sps:$4 sm:$0xff]   ;;  %v2697_v9 = vrot.slane %v2694_v5, 7  ;;  %3070 = vmatprep.subr.bf16.mxu0 %v3977_v48 }
 0x374   : > { %v2334_v20 = vsel %vm2058_vm4, %v2332_v22, %v2333_v14  ;;  %v2581_v56 = vsel %vm2023_vm15, %v2579_v49, %v6355_v32  ;;  %3095 = vmatprep.subr.bf16.mxu1 %v3974_v27  ;;  %v3979_v32 = vld [vmem:[%s4372_s18 + $0xa0] ss:$8 sps:$4 sm:$0xff]  }
 0x375   : > { %v2335_v47 = vsel %vm2060_vm5, %v2332_v22, %v2334_v20  ;;  %3096 = vmatpush1.bf16.msra.mxu1 %v3976_v11 }
 0x376   : > { %v2387_v18 = vpop.permute.xlu0 %2386  ;;  %v2336_v13 = vsel %vm2062_vm6, %v2332_v22, %v2335_v47  ;;  %3097 = vmatprep.subr.bf16.mxu1 %v3980_v61  ;;  %3071 = vmatpush2.bf16.msra.mxu0 %v3979_v32 }
 0x377   : > { %v2402_v15 = vsel %vm2032_vm2, %v2400_v54, %v2387_v18  ;;  %v2654_v58 = vpop.permute.xlu1 %2653  ;;  %2337 = vrot.lane.b32.xlu1 %v2336_v13, %s4185_s12  ;;  %v3986_v13 = vld [vmem:[%s4372_s18 + $0x104] ss:$8 sps:$4 sm:$0xff]   ;;  %3072 = vmatprep.subr.bf16.mxu0 %v3983_v2 }
 0x378   : > { %v2412_v37 = vrot.slane %v2402_v15, %v6177_v10  ;;  %v2675_v36 = vsel %vm2029_vm1, %v2673_v60, %v2654_v58  ;;  %v2788_v58 = vld [vmem:[%s4372_s18 + $0x180] sm:$0xff] }
 0x379   : > { %3098 = vmatpush1.bf16.msra.mxu1 %v3982_v40  ;;  %v3755_v46 = vcombine.high %v2788_v58, %v2788_v58 }
 0x37a   : > { %v2423_v34 = vsel %vm2056_vm3, %v2422_v53, %v2412_v37  ;;  %v2574_v1 = vpop.permute.xlu0 %2573  ;;  %3099 = vmatprep.subr.bf16.mxu1 %v3986_v13 }
 0x37b   : > { %v2556_v43 = vpop.permute.xlu1 %2555  ;;  %v2424_v7 = vsel %vm2058_vm4, %v2422_v53, %v2423_v34  ;;  %v2588_v42 = vsel %vm2032_vm2, %v2586_v19, %v2574_v1 }
 0x37c   : > { %v2425_v24 = vsel %vm2060_vm5, %v2422_v53, %v2424_v7  ;;  %v2604_v0 = vrot.slane %v2588_v42, %v6177_v10  ;;  %v2583_v25 = vsel %vm2026_vm0, %v2581_v56, %v2556_v43  ;;  %v3754_v43 = vcombine.low %v2788_v58, %v2788_v58 }
 0x37d   : > { %v2426_v33 = vsel %vm2062_vm6, %v2422_v53, %v2425_v24  ;;  %v3985_v53 = vld [vmem:[%s4372_s18 + $0x90] ss:$8 sps:$4 sm:$0xff]   ;;  %3100 = vmatpush1.bf16.msra.mxu1 %v3988_v30 }
 0x37e   : > { %2427 = vrot.lane.b32.xlu0 %v2426_v33, %s4186_s11  ;;  %v2564_v23 = vpop.permute.xlu0 %2563  ;;  %v2607_v47 = vrot.slane %v2604_v0, 7  ;;  %3073 = vmatpush2.bf16.msra.mxu0 %v3985_v53  ;;  %v3039_v51 = vsel %vm1916_vm10, %v3754_v43, 0 }
 0x37f   : > { %v2662_v22 = vpop.permute.xlu1 %2661  ;;  %v2585_v28 = vsel %vm2029_vm1, %v2583_v25, %v2564_v23  ;;  %3074 = vmatprep.subr.bf16.mxu0 %v3989_v17  ;;  %3756 = vmatprep.subr.msk.bf16.mxu1 %vm1916_vm10, %v3755_v46  ;;  %vm2245_vm10 = vcmask 801792  }
 0x380   : > { %v2677_v63 = vsel %vm2032_vm2, %v2675_v36, %v2662_v22 }
 0x381   : > { %v2687_v39 = vrot.slane %v2677_v63, %v6177_v10  ;;  %3116 = vmatpush2.bf16.msra.mxu1 %v3039_v51 }
 0x382   : > { %v1974_v14 = vpop.permute.xlu0 %1973  ;;  %3075 = vmatpush2.bf16.msra.mxu0 %v3991_v38  ;;  %v2739_v38 = vld [vmem:[#allocation2] sm:$0xf] }
 0x383   : > { %v2698_v44 = vsel %vm2056_vm3, %v2697_v9, %v2687_v39  ;;  %v2572_v8 = vpop.permute.xlu1 %2571  ;;  %v2019_v45 = vsel %vm2017_vm13, %v5996_v52, %v1974_v14 }
 0x384   : > { %v2587_v20 = vsel %vm2032_vm2, %v2585_v28, %v2572_v8  ;;  %v2699_v59 = vsel %vm2058_vm4, %v2697_v9, %v2698_v44 }
 0x385   : > { %v2597_v54 = vrot.slane %v2587_v20, %v6177_v10  ;;  %v2700_v18 = vsel %vm2060_vm5, %v2697_v9, %v2699_v59 }
 0x386   : > { %v1972_v16 = vpop.permute.xlu0 %1971  ;;  %v2701_v15 = vsel %vm2062_vm6, %v2697_v9, %v2700_v18 }
 0x387   : > { %v2608_v31 = vsel %vm2056_vm3, %v2607_v47, %v2597_v54  ;;  %v1982_v57 = vpop.permute.xlu1 %1981  ;;  %2702 = vrot.lane.b32.xlu1 %v2701_v15, %s4187_s15  ;;  %v2018_v19 = vsel %vm2017_vm13, %v6010_v6, %v1972_v16  ;;  %vm2340_vm13 = vcmask 550040  }
 0x388   : > { %v2609_v37 = vsel %vm2058_vm4, %v2607_v47, %v2608_v31  ;;  %v2022_v29 = vsel %vm2020_vm14, %v2019_v45, %v1982_v57 }
 0x389   : > { %v2610_v3 = vsel %vm2060_vm5, %v2607_v47, %v2609_v37 }
 0x38a   : > { %v1980_v34 = vpop.permute.xlu0 %1979  ;;  %v2611_v1 = vsel %vm2062_vm6, %v2607_v47, %v2610_v3 }
 0x38b   : > { %v1990_v12 = vpop.permute.xlu1 %1989  ;;  %2612 = vrot.lane.b32.xlu0 %v2611_v1, %s4188_s16  ;;  %v2021_v60 = vsel %vm2020_vm14, %v2018_v19, %v1980_v34  ;;  %vm2523_vm14 = vcmask 1042344  }
 0x38c   : > { %v2025_v35 = vsel %vm2023_vm15, %v2022_v29, %v1990_v12 }
 0x38e   : > { %v1988_v7 = vpop.permute.xlu0 %1987 }
 0x38f   : > { %v1998_v41 = vpop.permute.xlu1 %1997  ;;  %v2024_v52 = vsel %vm2023_vm15, %v2021_v60, %v1988_v7  ;;  %vm2524_vm15 = vcmask 306178  }
 0x390   : > { %v2028_v5 = vsel %vm2026_vm0, %v2025_v35, %v1998_v41 }
 0x392   : > { %v1996_v24 = vpop.permute.xlu0 %1995 }
 0x393   : > { %v2006_v62 = vpop.permute.xlu1 %2005  ;;  %v2027_v36 = vsel %vm2026_vm0, %v2024_v52, %v1996_v24  ;;  %vm2520_vm0 = vcmask 957440  }
 0x394   : > { %v2031_v33 = vsel %vm2029_vm1, %v2028_v5, %v2006_v62 }
 0x396   : > { %v2004_v42 = vpop.permute.xlu0 %2003 }
 0x397   : > { %v2014_v21 = vpop.permute.xlu1 %2013  ;;  %v2030_v22 = vsel %vm2029_vm1, %v2027_v36, %v2004_v42  ;;  %vm2430_vm1 = vcmask 951840  }
 0x398   : > { %v2034_v23 = vsel %vm2032_vm2, %v2031_v33, %v2014_v21 }
 0x399   : > { %v2050_v50 = vrot.slane %v2034_v23, %v6177_v10 }
 0x39b   : > { %v2012_v4 = vpop.permute.xlu1 %2011  ;;  %v2055_v6 = vrot.slane %v2050_v50, 7 }
 0x39c   : > { %v2033_v55 = vsel %vm2032_vm2, %v2030_v22, %v2012_v4  ;;  %vm2525_vm2 = vmor %vm2524_vm15, %vm2523_vm14 }
 0x39d   : > { %v2043_v27 = vrot.slane %v2033_v55, %v6177_v10  ;;  %v2243_v9 = vpop.permute.xlu0 %2242 }
 0x39e   : > { %v2244_v56 = vrot.slane %v2243_v9, 6 }
 0x39f   : > { %v2057_v49 = vsel %vm2056_vm3, %v2055_v6, %v2043_v27  ;;  %vm2708_vm3 = vcmask 1042104  }
 0x3a0   : > { %v2059_v63 = vsel %vm2058_vm4, %v2055_v6, %v2057_v49  ;;  %v2246_v39 = vsel %vm2245_vm10, %v2244_v56, %v2243_v9  ;;  %vm2709_vm4 = vcmask 60418  }
 0x3a1   : > { %v2061_v11 = vsel %vm2060_vm5, %v2055_v6, %v2059_v63  ;;  %vm2705_vm5 = vcmask 711680  }
 0x3a2   : > { %v2063_v48 = vsel %vm2062_vm6, %v2055_v6, %v2061_v11  ;;  %vm2615_vm6 = vcmask 705840  }
 0x3a3   : > { %2066 = vst.msk [vmem:[#allocation3] sm:$0x3] %vm2065_vm7, %v2063_v48  ;;  %vm2710_vm7 = vmor %vm2709_vm4, %vm2708_vm3 }
 0x3c5   : > { %v2153_v0 = vpop.permute.xlu1 %2152 }
 0x3c6   : > { %2156 = vst.msk [vmem:[#allocation3] sm:$0x3] %vm2155_vm11, %v2153_v0 }
 0x3c7   : > { %2251 = vst.msk [vmem:[#allocation3] sm:$0xf] %vm2250_vm12, %v2246_v39 }
 0x3dc   : > { %v2518_v25 = vpop.permute.xlu0 %2517 }
 0x3dd   : > { %v2519_v14 = vrot.slane %v2518_v25, 6 }
 0x3df   : > { %v2521_v44 = vsel %vm2520_vm0, %v2519_v14, %v2518_v25 }
 0x3e9   : > { %v2338_v61 = vpop.permute.xlu1 %2337 }
 0x3ea   : > { %2341 = vst.msk [vmem:[#allocation3 + $0x2] sm:$0x3] %vm2340_vm13, %v2338_v61 }
 0x3f0   : > { %v2428_v28 = vpop.permute.xlu0 %2427 }
 0x3f1   : > { %2431 = vst.msk [vmem:[#allocation3 + $0x2] sm:$0x3] %vm2430_vm1, %v2428_v28 }
 0x3f2   : > { %2526 = vst.msk [vmem:[#allocation3 + $0x2] sm:$0xf] %vm2525_vm2, %v2521_v44 }
 0x3f9   : > { %v2703_v8 = vpop.permute.xlu1 %2702 }
 0x3fa   : > { %v2704_v32 = vrot.slane %v2703_v8, 6 }
 0x3fc   : > { %v2706_v59 = vsel %vm2705_vm5, %v2704_v32, %v2703_v8 }
 0x3fd   : > { %v2613_v20 = vpop.permute.xlu0 %2612 }
 0x3fe   : > { %2616 = vst.msk [vmem:[#allocation3 + $0x4] sm:$0x3] %vm2615_vm6, %v2613_v20 }
 0x3ff   : > { %2711 = vst.msk [vmem:[#allocation3 + $0x4] sm:$0xf] %vm2710_vm7, %v2706_v59 }
 0x406   : > { %v2712_v40 = vld [vmem:[#allocation3] sm:$0xff] }
 0x407   : > { %v2714_v2 = vcombine.high %v2712_v40, %v2712_v40  ;;  %v2721_v47 = vrot.slane %v2712_v40, %v6177_v10 }
 0x409   : > { %v2729_v54 = vcombine.high %v2721_v47, %v2721_v47  ;;  %v2728_v18 = vrot.slane %v2714_v2, %v6177_v10  ;;  %v2735_v15 = vpack.c.bf16 %v2721_v47, %v2721_v47 }
 0x40b   : > { %v2736_v13 = vpack.c.bf16 %v2729_v54, %v2729_v54  ;;  %v2730_v16 = vcombine.high %v2728_v18, %v2728_v18  ;;  %v2737_v31 = vpack.c.bf16 %v2728_v18, %v2728_v18 }
 0x40d   : > { %3076 = vmatprep.mubr.bf16.mxu0 %v2736_v13  ;;  %v2738_v58 = vpack.c.bf16 %v2730_v16, %v2730_v16 }
 0x40e   : > { %3077 = vmatmul.mubr.bf16.vlgmr.msra.gmra.mxu0 %v2735_v15 }
 0x40f   : > { %3757 = vmatprep.mubr.msk.bf16.mxu1 %vm3034_vm8, %v2738_v58 }
 0x410   : > { %3118 = vmatmul.mubr.bf16.vlgmr.msra.gmra.mxu1 %v2737_v31 }
 0x4ce   : > { %v3078_v57 = vpop.f32.mrf.mxu0 }
 0x4d0   : > { %v3080_v53 = vpop.f32.mrf.mxu0  ;;  %v3119_v37 = vpop.f32.mrf.mxu1 }
 0x4d1   : > { %v3120_v3 = vadd.f32 %v3119_v37, %v3078_v57 }
 0x4d2   : > { %v3082_v30 = vpop.f32.mrf.mxu0  ;;  %v3121_v17 = vpop.f32.mrf.mxu1 }
 0x4d3   : > { %v3122_v46 = vadd.f32 %v3121_v17, %v3080_v53 }
 0x4d4   : > { %v3083_v34 = vpop.f32.mrf.mxu0  ;;  %v3123_v1 = vpop.f32.mrf.mxu1 }
 0x4d5   : > { %v3128_v12 = vcombine.low %v3120_v3, %v3122_v46 }
 0x4d6   : > { %v3124_v43 = vpop.f32.mrf.mxu1 }
 0x4d7   : > { %v3135_v7 = vrot.slane %v3128_v12, %v6177_v10  ;;  %3142 = sbr.rel (%p3758_p6) target bundleno = 1711 (0x6af), region = 98 }
 0x4d9   : > { %v3137_v41 = vadd.f32 %v3135_v7, %v2739_v38 }
 0x4db   : > { %3138 = vst [vmem:[#allocation2] sm:$0xf] %v3137_v41 }
 0x4dc   : > { %v3995_v51 = vld [vmem:[%s6676_s3 + $0x74] ss:$8 sps:$4 sm:$0xff]   ;;  %v3997_v24 = vld [vmem:[%s6676_s3 + $0x70] ss:$8 sps:$4 sm:$0xff]   ;;  %v3998_v45 = vld [vmem:[%s6676_s3 + $0x64] ss:$8 sps:$4 sm:$0xff]  }
 0x4dd   : > { %3382 = vmatprep.subr.bf16.mxu0 %v3995_v51  ;;  %v4000_v62 = vld [vmem:[%s6676_s3 + $0x60] ss:$8 sps:$4 sm:$0xff]   ;;  %v4001_v29 = vld [vmem:[%s6676_s3 + $0x54] ss:$8 sps:$4 sm:$0xff]   ;;  %v4003_v35 = vld [vmem:[%s6676_s3 + $0x50] ss:$8 sps:$4 sm:$0xff]  }
 0x4de   : > { %3383 = vmatpush1.bf16.msra.mxu0 %v3997_v24  ;;  %v4004_v5 = vld [vmem:[%s6676_s3 + $0x44] ss:$8 sps:$4 sm:$0xff]   ;;  %v4006_v19 = vld [vmem:[%s6676_s3 + $0x40] ss:$8 sps:$4 sm:$0xff]   ;;  %v4007_v33 = vld [vmem:[%s6676_s3 + $0x34] ss:$8 sps:$4 sm:$0xff]  }
 0x4df   : > { %3384 = vmatprep.subr.bf16.mxu0 %v3998_v45  ;;  %v4009_v21 = vld [vmem:[%s6676_s3 + $0x30] ss:$8 sps:$4 sm:$0xff]   ;;  %v4010_v60 = vld [vmem:[%s6676_s3 + $0x24] ss:$8 sps:$4 sm:$0xff]   ;;  %v3148_v42 = vsub.s32 0, %v6160_v26  ;;  %v3152_v23 = vsub.s32 1, %v6160_v26 }
 0x4e0   : > { %v4012_v52 = vld [vmem:[%s6676_s3 + $0x20] ss:$8 sps:$4 sm:$0xff]   ;;  %v4013_v50 = vld [vmem:[%s6676_s3 + $0x14] ss:$8 sps:$4 sm:$0xff]   ;;  %v4015_v36 = vld [vmem:[%s6676_s3 + $0x10] ss:$8 sps:$4 sm:$0xff]  }
 0x4e1   : > { %v3144_v22 = vld [vmem:[%s6675_s2] sm:$0x3]  ;;  %v4016_v4 = vld [vmem:[%s6676_s3 + $0x4] ss:$8 sps:$4 sm:$0xff]   ;;  %v4043_v27 = vld [vmem:[%s6678_s5 + $0x78] sm:$0xff]  }
 0x4e2   : > { %3385 = vmatpush1.bf16.msra.mxu0 %v4000_v62  ;;  %v3149_v55 = vrot.slane %v3144_v22, %v3148_v42  ;;  %v3153_v6 = vrot.slane %v3144_v22, %v3152_v23  ;;  %v3143_v49 = vld [vmem:[#allocation2] sm:$0xf]  ;;  %v4044_v63 = vld [vmem:[%s6678_s5 + $0x38] sm:$0xff]   ;;  %3817 = vmatprep.subr.bf16.mxu1 %v4043_v27  ;;  %v4045_v48 = vld [vmem:[%s6678_s5 + $0x70] sm:$0xff]  }
 0x4e3   : > { %3386 = vmatprep.subr.bf16.mxu0 %v4001_v29  ;;  %3818 = vmatpush3.bf16.msra.mxu1 %v4044_v63  ;;  %v4046_v9 = vld [vmem:[%s6678_s5 + $0x30] sm:$0xff]   ;;  %v4047_v0 = vld [vmem:[%s6678_s5 + $0x68] sm:$0xff]   ;;  %v4049_v44 = vld [vmem:[%s6678_s5 + $0x60] sm:$0xff]  }
 0x4e4   : > { %v3154_v11 = vcombine.low %v3149_v55, %v3153_v6  ;;  %3819 = vmatprep.subr.bf16.mxu1 %v4045_v48  ;;  %v4018_v39 = vld [vmem:[%s6676_s3] ss:$8 sps:$4 sm:$0xff]   ;;  %v4019_v61 = vld [vmem:[%s6676_s3 + $0xf4] ss:$8 sps:$4 sm:$0xff]   ;;  %v4021_v8 = vld [vmem:[%s6676_s3 + $0xf0] ss:$8 sps:$4 sm:$0xff]  }
 0x4e5   : > { %v4048_v14 = vld [vmem:[%s6678_s5 + $0x28] sm:$0xff]   ;;  %v4050_v40 = vld [vmem:[%s6678_s5 + $0x20] sm:$0xff]   ;;  %v4025_v2 = vld [vmem:[%s6676_s3 + $0xd4] ss:$8 sps:$4 sm:$0xff]  }
 0x4e6   : > { %3387 = vmatpush1.bf16.msra.mxu0 %v4003_v35  ;;  %v3161_v56 = vrot.slane %v3154_v11, %v6177_v10  ;;  %v4022_v32 = vld [vmem:[%s6676_s3 + $0xe4] ss:$8 sps:$4 sm:$0xff]   ;;  %v4024_v59 = vld [vmem:[%s6676_s3 + $0xe0] ss:$8 sps:$4 sm:$0xff]   ;;  %v4051_v54 = vld [vmem:[%s6678_s5 + $0x58] sm:$0xff]  }
 0x4e7   : > { %3388 = vmatprep.subr.bf16.mxu0 %v4004_v5  ;;  %3820 = vmatpush3.bf16.msra.mxu1 %v4046_v9  ;;  %v4052_v18 = vld [vmem:[%s6678_s5 + $0x18] sm:$0xff]   ;;  %v4053_v13 = vld [vmem:[%s6678_s5 + $0x50] sm:$0xff]   ;;  %v4028_v15 = vld [vmem:[%s6676_s3 + $0xc4] ss:$8 sps:$4 sm:$0xff]  }
 0x4e8   : > { %v3163_v25 = vadd.f32 %v3161_v56, %v3143_v49  ;;  %3821 = vmatprep.subr.bf16.mxu1 %v4047_v0  ;;  %v4027_v16 = vld [vmem:[%s6676_s3 + $0xd0] ss:$8 sps:$4 sm:$0xff]   ;;  %v4030_v31 = vld [vmem:[%s6676_s3 + $0xc0] ss:$8 sps:$4 sm:$0xff]   ;;  %v4031_v57 = vld [vmem:[%s6676_s3 + $0xb4] ss:$8 sps:$4 sm:$0xff]  }
 0x4e9   : > { %v4054_v58 = vld [vmem:[%s6678_s5 + $0x10] sm:$0xff]   ;;  %v4034_v37 = vld [vmem:[%s6676_s3 + $0xa4] ss:$8 sps:$4 sm:$0xff]   ;;  %v4036_v30 = vld [vmem:[%s6676_s3 + $0xa0] ss:$8 sps:$4 sm:$0xff]  }
 0x4ea   : > { %3389 = vmatpush1.bf16.msra.mxu0 %v4006_v19  ;;  %v3164_v28 = vmax.f32 %v3163_v25, 0.0  ;;  %v4033_v53 = vld [vmem:[%s6676_s3 + $0xb0] ss:$8 sps:$4 sm:$0xff]   ;;  %v4037_v17 = vld [vmem:[%s6676_s3 + $0x94] ss:$8 sps:$4 sm:$0xff]   ;;  %v4055_v12 = vld [vmem:[%s6678_s5 + $0x48] sm:$0xff]  }
 0x4eb   : > { %3390 = vmatprep.subr.bf16.mxu0 %v4007_v33  ;;  %3822 = vmatpush3.bf16.msra.mxu1 %v4048_v14  ;;  %v4039_v3 = vld [vmem:[%s6676_s3 + $0x90] ss:$8 sps:$4 sm:$0xff]   ;;  %v4040_v46 = vld [vmem:[%s6676_s3 + $0x84] ss:$8 sps:$4 sm:$0xff]   ;;  %v4042_v34 = vld [vmem:[%s6676_s3 + $0x80] ss:$8 sps:$4 sm:$0xff]  }
 0x4ec   : > { %v3172_v20 = vrot.slane %v3164_v28, %v6177_v10  ;;  %3823 = vmatprep.subr.bf16.mxu1 %v4049_v44  ;;  %v4056_v38 = vld [vmem:[%s6678_s5 + $0x8] sm:$0xff]   ;;  %v4057_v43 = vld [vmem:[%s6678_s5 + $0x40] sm:$0xff]  }
 0x4ed   : > { %v4058_v7 = vld [vmem:[%s6678_s5] sm:$0xff]  }
 0x4ee   : > { %3391 = vmatpush1.bf16.msra.mxu0 %v4009_v21  ;;  %v3173_v47 = vcombine.high %v3172_v20, %v3172_v20  ;;  %v3176_v1 = vpack.c.bf16 %v3172_v20, %v3172_v20  ;;  %v3210_v41 = vld [vmem:[%s6677_s4] sm:$0x3] }
 0x4ef   : > { %3392 = vmatprep.subr.bf16.mxu0 %v4010_v60  ;;  %3824 = vmatpush3.bf16.msra.mxu1 %v4050_v40  ;;  %v3215_v51 = vrot.slane %v3210_v41, %v3148_v42  ;;  %v3219_v24 = vrot.slane %v3210_v41, %v3152_v23  ;;  %v3791_v42 = vld [vmem:[%s6679_s6] ss:$0 sm:$0xff] }
 0x4f0   : > { %v3177_v10 = vpack.c.bf16 %v3173_v47, %v3173_v47  ;;  %3825 = vmatprep.subr.bf16.mxu1 %v4051_v54 }
 0x4f2   : > { %3393 = vmatpush1.bf16.msra.mxu0 %v4012_v52  ;;  %3414 = vmatprep.mubr.bf16.mxu0 %v3177_v10 }
 0x4f3   : > { %3394 = vmatprep.subr.bf16.mxu0 %v4013_v50  ;;  %3826 = vmatpush3.bf16.msra.mxu1 %v4052_v18 }
 0x4f4   : > { %3827 = vmatprep.subr.bf16.mxu1 %v4053_v13 }
 0x4f6   : > { %3395 = vmatpush1.bf16.msra.mxu0 %v4015_v36 }
 0x4f7   : > { %3396 = vmatprep.subr.bf16.mxu0 %v4016_v4  ;;  %3828 = vmatpush3.bf16.msra.mxu1 %v4054_v58 }
 0x4f8   : > { %3829 = vmatprep.subr.bf16.mxu1 %v4055_v12 }
 0x4fa   : > { %3397 = vmatpush1.bf16.msra.mxu0 %v4018_v39 }
 0x4fb   : > { %3398 = vmatprep.subr.bf16.mxu0 %v4019_v61  ;;  %3830 = vmatpush3.bf16.msra.mxu1 %v4056_v38 }
 0x4fc   : > { %3831 = vmatprep.subr.bf16.mxu1 %v4057_v43 }
 0x4fe   : > { %3399 = vmatpush2.bf16.msra.mxu0 %v4021_v8 }
 0x4ff   : > { %3400 = vmatprep.subr.bf16.mxu0 %v4022_v32  ;;  %3832 = vmatpush3.bf16.msra.mxu1 %v4058_v7 }
 0x502   : > { %3401 = vmatpush2.bf16.msra.mxu0 %v4024_v59 }
 0x503   : > { %3402 = vmatprep.subr.bf16.mxu0 %v4025_v2 }
 0x506   : > { %3403 = vmatpush2.bf16.msra.mxu0 %v4027_v16 }
 0x507   : > { %3404 = vmatprep.subr.bf16.mxu0 %v4028_v15 }
 0x50a   : > { %3405 = vmatpush2.bf16.msra.mxu0 %v4030_v31 }
 0x50b   : > { %3406 = vmatprep.subr.bf16.mxu0 %v4031_v57 }
 0x50e   : > { %3407 = vmatpush2.bf16.msra.mxu0 %v4033_v53 }
 0x50f   : > { %3408 = vmatprep.subr.bf16.mxu0 %v4034_v37 }
 0x512   : > { %3409 = vmatpush2.bf16.msra.mxu0 %v4036_v30 }
 0x513   : > { %3410 = vmatprep.subr.bf16.mxu0 %v4037_v17 }
 0x516   : > { %3411 = vmatpush2.bf16.msra.mxu0 %v4039_v3 }
 0x517   : > { %3412 = vmatprep.subr.bf16.mxu0 %v4040_v46 }
 0x51a   : > { %3413 = vmatpush2.bf16.msra.mxu0 %v4042_v34 }
 0x51d   : > { %3415 = vmatmul.mubr.bf16.vlgmr.msra.gmra.mxu0 %v3176_v1 }
 0x5dd   : > { %v3416_v45 = vpop.f32.mrf.mxu0 }
 0x5de   : > { %v3417_v62 = vadd.f32 %v3416_v45, %v3215_v51 }
 0x5df   : > { %v3418_v29 = vpop.f32.mrf.mxu0 }
 0x5e0   : > { %v3419_v35 = vadd.f32 %v3418_v29, %v3219_v24  ;;  %v3423_v5 = vmax.f32 %v3417_v62, 0.0 }
 0x5e1   : > { %v3420_v19 = vpop.f32.mrf.mxu0 }
 0x5e2   : > { %v3424_v33 = vmax.f32 %v3419_v35, 0.0  ;;  %v3425_v52 = vpack.c.bf16 %v3423_v5, %v3423_v5 }
 0x5e3   : > { %v3421_v21 = vpop.f32.mrf.mxu0 }
 0x5e4   : > { %v3426_v60 = vpack.c.bf16 %v3424_v33, %v3424_v33 }
 0x5e6   : > { %3594 = vmatprep.mubr.bf16.mxu1 %v3426_v60 }
 0x5e7   : > { %3595 = vmatmul.mubr.bf16.vlgmr.msra.gmra.mxu1 %v3425_v52 }
 0x6a7   : > { %v3833_v50 = vpop.f32.mrf.mxu1 }
 0x6a9   : > { %v3834_v36 = vpop.f32.mrf.mxu1 }
 0x6aa   : > { %v3835_v26 = vadd.f32 %v3834_v36, %v3833_v50 }
 0x6ab   : > { %v3836_v23 = vpop.f32.mrf.mxu1 }
 0x6ac   : > { %v3597_v22 = vadd.f32 %v3835_v26, %v3791_v42 }
 0x6ad   : > { %v3837_v4 = vpop.f32.mrf.mxu1 }
 0x6ae   : > { %3602 = vst [vmem:[#allocation8] sm:$0x3] %v3597_v22 }
 0x6af PF: > { %p6640_p7 = scmp.eq.s32.totalorder %s3694_s30, 3  ;;  %s4189_s9 = smov [#allocation8]  }
 0x6b0   : > { %s3612_s27 = sshll.u32 %s4189_s9, 4  ;;  %s3613_s27 = int_to_ptr.vmem [resolvable:$true] %s3612_s27 }
 0x6b1   : > { %s4085_s14 = scalar_lea.vmem %s3613_s27, 32  ;;  %p4092_p11 = scmp.lt.s32.totalorder %s3613_s27, %s3613_s27 }
 0x6b2   : > { %p4086_p8 = scmp.ne.s32.totalorder %s3613_s27, %s4085_s14  ;;  %p4093_p12 = scmp.lt.s32.totalorder %s4085_s14, %s4085_s14 }
 0x6b4   : > { %p4087_p9 = pnand %p4086_p8, %p6640_p7  ;;  %p4094_p13 = por %p4093_p12, %p4092_p11 }
 0x6b6   : > { %p4088_p10 = pneg %p4087_p9 }
 0x6b8   : > { %p4095_p0 = pnand %p4094_p13, %p4088_p10 }
 0x6ba   : > { %4098 = shalt.err (!%p4095_p0)
}
 0x6bb   : > { %3844 = dma.vmem_to_hbm [thread:$0]  (%p6640_p7), %s3613_s27, 32, %s6680_s7, [#allocation7]  }
 0x6bc   : > { %4138 = dma.done.wait (%p6640_p7), [#allocation7], 32  }
 0x6bd   : > { %4140 = vsyncadd (%p6640_p7), [#allocation7], 4294967264 }
 0x6be PF: > { %s21_s29 = sadd.s32 1, %s4163_s29   ;;  %s6802_s24 = smov %s4147_s25 }
 0x6bf   : > { %p18_p1 = scmp.ge.s32.totalorder %s21_s29, 6   ;;  %s6803_s25 = smov %s4151_s26 }
 0x6c0   : > { %s6804_s26 = smov %s4280_s13  ;;  %s6805_s27 = smov %s4159_s28 }
 0x6c1   : > { %s6806_s28 = smov %s6808_s8  ;;  %20 = sbr.rel (!%p18_p1) target bundleno = 5 (0x5), region = 140 }
 0x6c6   :  { %3625 = vsyncpa [#allocation6], 1 }
 0x6c7   :  { %3627 = vsyncpa [#allocation6 + $0x1], 1 }
 0x6c8   :  { %3628 = vsyncpa [#allocation7], 1 }
 0x6c9   :  { %3630 = vsyncpa [#allocation7 + $0x1], 1 }

</bundles_post_ra>
